<compile_context>
chip_gen: v5e
topology: v5e:2x2
jax: 0.10.0
libtpu: 0.0.40
codegen_flags: <defaults>
</compile_context>

<pallas_src>
import math
from functools import partial
from types import SimpleNamespace

import jax
import jax.numpy as jnp
from jax import lax
from jax.experimental import pallas as pl
from jax.experimental.pallas import tpu as pltpu  # noqa: F401  (TPU backend assumed)


# ----------------------------------------------------------------------------
# The single fused kernel
# ----------------------------------------------------------------------------
def _hybrid_kernel(
    # data
    x_bc_ref,     # [B*C, Lp]        raw series, replicate-padded over time, row = (b, c)
    patches_ref,  # [T, patch_len]   normalized patches, rows ordered (p, b, c)
    mu_s_ref,     # [B*C, 1]         w_patchtst * mean  (de-norm with ensemble weight folded)
    sd_s_ref,     # [B*C, 1]         w_patchtst * std
    mask_ref,     # [T, T]           additive block-diagonal attention mask
    pe_ref,       # [T, D]           positional embedding tiled to token rows
    # PatchTST weights
    w_emb_ref,    # [patch_len, D]
    wqkv_ref,     # [E, D, 3D]       packed Q|K|V  (softmax scale pre-folded into Q)
    bqkv_ref,     # [E, 1, 3D]
    wo_ref,       # [E, D, D]
    bo_ref,       # [E, 1, D]
    g1_ref, be1_ref,    # [E, 1, D]
    w1_ref, bff1_ref,   # [E, D, F], [E, 1, F]
    w2_ref, bff2_ref,   # [E, F, D], [E, 1, D]
    g2_ref, be2_ref,    # [E, 1, D]
    gf_ref, bf_ref,     # [1, D]     final encoder LayerNorm
    wh_ref,       # [n_patches, D, P]  flatten-head weight, per-patch slices
    bh_ref,       # [1, P]
    # DLinear (moving-average decomposition + seasonal/trend heads + ensemble weight, fused)
    dlw_ref,      # [Lp, P]
    dlb_ref,      # [1, P]
    # output
    o_ref,        # [B*C, P]
    *, BC, D, H, P, n_patches, e_layers, eps, activation,
):
    f32 = jnp.float32
    Dh = D // H

    def layer_norm(z, g, b):
        # independent reductions: var = E[z^2] - E[z]^2 (no mean->var XLU serialization)
        m = jnp.mean(z, axis=-1, keepdims=True)
        ms = jnp.mean(z * z, axis=-1, keepdims=True)
        return (z - m) * lax.rsqrt(ms - m * m + eps) * g + b

    mask = mask_ref[...]

    # ---------------- PatchTST encoder over the whole [T, D] token slab ---------
    h = jnp.dot(patches_ref[...], w_emb_ref[...], preferred_element_type=f32) + pe_ref[...]

    for l in range(e_layers):
        # packed QKV projection: one [T, D] x [D, 3D] matmul (Q scale pre-folded)
        qkv = jnp.dot(h, wqkv_ref[l], preferred_element_type=f32) + bqkv_ref[l]
        wo = wo_ref[l]
        attn = jnp.zeros_like(h)
        for hh in range(H):
            qh = qkv[:, hh * Dh:(hh + 1) * Dh]
            kh = qkv[:, D + hh * Dh:D + (hh + 1) * Dh]
            vh = qkv[:, 2 * D + hh * Dh:2 * D + (hh + 1) * Dh]
            # block-diagonal (per-(batch, channel) sequence) attention via additive mask
            s = lax.dot_general(qh, kh, (((1,), (1,)), ((), ())),
                                preferred_element_type=f32) + mask
            s = s - jnp.max(s, axis=-1, keepdims=True)
            prob = jnp.exp(s)
            prob = prob * pl.reciprocal(jnp.sum(prob, axis=-1, keepdims=True), approx=True)
            oh = jnp.dot(prob, vh, preferred_element_type=f32)            # [T, Dh]
            # head-concat folded into the output projection (aligned sublane slice of wo)
            attn = attn + jnp.dot(oh, wo[hh * Dh:(hh + 1) * Dh, :],
                                  preferred_element_type=f32)
        attn = attn + bo_ref[l]
        h = layer_norm(h + attn, g1_ref[l], be1_ref[l])                   # norm1(x + attn)

        ff = jnp.dot(h, w1_ref[l], preferred_element_type=f32) + bff1_ref[l]
        if activation == "relu":
            ff = jnp.maximum(ff, 0.0)
        else:
            ff = jax.nn.gelu(ff)
        ff = jnp.dot(ff, w2_ref[l], preferred_element_type=f32) + bff2_ref[l]
        h = layer_norm(h + ff, g2_ref[l], be2_ref[l])                     # norm2(x + ffn)

    h = layer_norm(h, gf_ref[...], bf_ref[...])                           # final encoder LN

    # ---- PatchTST flatten head: (p, b, c) order => contiguous 8-aligned slices ----
    out_pt = jnp.dot(h[0:BC, :], wh_ref[0], preferred_element_type=f32)   # [B*C, P]
    for p in range(1, n_patches):
        out_pt = out_pt + jnp.dot(h[p * BC:(p + 1) * BC, :], wh_ref[p],
                                  preferred_element_type=f32)
    out_pt = out_pt + bh_ref[...]

    # ---- DLinear (fused decomposition), all (b, c) rows in ONE matmul -------------
    out_dl = jnp.dot(x_bc_ref[...], dlw_ref[...], preferred_element_type=f32) + dlb_ref[...]

    # ---- de-normalize PatchTST branch + ensemble (weights pre-folded) -------------
    o_ref[...] = out_dl + out_pt * sd_s_ref[...] + mu_s_ref[...]


# ----------------------------------------------------------------------------
# Parameter initialization (deterministic, synthetic, PyTorch-style layout)
# ----------------------------------------------------------------------------
def positional_embedding(max_len, d_model):
    position = jnp.arange(max_len, dtype=jnp.float32)[:, None]
    div_term = jnp.exp(jnp.arange(0, d_model, 2, dtype=jnp.float32)
                       * -(math.log(10000.0) / d_model))
    pe = jnp.zeros((max_len, d_model), jnp.float32)
    pe = pe.at[:, 0::2].set(jnp.sin(position * div_term))
    pe = pe.at[:, 1::2].set(jnp.cos(position * div_term))
    return pe


def init_params(key, cfg):
    n_p = (cfg.seq_len + cfg.stride - cfg.patch_len) // cfg.stride + 1
    D, F, P, L, E = cfg.d_model, cfg.d_ff, cfg.pred_len, cfg.seq_len, cfg.e_layers
    keys = iter(jax.random.split(key, 32))

    def w(shape):
        return 0.02 * jax.random.normal(next(keys), shape, jnp.float32)

    zeros = lambda s: jnp.zeros(s, jnp.float32)
    ones = lambda s: jnp.ones(s, jnp.float32)

    return {
        # DLinear (channel-shared): Linear(seq_len -> pred_len), seasonal & trend heads
        "dl_ws": w((P, L)), "dl_wt": w((P, L)), "dl_b": zeros((P, 1)),
        # PatchTST patch embedding (bias-free) + sinusoidal positional embedding
        "w_emb": w((cfg.patch_len, D)), "pe": positional_embedding(n_p, D),
        # encoder layers stacked along a leading layer axis; Q/K/V packed into one matmul
        "wqkv": w((E, D, 3 * D)), "bqkv": zeros((E, 1, 3 * D)),
        "wo": w((E, D, D)), "bo": zeros((E, 1, D)),
        "g1": ones((E, 1, D)), "be1": zeros((E, 1, D)),
        "w1": w((E, D, F)), "bff1": zeros((E, 1, F)),
        "w2": w((E, F, D)), "bff2": zeros((E, 1, D)),
        "g2": ones((E, 1, D)), "be2": zeros((E, 1, D)),
        # final encoder LayerNorm
        "gf": ones((1, D)), "bf": zeros((1, D)),
        # flatten head: [P, D*n_patches], PyTorch flat index = d*n_patches + p
        "w_head": w((P, D * n_p)), "b_head": zeros((P, 1)),
    }


# ----------------------------------------------------------------------------
# One-time (outside jit) constant folding: moving-average fold, softmax-scale fold,
# ensemble-weight fold, head-weight reorder, attention mask, tiled positions.
# ----------------------------------------------------------------------------
def make_fused_params(params, cfg, B, w_dlinear=0.5, w_patchtst=0.5):
    C, L, P, D = cfg.enc_in, cfg.seq_len, cfg.pred_len, cfg.d_model
    K = cfg.moving_avg
    pad = (K - 1) // 2
    Lp = L + 2 * pad
    n_p = (L + cfg.stride - cfg.patch_len) // cfg.stride + 1
    BC = B * C
    T = n_p * BC
    scale = 1.0 / math.sqrt(D // cfg.n_heads)
    del w_patchtst  # folded into mu_s/sd_s at forward time

    # fold the softmax scale into the Q block of the packed QKV projection
    wqkv = params["wqkv"].at[:, :, :D].multiply(scale)
    bqkv = params["bqkv"].at[:, :, :D].multiply(scale)

    # fold the moving-average decomposition (and the ensemble weight) into DLinear:
    #   out = ws @ seasonal + wt @ trend = (ws @ C_sel + (wt - ws) @ A_avg) @ x_pad
    rows = jnp.arange(L)
    cols = jnp.arange(Lp)
    c_sel = (cols[None, :] == (rows + pad)[:, None]).astype(jnp.float32)     # [L, Lp]
    off = cols[None, :] - rows[:, None]
    a_avg = ((off >= 0) & (off < K)).astype(jnp.float32) / float(K)          # [L, Lp]
    w_fused = params["dl_ws"] @ c_sel + (params["dl_wt"] - params["dl_ws"]) @ a_avg
    dlw = (w_dlinear * w_fused).T                                            # [Lp, P]
    dlb = (w_dlinear * params["dl_b"]).T                                     # [1, P]

    # flatten-head weight [P, D*n_p] (flat index = d*n_p + p) -> per-patch [n_p, D, P]
    wh = jnp.transpose(params["w_head"].reshape(P, D, n_p), (2, 1, 0))
    bh = params["b_head"].T                                                  # [1, P]

    # token constants for the (patch, batch, channel) row order
    seq_id = jnp.arange(T, dtype=jnp.int32) % BC
    mask = jnp.where(seq_id[:, None] == seq_id[None, :], 0.0, -1e9).astype(jnp.float32)
    pe_tiled = jnp.repeat(params["pe"], BC, axis=0)                          # [T, D]

    fused = {k: params[k] for k in ("w_emb", "wo", "bo", "g1", "be1", "w1", "bff1",
                                    "w2", "bff2", "g2", "be2", "gf", "bf")}
    fused.update(wqkv=wqkv, bqkv=bqkv, dlw=dlw, dlb=dlb, wh=wh, bh=bh,
                 mask=mask, pe=pe_tiled)
    return fused


# ----------------------------------------------------------------------------
# Forward pass: tiny XLA prologue (layout plumbing) + ONE fused grid-free pallas_call
# ----------------------------------------------------------------------------
def hybrid_forward(x, fp, cfg, w_patchtst=0.5):
    B, L, C = x.shape
    P, D, F = cfg.pred_len, cfg.d_model, cfg.d_ff
    # TODO(synk): reshape-based patching assumes non-overlapping patches (stride == patch_len);
    # a gather-based path would be needed for overlapping patches.
    assert cfg.stride == cfg.patch_len
    n_p = (L + cfg.stride - cfg.patch_len) // cfg.stride + 1
    BC = B * C
    T = n_p * BC
    pad = (cfg.moving_avg - 1) // 2
    Lp = L + 2 * pad

    # --- prologue: replicate padding, instance-norm stats, patch reshape ---------
    x_pad = jnp.concatenate(
        [jnp.broadcast_to(x[:, :1, :], (B, pad, C)), x,
         jnp.broadcast_to(x[:, -1:, :], (B, pad, C))], axis=1)               # [B, Lp, C]
    x_bc = x_pad.transpose(0, 2, 1).reshape(BC, Lp)                          # rows (b, c)

    mu = jnp.mean(x, axis=1, keepdims=True)                                  # [B, 1, C]
    sd = jnp.sqrt(jnp.mean(jnp.square(x - mu), axis=1, keepdims=True) + 1e-5)
    x_n = (x - mu) / sd
    # ReplicationPad1d((0, stride)) + unfold(patch_len, stride) == pad-then-reshape
    x_np = jnp.concatenate(
        [x_n, jnp.broadcast_to(x_n[:, -1:, :], (B, cfg.stride, C))], axis=1)
    patches = (x_np.reshape(B, n_p, cfg.patch_len, C)
               .transpose(1, 0, 3, 2)
               .reshape(T, cfg.patch_len))                                   # rows (p, b, c)

    # ensemble weight for the PatchTST branch folded into the de-norm scales
    mu_s = (w_patchtst * mu).transpose(0, 2, 1).reshape(BC, 1)
    sd_s = (w_patchtst * sd).transpose(0, 2, 1).reshape(BC, 1)

    kernel = partial(
        _hybrid_kernel, BC=BC, D=D, H=cfg.n_heads, P=P, n_patches=n_p,
        e_layers=cfg.e_layers, eps=1e-5, activation=cfg.activation)

    operands = (x_bc, patches, mu_s, sd_s, fp["mask"], fp["pe"],
                fp["w_emb"],
                fp["wqkv"], fp["bqkv"], fp["wo"], fp["bo"],
                fp["g1"], fp["be1"], fp["w1"], fp["bff1"],
                fp["w2"], fp["bff2"], fp["g2"], fp["be2"],
                fp["gf"], fp["bf"],
                fp["wh"], fp["bh"], fp["dlw"], fp["dlb"])

    # advisory cost estimate so XLA schedules the call well relative to the prologue
    flops = (2 * T * cfg.patch_len * D
             + cfg.e_layers * (2 * T * D * 3 * D + 4 * T * T * D
                               + 2 * T * D * D + 4 * T * D * F)
             + 2 * T * D * P + 2 * BC * Lp * P)
    transc = cfg.e_layers * cfg.n_heads * T * T
    bytes_accessed = sum(int(a.size) * 4 for a in operands) + BC * P * 4

    # Grid-free pallas_call: every operand is a full-array VMEM-resident block (<100 KB).
    out_bc = pl.pallas_call(
        kernel,
        out_shape=jax.ShapeDtypeStruct((BC, P), jnp.float32),
        cost_estimate=pl.CostEstimate(flops=flops, transcendentals=transc,
                                      bytes_accessed=bytes_accessed),
    )(*operands)

    # [B*C, P] -> [B, P, C]  (epilogue layout plumbing)
    return out_bc.reshape(B, C, P).transpose(0, 2, 1)


# ----------------------------------------------------------------------------
# Main
# ----------------------------------------------------------------------------
if __name__ == "__main__":
    cfg = SimpleNamespace(
        seq_len=16, pred_len=8, enc_in=4, moving_avg=5,
        d_model=32, n_heads=4, e_layers=2, d_ff=64,
        patch_len=4, stride=4, activation="relu",
    )
    key = jax.random.PRNGKey(0)
    k_x, k_p = jax.random.split(key)
    x = jax.random.normal(k_x, (2, cfg.seq_len, cfg.enc_in), jnp.float32)
    params = init_params(k_p, cfg)
    fused = make_fused_params(params, cfg, B=2, w_dlinear=0.5, w_patchtst=0.5)

    fwd = jax.jit(lambda xx: hybrid_forward(xx, fused, cfg, w_patchtst=0.5))
    out = jax.block_until_ready(fwd(x))

    assert out.shape == (2, cfg.pred_len, cfg.enc_in), out.shape
    assert bool(jnp.all(jnp.isfinite(out)))
    print("KERNEL_OK")
</pallas_src>

<mosaic_0001>
module attributes {stable_mosaic.version = 11 : i64} {
  func.func @_hybrid_kernel(%arg0: memref<8x20xf32, #tpu.memory_space<vmem>>, %arg1: memref<40x4xf32, #tpu.memory_space<vmem>>, %arg2: memref<8x1xf32, #tpu.memory_space<vmem>>, %arg3: memref<8x1xf32, #tpu.memory_space<vmem>>, %arg4: memref<40x40xf32, #tpu.memory_space<vmem>>, %arg5: memref<40x32xf32, #tpu.memory_space<vmem>>, %arg6: memref<4x32xf32, #tpu.memory_space<vmem>>, %arg7: memref<2x32x96xf32, #tpu.memory_space<vmem>>, %arg8: memref<2x1x96xf32, #tpu.memory_space<vmem>>, %arg9: memref<2x32x32xf32, #tpu.memory_space<vmem>>, %arg10: memref<2x1x32xf32, #tpu.memory_space<vmem>>, %arg11: memref<2x1x32xf32, #tpu.memory_space<vmem>>, %arg12: memref<2x1x32xf32, #tpu.memory_space<vmem>>, %arg13: memref<2x32x64xf32, #tpu.memory_space<vmem>>, %arg14: memref<2x1x64xf32, #tpu.memory_space<vmem>>, %arg15: memref<2x64x32xf32, #tpu.memory_space<vmem>>, %arg16: memref<2x1x32xf32, #tpu.memory_space<vmem>>, %arg17: memref<2x1x32xf32, #tpu.memory_space<vmem>>, %arg18: memref<2x1x32xf32, #tpu.memory_space<vmem>>, %arg19: memref<1x32xf32, #tpu.memory_space<vmem>>, %arg20: memref<1x32xf32, #tpu.memory_space<vmem>>, %arg21: memref<5x32x8xf32, #tpu.memory_space<vmem>>, %arg22: memref<1x8xf32, #tpu.memory_space<vmem>>, %arg23: memref<20x8xf32, #tpu.memory_space<vmem>>, %arg24: memref<1x8xf32, #tpu.memory_space<vmem>>, %arg25: memref<8x8xf32, #tpu.memory_space<vmem>>) attributes {dimension_semantics = [], scalar_prefetch = 0 : i64, scratch_operands = 0 : i64, tpu.core_type = #tpu.core_type<tc>} {
    %c0 = arith.constant 0 : index
    %c0_0 = arith.constant 0 : index
    %0 = vector.load %arg4[%c0, %c0_0] : memref<40x40xf32, #tpu.memory_space<vmem>>, vector<40x40xf32>
    %c0_1 = arith.constant 0 : index
    %c0_2 = arith.constant 0 : index
    %1 = vector.load %arg1[%c0_1, %c0_2] : memref<40x4xf32, #tpu.memory_space<vmem>>, vector<40x4xf32>
    %c0_3 = arith.constant 0 : index
    %c0_4 = arith.constant 0 : index
    %2 = vector.load %arg6[%c0_3, %c0_4] : memref<4x32xf32, #tpu.memory_space<vmem>>, vector<4x32xf32>
    %cst = arith.constant dense<0.000000e+00> : vector<40x32xf32>
    %3 = tpu.matmul %1, %2, %cst {dimension_numbers = #tpu.dot_dimension_numbers<[1], [0], [0], [1], [0, 0, 1, 1], [], []>} : vector<40x4xf32>, vector<4x32xf32>, vector<40x32xf32> -> vector<40x32xf32>
    %c0_5 = arith.constant 0 : index
    %c0_6 = arith.constant 0 : index
    %4 = vector.load %arg5[%c0_5, %c0_6] : memref<40x32xf32, #tpu.memory_space<vmem>>, vector<40x32xf32>
    %5 = arith.addf %3, %4 : vector<40x32xf32>
    %c0_7 = arith.constant 0 : index
    %c0_8 = arith.constant 0 : index
    %c0_9 = arith.constant 0 : index
    %6 = vector.load %arg7[%c0_7, %c0_8, %c0_9] : memref<2x32x96xf32, #tpu.memory_space<vmem>>, vector<1x32x96xf32>
    %7 = vector.shape_cast %6 : vector<1x32x96xf32> to vector<32x96xf32>
    %cst_10 = arith.constant dense<0.000000e+00> : vector<40x96xf32>
    %8 = tpu.matmul %5, %7, %cst_10 {dimension_numbers = #tpu.dot_dimension_numbers<[1], [0], [0], [1], [0, 0, 1, 1], [], []>} : vector<40x32xf32>, vector<32x96xf32>, vector<40x96xf32> -> vector<40x96xf32>
    %c0_11 = arith.constant 0 : index
    %c0_12 = arith.constant 0 : index
    %c0_13 = arith.constant 0 : index
    %9 = vector.load %arg8[%c0_11, %c0_12, %c0_13] : memref<2x1x96xf32, #tpu.memory_space<vmem>>, vector<1x1x96xf32>
    %10 = vector.shape_cast %9 : vector<1x1x96xf32> to vector<1x96xf32>
    %11 = vector.broadcast %10 : vector<1x96xf32> to vector<40x96xf32>
    %12 = arith.addf %8, %11 : vector<40x96xf32>
    %c0_14 = arith.constant 0 : index
    %c0_15 = arith.constant 0 : index
    %c0_16 = arith.constant 0 : index
    %13 = vector.load %arg9[%c0_14, %c0_15, %c0_16] : memref<2x32x32xf32, #tpu.memory_space<vmem>>, vector<1x32x32xf32>
    %14 = vector.shape_cast %13 : vector<1x32x32xf32> to vector<32x32xf32>
    %cst_17 = arith.constant 0.000000e+00 : f32
    %15 = vector.broadcast %cst_17 : f32 to vector<40x32xf32>
    %16 = vector.extract_strided_slice %12 {offsets = [0, 0], sizes = [40, 8], strides = [1, 1]} : vector<40x96xf32> to vector<40x8xf32>
    %17 = vector.extract_strided_slice %12 {offsets = [0, 32], sizes = [40, 8], strides = [1, 1]} : vector<40x96xf32> to vector<40x8xf32>
    %18 = vector.extract_strided_slice %12 {offsets = [0, 64], sizes = [40, 8], strides = [1, 1]} : vector<40x96xf32> to vector<40x8xf32>
    %cst_18 = arith.constant dense<0.000000e+00> : vector<40x40xf32>
    %19 = tpu.matmul %16, %17, %cst_18 {dimension_numbers = #tpu.dot_dimension_numbers<[1], [1], [0], [0], [0, 0, 1, 0], [], []>} : vector<40x8xf32>, vector<40x8xf32>, vector<40x40xf32> -> vector<40x40xf32>
    %20 = arith.addf %19, %0 : vector<40x40xf32>
    %cst_19 = arith.constant dense<0xFF800000> : vector<40xf32>
    %21 = vector.multi_reduction <maximumf>, %20, %cst_19 [1] : vector<40x40xf32> to vector<40xf32>
    %22 = vector.shape_cast %21 : vector<40xf32> to vector<40x1xf32>
    %23 = vector.broadcast %22 : vector<40x1xf32> to vector<40x40xf32>
    %24 = arith.subf %20, %23 : vector<40x40xf32>
    %25 = math.exp %24 : vector<40x40xf32>
    %cst_20 = arith.constant dense<0.000000e+00> : vector<40xf32>
    %26 = vector.multi_reduction <add>, %25, %cst_20 [1] : vector<40x40xf32> to vector<40xf32>
    %27 = vector.shape_cast %26 : vector<40xf32> to vector<40x1xf32>
    %28 = tpu.reciprocal %27 {approx = true} : vector<40x1xf32> -> vector<40x1xf32>
    %29 = vector.broadcast %28 : vector<40x1xf32> to vector<40x40xf32>
    %30 = arith.mulf %25, %29 : vector<40x40xf32>
    %cst_21 = arith.constant dense<0.000000e+00> : vector<40x8xf32>
    %31 = tpu.matmul %30, %18, %cst_21 {dimension_numbers = #tpu.dot_dimension_numbers<[1], [0], [0], [1], [0, 0, 1, 1], [], []>} : vector<40x40xf32>, vector<40x8xf32>, vector<40x8xf32> -> vector<40x8xf32>
    %32 = vector.extract_strided_slice %14 {offsets = [0, 0], sizes = [8, 32], strides = [1, 1]} : vector<32x32xf32> to vector<8x32xf32>
    %cst_22 = arith.constant dense<0.000000e+00> : vector<40x32xf32>
    %33 = tpu.matmul %31, %32, %cst_22 {dimension_numbers = #tpu.dot_dimension_numbers<[1], [0], [0], [1], [0, 0, 1, 1], [], []>} : vector<40x8xf32>, vector<8x32xf32>, vector<40x32xf32> -> vector<40x32xf32>
    %34 = arith.addf %15, %33 : vector<40x32xf32>
    %35 = vector.extract_strided_slice %12 {offsets = [0, 8], sizes = [40, 8], strides = [1, 1]} : vector<40x96xf32> to vector<40x8xf32>
    %36 = vector.extract_strided_slice %12 {offsets = [0, 40], sizes = [40, 8], strides = [1, 1]} : vector<40x96xf32> to vector<40x8xf32>
    %37 = vector.extract_strided_slice %12 {offsets = [0, 72], sizes = [40, 8], strides = [1, 1]} : vector<40x96xf32> to vector<40x8xf32>
    %cst_23 = arith.constant dense<0.000000e+00> : vector<40x40xf32>
    %38 = tpu.matmul %35, %36, %cst_23 {dimension_numbers = #tpu.dot_dimension_numbers<[1], [1], [0], [0], [0, 0, 1, 0], [], []>} : vector<40x8xf32>, vector<40x8xf32>, vector<40x40xf32> -> vector<40x40xf32>
    %39 = arith.addf %38, %0 : vector<40x40xf32>
    %cst_24 = arith.constant dense<0xFF800000> : vector<40xf32>
    %40 = vector.multi_reduction <maximumf>, %39, %cst_24 [1] : vector<40x40xf32> to vector<40xf32>
    %41 = vector.shape_cast %40 : vector<40xf32> to vector<40x1xf32>
    %42 = vector.broadcast %41 : vector<40x1xf32> to vector<40x40xf32>
    %43 = arith.subf %39, %42 : vector<40x40xf32>
    %44 = math.exp %43 : vector<40x40xf32>
    %cst_25 = arith.constant dense<0.000000e+00> : vector<40xf32>
    %45 = vector.multi_reduction <add>, %44, %cst_25 [1] : vector<40x40xf32> to vector<40xf32>
    %46 = vector.shape_cast %45 : vector<40xf32> to vector<40x1xf32>
    %47 = tpu.reciprocal %46 {approx = true} : vector<40x1xf32> -> vector<40x1xf32>
    %48 = vector.broadcast %47 : vector<40x1xf32> to vector<40x40xf32>
    %49 = arith.mulf %44, %48 : vector<40x40xf32>
    %cst_26 = arith.constant dense<0.000000e+00> : vector<40x8xf32>
    %50 = tpu.matmul %49, %37, %cst_26 {dimension_numbers = #tpu.dot_dimension_numbers<[1], [0], [0], [1], [0, 0, 1, 1], [], []>} : vector<40x40xf32>, vector<40x8xf32>, vector<40x8xf32> -> vector<40x8xf32>
    %51 = vector.extract_strided_slice %14 {offsets = [8, 0], sizes = [8, 32], strides = [1, 1]} : vector<32x32xf32> to vector<8x32xf32>
    %cst_27 = arith.constant dense<0.000000e+00> : vector<40x32xf32>
    %52 = tpu.matmul %50, %51, %cst_27 {dimension_numbers = #tpu.dot_dimension_numbers<[1], [0], [0], [1], [0, 0, 1, 1], [], []>} : vector<40x8xf32>, vector<8x32xf32>, vector<40x32xf32> -> vector<40x32xf32>
    %53 = arith.addf %34, %52 : vector<40x32xf32>
    %54 = vector.extract_strided_slice %12 {offsets = [0, 16], sizes = [40, 8], strides = [1, 1]} : vector<40x96xf32> to vector<40x8xf32>
    %55 = vector.extract_strided_slice %12 {offsets = [0, 48], sizes = [40, 8], strides = [1, 1]} : vector<40x96xf32> to vector<40x8xf32>
    %56 = vector.extract_strided_slice %12 {offsets = [0, 80], sizes = [40, 8], strides = [1, 1]} : vector<40x96xf32> to vector<40x8xf32>
    %cst_28 = arith.constant dense<0.000000e+00> : vector<40x40xf32>
    %57 = tpu.matmul %54, %55, %cst_28 {dimension_numbers = #tpu.dot_dimension_numbers<[1], [1], [0], [0], [0, 0, 1, 0], [], []>} : vector<40x8xf32>, vector<40x8xf32>, vector<40x40xf32> -> vector<40x40xf32>
    %58 = arith.addf %57, %0 : vector<40x40xf32>
    %cst_29 = arith.constant dense<0xFF800000> : vector<40xf32>
    %59 = vector.multi_reduction <maximumf>, %58, %cst_29 [1] : vector<40x40xf32> to vector<40xf32>
    %60 = vector.shape_cast %59 : vector<40xf32> to vector<40x1xf32>
    %61 = vector.broadcast %60 : vector<40x1xf32> to vector<40x40xf32>
    %62 = arith.subf %58, %61 : vector<40x40xf32>
    %63 = math.exp %62 : vector<40x40xf32>
    %cst_30 = arith.constant dense<0.000000e+00> : vector<40xf32>
    %64 = vector.multi_reduction <add>, %63, %cst_30 [1] : vector<40x40xf32> to vector<40xf32>
    %65 = vector.shape_cast %64 : vector<40xf32> to vector<40x1xf32>
    %66 = tpu.reciprocal %65 {approx = true} : vector<40x1xf32> -> vector<40x1xf32>
    %67 = vector.broadcast %66 : vector<40x1xf32> to vector<40x40xf32>
    %68 = arith.mulf %63, %67 : vector<40x40xf32>
    %cst_31 = arith.constant dense<0.000000e+00> : vector<40x8xf32>
    %69 = tpu.matmul %68, %56, %cst_31 {dimension_numbers = #tpu.dot_dimension_numbers<[1], [0], [0], [1], [0, 0, 1, 1], [], []>} : vector<40x40xf32>, vector<40x8xf32>, vector<40x8xf32> -> vector<40x8xf32>
    %70 = vector.extract_strided_slice %14 {offsets = [16, 0], sizes = [8, 32], strides = [1, 1]} : vector<32x32xf32> to vector<8x32xf32>
    %cst_32 = arith.constant dense<0.000000e+00> : vector<40x32xf32>
    %71 = tpu.matmul %69, %70, %cst_32 {dimension_numbers = #tpu.dot_dimension_numbers<[1], [0], [0], [1], [0, 0, 1, 1], [], []>} : vector<40x8xf32>, vector<8x32xf32>, vector<40x32xf32> -> vector<40x32xf32>
    %72 = arith.addf %53, %71 : vector<40x32xf32>
    %73 = vector.extract_strided_slice %12 {offsets = [0, 24], sizes = [40, 8], strides = [1, 1]} : vector<40x96xf32> to vector<40x8xf32>
    %74 = vector.extract_strided_slice %12 {offsets = [0, 56], sizes = [40, 8], strides = [1, 1]} : vector<40x96xf32> to vector<40x8xf32>
    %75 = vector.extract_strided_slice %12 {offsets = [0, 88], sizes = [40, 8], strides = [1, 1]} : vector<40x96xf32> to vector<40x8xf32>
    %cst_33 = arith.constant dense<0.000000e+00> : vector<40x40xf32>
    %76 = tpu.matmul %73, %74, %cst_33 {dimension_numbers = #tpu.dot_dimension_numbers<[1], [1], [0], [0], [0, 0, 1, 0], [], []>} : vector<40x8xf32>, vector<40x8xf32>, vector<40x40xf32> -> vector<40x40xf32>
    %77 = arith.addf %76, %0 : vector<40x40xf32>
    %cst_34 = arith.constant dense<0xFF800000> : vector<40xf32>
    %78 = vector.multi_reduction <maximumf>, %77, %cst_34 [1] : vector<40x40xf32> to vector<40xf32>
    %79 = vector.shape_cast %78 : vector<40xf32> to vector<40x1xf32>
    %80 = vector.broadcast %79 : vector<40x1xf32> to vector<40x40xf32>
    %81 = arith.subf %77, %80 : vector<40x40xf32>
    %82 = math.exp %81 : vector<40x40xf32>
    %cst_35 = arith.constant dense<0.000000e+00> : vector<40xf32>
    %83 = vector.multi_reduction <add>, %82, %cst_35 [1] : vector<40x40xf32> to vector<40xf32>
    %84 = vector.shape_cast %83 : vector<40xf32> to vector<40x1xf32>
    %85 = tpu.reciprocal %84 {approx = true} : vector<40x1xf32> -> vector<40x1xf32>
    %86 = vector.broadcast %85 : vector<40x1xf32> to vector<40x40xf32>
    %87 = arith.mulf %82, %86 : vector<40x40xf32>
    %cst_36 = arith.constant dense<0.000000e+00> : vector<40x8xf32>
    %88 = tpu.matmul %87, %75, %cst_36 {dimension_numbers = #tpu.dot_dimension_numbers<[1], [0], [0], [1], [0, 0, 1, 1], [], []>} : vector<40x40xf32>, vector<40x8xf32>, vector<40x8xf32> -> vector<40x8xf32>
    %89 = vector.extract_strided_slice %14 {offsets = [24, 0], sizes = [8, 32], strides = [1, 1]} : vector<32x32xf32> to vector<8x32xf32>
    %cst_37 = arith.constant dense<0.000000e+00> : vector<40x32xf32>
    %90 = tpu.matmul %88, %89, %cst_37 {dimension_numbers = #tpu.dot_dimension_numbers<[1], [0], [0], [1], [0, 0, 1, 1], [], []>} : vector<40x8xf32>, vector<8x32xf32>, vector<40x32xf32> -> vector<40x32xf32>
    %91 = arith.addf %72, %90 : vector<40x32xf32>
    %c0_38 = arith.constant 0 : index
    %c0_39 = arith.constant 0 : index
    %c0_40 = arith.constant 0 : index
    %92 = vector.load %arg10[%c0_38, %c0_39, %c0_40] : memref<2x1x32xf32, #tpu.memory_space<vmem>>, vector<1x1x32xf32>
    %93 = vector.shape_cast %92 : vector<1x1x32xf32> to vector<1x32xf32>
    %94 = vector.broadcast %93 : vector<1x32xf32> to vector<40x32xf32>
    %95 = arith.addf %91, %94 : vector<40x32xf32>
    %96 = arith.addf %5, %95 : vector<40x32xf32>
    %c0_41 = arith.constant 0 : index
    %c0_42 = arith.constant 0 : index
    %c0_43 = arith.constant 0 : index
    %97 = vector.load %arg11[%c0_41, %c0_42, %c0_43] : memref<2x1x32xf32, #tpu.memory_space<vmem>>, vector<1x1x32xf32>
    %98 = vector.shape_cast %97 : vector<1x1x32xf32> to vector<1x32xf32>
    %c0_44 = arith.constant 0 : index
    %c0_45 = arith.constant 0 : index
    %c0_46 = arith.constant 0 : index
    %99 = vector.load %arg12[%c0_44, %c0_45, %c0_46] : memref<2x1x32xf32, #tpu.memory_space<vmem>>, vector<1x1x32xf32>
    %100 = vector.shape_cast %99 : vector<1x1x32xf32> to vector<1x32xf32>
    %cst_47 = arith.constant dense<0.000000e+00> : vector<40xf32>
    %101 = vector.multi_reduction <add>, %96, %cst_47 [1] : vector<40x32xf32> to vector<40xf32>
    %102 = vector.shape_cast %101 : vector<40xf32> to vector<40x1xf32>
    %cst_48 = arith.constant 3.200000e+01 : f32
    %103 = vector.broadcast %cst_48 : f32 to vector<40x1xf32>
    %104 = arith.divf %102, %103 : vector<40x1xf32>
    %105 = arith.mulf %96, %96 : vector<40x32xf32>
    %cst_49 = arith.constant dense<0.000000e+00> : vector<40xf32>
    %106 = vector.multi_reduction <add>, %105, %cst_49 [1] : vector<40x32xf32> to vector<40xf32>
    %107 = vector.shape_cast %106 : vector<40xf32> to vector<40x1xf32>
    %cst_50 = arith.constant 3.200000e+01 : f32
    %108 = vector.broadcast %cst_50 : f32 to vector<40x1xf32>
    %109 = arith.divf %107, %108 : vector<40x1xf32>
    %110 = vector.broadcast %104 : vector<40x1xf32> to vector<40x32xf32>
    %111 = arith.subf %96, %110 : vector<40x32xf32>
    %112 = arith.mulf %104, %104 : vector<40x1xf32>
    %113 = arith.subf %109, %112 : vector<40x1xf32>
    %cst_51 = arith.constant 9.99999974E-6 : f32
    %114 = vector.broadcast %cst_51 : f32 to vector<40x1xf32>
    %115 = arith.addf %113, %114 : vector<40x1xf32>
    %116 = math.rsqrt %115 : vector<40x1xf32>
    %117 = vector.broadcast %116 : vector<40x1xf32> to vector<40x32xf32>
    %118 = arith.mulf %111, %117 : vector<40x32xf32>
    %119 = vector.broadcast %98 : vector<1x32xf32> to vector<40x32xf32>
    %120 = arith.mulf %118, %119 : vector<40x32xf32>
    %121 = vector.broadcast %100 : vector<1x32xf32> to vector<40x32xf32>
    %122 = arith.addf %120, %121 : vector<40x32xf32>
    %c0_52 = arith.constant 0 : index
    %c0_53 = arith.constant 0 : index
    %c0_54 = arith.constant 0 : index
    %123 = vector.load %arg13[%c0_52, %c0_53, %c0_54] : memref<2x32x64xf32, #tpu.memory_space<vmem>>, vector<1x32x64xf32>
    %124 = vector.shape_cast %123 : vector<1x32x64xf32> to vector<32x64xf32>
    %cst_55 = arith.constant dense<0.000000e+00> : vector<40x64xf32>
    %125 = tpu.matmul %122, %124, %cst_55 {dimension_numbers = #tpu.dot_dimension_numbers<[1], [0], [0], [1], [0, 0, 1, 1], [], []>} : vector<40x32xf32>, vector<32x64xf32>, vector<40x64xf32> -> vector<40x64xf32>
    %c0_56 = arith.constant 0 : index
    %c0_57 = arith.constant 0 : index
    %c0_58 = arith.constant 0 : index
    %126 = vector.load %arg14[%c0_56, %c0_57, %c0_58] : memref<2x1x64xf32, #tpu.memory_space<vmem>>, vector<1x1x64xf32>
    %127 = vector.shape_cast %126 : vector<1x1x64xf32> to vector<1x64xf32>
    %128 = vector.broadcast %127 : vector<1x64xf32> to vector<40x64xf32>
    %129 = arith.addf %125, %128 : vector<40x64xf32>
    %cst_59 = arith.constant 0.000000e+00 : f32
    %130 = vector.broadcast %cst_59 : f32 to vector<40x64xf32>
    %131 = arith.maximumf %129, %130 : vector<40x64xf32>
    %c0_60 = arith.constant 0 : index
    %c0_61 = arith.constant 0 : index
    %c0_62 = arith.constant 0 : index
    %132 = vector.load %arg15[%c0_60, %c0_61, %c0_62] : memref<2x64x32xf32, #tpu.memory_space<vmem>>, vector<1x64x32xf32>
    %133 = vector.shape_cast %132 : vector<1x64x32xf32> to vector<64x32xf32>
    %cst_63 = arith.constant dense<0.000000e+00> : vector<40x32xf32>
    %134 = tpu.matmul %131, %133, %cst_63 {dimension_numbers = #tpu.dot_dimension_numbers<[1], [0], [0], [1], [0, 0, 1, 1], [], []>} : vector<40x64xf32>, vector<64x32xf32>, vector<40x32xf32> -> vector<40x32xf32>
    %c0_64 = arith.constant 0 : index
    %c0_65 = arith.constant 0 : index
    %c0_66 = arith.constant 0 : index
    %135 = vector.load %arg16[%c0_64, %c0_65, %c0_66] : memref<2x1x32xf32, #tpu.memory_space<vmem>>, vector<1x1x32xf32>
    %136 = vector.shape_cast %135 : vector<1x1x32xf32> to vector<1x32xf32>
    %137 = vector.broadcast %136 : vector<1x32xf32> to vector<40x32xf32>
    %138 = arith.addf %134, %137 : vector<40x32xf32>
    %139 = arith.addf %122, %138 : vector<40x32xf32>
    %c0_67 = arith.constant 0 : index
    %c0_68 = arith.constant 0 : index
    %c0_69 = arith.constant 0 : index
    %140 = vector.load %arg17[%c0_67, %c0_68, %c0_69] : memref<2x1x32xf32, #tpu.memory_space<vmem>>, vector<1x1x32xf32>
    %141 = vector.shape_cast %140 : vector<1x1x32xf32> to vector<1x32xf32>
    %c0_70 = arith.constant 0 : index
    %c0_71 = arith.constant 0 : index
    %c0_72 = arith.constant 0 : index
    %142 = vector.load %arg18[%c0_70, %c0_71, %c0_72] : memref<2x1x32xf32, #tpu.memory_space<vmem>>, vector<1x1x32xf32>
    %143 = vector.shape_cast %142 : vector<1x1x32xf32> to vector<1x32xf32>
    %cst_73 = arith.constant dense<0.000000e+00> : vector<40xf32>
    %144 = vector.multi_reduction <add>, %139, %cst_73 [1] : vector<40x32xf32> to vector<40xf32>
    %145 = vector.shape_cast %144 : vector<40xf32> to vector<40x1xf32>
    %cst_74 = arith.constant 3.200000e+01 : f32
    %146 = vector.broadcast %cst_74 : f32 to vector<40x1xf32>
    %147 = arith.divf %145, %146 : vector<40x1xf32>
    %148 = arith.mulf %139, %139 : vector<40x32xf32>
    %cst_75 = arith.constant dense<0.000000e+00> : vector<40xf32>
    %149 = vector.multi_reduction <add>, %148, %cst_75 [1] : vector<40x32xf32> to vector<40xf32>
    %150 = vector.shape_cast %149 : vector<40xf32> to vector<40x1xf32>
    %cst_76 = arith.constant 3.200000e+01 : f32
    %151 = vector.broadcast %cst_76 : f32 to vector<40x1xf32>
    %152 = arith.divf %150, %151 : vector<40x1xf32>
    %153 = vector.broadcast %147 : vector<40x1xf32> to vector<40x32xf32>
    %154 = arith.subf %139, %153 : vector<40x32xf32>
    %155 = arith.mulf %147, %147 : vector<40x1xf32>
    %156 = arith.subf %152, %155 : vector<40x1xf32>
    %cst_77 = arith.constant 9.99999974E-6 : f32
    %157 = vector.broadcast %cst_77 : f32 to vector<40x1xf32>
    %158 = arith.addf %156, %157 : vector<40x1xf32>
    %159 = math.rsqrt %158 : vector<40x1xf32>
    %160 = vector.broadcast %159 : vector<40x1xf32> to vector<40x32xf32>
    %161 = arith.mulf %154, %160 : vector<40x32xf32>
    %162 = vector.broadcast %141 : vector<1x32xf32> to vector<40x32xf32>
    %163 = arith.mulf %161, %162 : vector<40x32xf32>
    %164 = vector.broadcast %143 : vector<1x32xf32> to vector<40x32xf32>
    %165 = arith.addf %163, %164 : vector<40x32xf32>
    %c1 = arith.constant 1 : index
    %c0_78 = arith.constant 0 : index
    %c0_79 = arith.constant 0 : index
    %166 = vector.load %arg7[%c1, %c0_78, %c0_79] : memref<2x32x96xf32, #tpu.memory_space<vmem>>, vector<1x32x96xf32>
    %167 = vector.shape_cast %166 : vector<1x32x96xf32> to vector<32x96xf32>
    %cst_80 = arith.constant dense<0.000000e+00> : vector<40x96xf32>
    %168 = tpu.matmul %165, %167, %cst_80 {dimension_numbers = #tpu.dot_dimension_numbers<[1], [0], [0], [1], [0, 0, 1, 1], [], []>} : vector<40x32xf32>, vector<32x96xf32>, vector<40x96xf32> -> vector<40x96xf32>
    %c1_81 = arith.constant 1 : index
    %c0_82 = arith.constant 0 : index
    %c0_83 = arith.constant 0 : index
    %169 = vector.load %arg8[%c1_81, %c0_82, %c0_83] : memref<2x1x96xf32, #tpu.memory_space<vmem>>, vector<1x1x96xf32>
    %170 = vector.shape_cast %169 : vector<1x1x96xf32> to vector<1x96xf32>
    %171 = vector.broadcast %170 : vector<1x96xf32> to vector<40x96xf32>
    %172 = arith.addf %168, %171 : vector<40x96xf32>
    %c1_84 = arith.constant 1 : index
    %c0_85 = arith.constant 0 : index
    %c0_86 = arith.constant 0 : index
    %173 = vector.load %arg9[%c1_84, %c0_85, %c0_86] : memref<2x32x32xf32, #tpu.memory_space<vmem>>, vector<1x32x32xf32>
    %174 = vector.shape_cast %173 : vector<1x32x32xf32> to vector<32x32xf32>
    %cst_87 = arith.constant 0.000000e+00 : f32
    %175 = vector.broadcast %cst_87 : f32 to vector<40x32xf32>
    %176 = vector.extract_strided_slice %172 {offsets = [0, 0], sizes = [40, 8], strides = [1, 1]} : vector<40x96xf32> to vector<40x8xf32>
    %177 = vector.extract_strided_slice %172 {offsets = [0, 32], sizes = [40, 8], strides = [1, 1]} : vector<40x96xf32> to vector<40x8xf32>
    %178 = vector.extract_strided_slice %172 {offsets = [0, 64], sizes = [40, 8], strides = [1, 1]} : vector<40x96xf32> to vector<40x8xf32>
    %cst_88 = arith.constant dense<0.000000e+00> : vector<40x40xf32>
    %179 = tpu.matmul %176, %177, %cst_88 {dimension_numbers = #tpu.dot_dimension_numbers<[1], [1], [0], [0], [0, 0, 1, 0], [], []>} : vector<40x8xf32>, vector<40x8xf32>, vector<40x40xf32> -> vector<40x40xf32>
    %180 = arith.addf %179, %0 : vector<40x40xf32>
    %cst_89 = arith.constant dense<0xFF800000> : vector<40xf32>
    %181 = vector.multi_reduction <maximumf>, %180, %cst_89 [1] : vector<40x40xf32> to vector<40xf32>
    %182 = vector.shape_cast %181 : vector<40xf32> to vector<40x1xf32>
    %183 = vector.broadcast %182 : vector<40x1xf32> to vector<40x40xf32>
    %184 = arith.subf %180, %183 : vector<40x40xf32>
    %185 = math.exp %184 : vector<40x40xf32>
    %cst_90 = arith.constant dense<0.000000e+00> : vector<40xf32>
    %186 = vector.multi_reduction <add>, %185, %cst_90 [1] : vector<40x40xf32> to vector<40xf32>
    %187 = vector.shape_cast %186 : vector<40xf32> to vector<40x1xf32>
    %188 = tpu.reciprocal %187 {approx = true} : vector<40x1xf32> -> vector<40x1xf32>
    %189 = vector.broadcast %188 : vector<40x1xf32> to vector<40x40xf32>
    %190 = arith.mulf %185, %189 : vector<40x40xf32>
    %cst_91 = arith.constant dense<0.000000e+00> : vector<40x8xf32>
    %191 = tpu.matmul %190, %178, %cst_91 {dimension_numbers = #tpu.dot_dimension_numbers<[1], [0], [0], [1], [0, 0, 1, 1], [], []>} : vector<40x40xf32>, vector<40x8xf32>, vector<40x8xf32> -> vector<40x8xf32>
    %192 = vector.extract_strided_slice %174 {offsets = [0, 0], sizes = [8, 32], strides = [1, 1]} : vector<32x32xf32> to vector<8x32xf32>
    %cst_92 = arith.constant dense<0.000000e+00> : vector<40x32xf32>
    %193 = tpu.matmul %191, %192, %cst_92 {dimension_numbers = #tpu.dot_dimension_numbers<[1], [0], [0], [1], [0, 0, 1, 1], [], []>} : vector<40x8xf32>, vector<8x32xf32>, vector<40x32xf32> -> vector<40x32xf32>
    %194 = arith.addf %175, %193 : vector<40x32xf32>
    %195 = vector.extract_strided_slice %172 {offsets = [0, 8], sizes = [40, 8], strides = [1, 1]} : vector<40x96xf32> to vector<40x8xf32>
    %196 = vector.extract_strided_slice %172 {offsets = [0, 40], sizes = [40, 8], strides = [1, 1]} : vector<40x96xf32> to vector<40x8xf32>
    %197 = vector.extract_strided_slice %172 {offsets = [0, 72], sizes = [40, 8], strides = [1, 1]} : vector<40x96xf32> to vector<40x8xf32>
    %cst_93 = arith.constant dense<0.000000e+00> : vector<40x40xf32>
    %198 = tpu.matmul %195, %196, %cst_93 {dimension_numbers = #tpu.dot_dimension_numbers<[1], [1], [0], [0], [0, 0, 1, 0], [], []>} : vector<40x8xf32>, vector<40x8xf32>, vector<40x40xf32> -> vector<40x40xf32>
    %199 = arith.addf %198, %0 : vector<40x40xf32>
    %cst_94 = arith.constant dense<0xFF800000> : vector<40xf32>
    %200 = vector.multi_reduction <maximumf>, %199, %cst_94 [1] : vector<40x40xf32> to vector<40xf32>
    %201 = vector.shape_cast %200 : vector<40xf32> to vector<40x1xf32>
    %202 = vector.broadcast %201 : vector<40x1xf32> to vector<40x40xf32>
    %203 = arith.subf %199, %202 : vector<40x40xf32>
    %204 = math.exp %203 : vector<40x40xf32>
    %cst_95 = arith.constant dense<0.000000e+00> : vector<40xf32>
    %205 = vector.multi_reduction <add>, %204, %cst_95 [1] : vector<40x40xf32> to vector<40xf32>
    %206 = vector.shape_cast %205 : vector<40xf32> to vector<40x1xf32>
    %207 = tpu.reciprocal %206 {approx = true} : vector<40x1xf32> -> vector<40x1xf32>
    %208 = vector.broadcast %207 : vector<40x1xf32> to vector<40x40xf32>
    %209 = arith.mulf %204, %208 : vector<40x40xf32>
    %cst_96 = arith.constant dense<0.000000e+00> : vector<40x8xf32>
    %210 = tpu.matmul %209, %197, %cst_96 {dimension_numbers = #tpu.dot_dimension_numbers<[1], [0], [0], [1], [0, 0, 1, 1], [], []>} : vector<40x40xf32>, vector<40x8xf32>, vector<40x8xf32> -> vector<40x8xf32>
    %211 = vector.extract_strided_slice %174 {offsets = [8, 0], sizes = [8, 32], strides = [1, 1]} : vector<32x32xf32> to vector<8x32xf32>
    %cst_97 = arith.constant dense<0.000000e+00> : vector<40x32xf32>
    %212 = tpu.matmul %210, %211, %cst_97 {dimension_numbers = #tpu.dot_dimension_numbers<[1], [0], [0], [1], [0, 0, 1, 1], [], []>} : vector<40x8xf32>, vector<8x32xf32>, vector<40x32xf32> -> vector<40x32xf32>
    %213 = arith.addf %194, %212 : vector<40x32xf32>
    %214 = vector.extract_strided_slice %172 {offsets = [0, 16], sizes = [40, 8], strides = [1, 1]} : vector<40x96xf32> to vector<40x8xf32>
    %215 = vector.extract_strided_slice %172 {offsets = [0, 48], sizes = [40, 8], strides = [1, 1]} : vector<40x96xf32> to vector<40x8xf32>
    %216 = vector.extract_strided_slice %172 {offsets = [0, 80], sizes = [40, 8], strides = [1, 1]} : vector<40x96xf32> to vector<40x8xf32>
    %cst_98 = arith.constant dense<0.000000e+00> : vector<40x40xf32>
    %217 = tpu.matmul %214, %215, %cst_98 {dimension_numbers = #tpu.dot_dimension_numbers<[1], [1], [0], [0], [0, 0, 1, 0], [], []>} : vector<40x8xf32>, vector<40x8xf32>, vector<40x40xf32> -> vector<40x40xf32>
    %218 = arith.addf %217, %0 : vector<40x40xf32>
    %cst_99 = arith.constant dense<0xFF800000> : vector<40xf32>
    %219 = vector.multi_reduction <maximumf>, %218, %cst_99 [1] : vector<40x40xf32> to vector<40xf32>
    %220 = vector.shape_cast %219 : vector<40xf32> to vector<40x1xf32>
    %221 = vector.broadcast %220 : vector<40x1xf32> to vector<40x40xf32>
    %222 = arith.subf %218, %221 : vector<40x40xf32>
    %223 = math.exp %222 : vector<40x40xf32>
    %cst_100 = arith.constant dense<0.000000e+00> : vector<40xf32>
    %224 = vector.multi_reduction <add>, %223, %cst_100 [1] : vector<40x40xf32> to vector<40xf32>
    %225 = vector.shape_cast %224 : vector<40xf32> to vector<40x1xf32>
    %226 = tpu.reciprocal %225 {approx = true} : vector<40x1xf32> -> vector<40x1xf32>
    %227 = vector.broadcast %226 : vector<40x1xf32> to vector<40x40xf32>
    %228 = arith.mulf %223, %227 : vector<40x40xf32>
    %cst_101 = arith.constant dense<0.000000e+00> : vector<40x8xf32>
    %229 = tpu.matmul %228, %216, %cst_101 {dimension_numbers = #tpu.dot_dimension_numbers<[1], [0], [0], [1], [0, 0, 1, 1], [], []>} : vector<40x40xf32>, vector<40x8xf32>, vector<40x8xf32> -> vector<40x8xf32>
    %230 = vector.extract_strided_slice %174 {offsets = [16, 0], sizes = [8, 32], strides = [1, 1]} : vector<32x32xf32> to vector<8x32xf32>
    %cst_102 = arith.constant dense<0.000000e+00> : vector<40x32xf32>
    %231 = tpu.matmul %229, %230, %cst_102 {dimension_numbers = #tpu.dot_dimension_numbers<[1], [0], [0], [1], [0, 0, 1, 1], [], []>} : vector<40x8xf32>, vector<8x32xf32>, vector<40x32xf32> -> vector<40x32xf32>
    %232 = arith.addf %213, %231 : vector<40x32xf32>
    %233 = vector.extract_strided_slice %172 {offsets = [0, 24], sizes = [40, 8], strides = [1, 1]} : vector<40x96xf32> to vector<40x8xf32>
    %234 = vector.extract_strided_slice %172 {offsets = [0, 56], sizes = [40, 8], strides = [1, 1]} : vector<40x96xf32> to vector<40x8xf32>
    %235 = vector.extract_strided_slice %172 {offsets = [0, 88], sizes = [40, 8], strides = [1, 1]} : vector<40x96xf32> to vector<40x8xf32>
    %cst_103 = arith.constant dense<0.000000e+00> : vector<40x40xf32>
    %236 = tpu.matmul %233, %234, %cst_103 {dimension_numbers = #tpu.dot_dimension_numbers<[1], [1], [0], [0], [0, 0, 1, 0], [], []>} : vector<40x8xf32>, vector<40x8xf32>, vector<40x40xf32> -> vector<40x40xf32>
    %237 = arith.addf %236, %0 : vector<40x40xf32>
    %cst_104 = arith.constant dense<0xFF800000> : vector<40xf32>
    %238 = vector.multi_reduction <maximumf>, %237, %cst_104 [1] : vector<40x40xf32> to vector<40xf32>
    %239 = vector.shape_cast %238 : vector<40xf32> to vector<40x1xf32>
    %240 = vector.broadcast %239 : vector<40x1xf32> to vector<40x40xf32>
    %241 = arith.subf %237, %240 : vector<40x40xf32>
    %242 = math.exp %241 : vector<40x40xf32>
    %cst_105 = arith.constant dense<0.000000e+00> : vector<40xf32>
    %243 = vector.multi_reduction <add>, %242, %cst_105 [1] : vector<40x40xf32> to vector<40xf32>
    %244 = vector.shape_cast %243 : vector<40xf32> to vector<40x1xf32>
    %245 = tpu.reciprocal %244 {approx = true} : vector<40x1xf32> -> vector<40x1xf32>
    %246 = vector.broadcast %245 : vector<40x1xf32> to vector<40x40xf32>
    %247 = arith.mulf %242, %246 : vector<40x40xf32>
    %cst_106 = arith.constant dense<0.000000e+00> : vector<40x8xf32>
    %248 = tpu.matmul %247, %235, %cst_106 {dimension_numbers = #tpu.dot_dimension_numbers<[1], [0], [0], [1], [0, 0, 1, 1], [], []>} : vector<40x40xf32>, vector<40x8xf32>, vector<40x8xf32> -> vector<40x8xf32>
    %249 = vector.extract_strided_slice %174 {offsets = [24, 0], sizes = [8, 32], strides = [1, 1]} : vector<32x32xf32> to vector<8x32xf32>
    %cst_107 = arith.constant dense<0.000000e+00> : vector<40x32xf32>
    %250 = tpu.matmul %248, %249, %cst_107 {dimension_numbers = #tpu.dot_dimension_numbers<[1], [0], [0], [1], [0, 0, 1, 1], [], []>} : vector<40x8xf32>, vector<8x32xf32>, vector<40x32xf32> -> vector<40x32xf32>
    %251 = arith.addf %232, %250 : vector<40x32xf32>
    %c1_108 = arith.constant 1 : index
    %c0_109 = arith.constant 0 : index
    %c0_110 = arith.constant 0 : index
    %252 = vector.load %arg10[%c1_108, %c0_109, %c0_110] : memref<2x1x32xf32, #tpu.memory_space<vmem>>, vector<1x1x32xf32>
    %253 = vector.shape_cast %252 : vector<1x1x32xf32> to vector<1x32xf32>
    %254 = vector.broadcast %253 : vector<1x32xf32> to vector<40x32xf32>
    %255 = arith.addf %251, %254 : vector<40x32xf32>
    %256 = arith.addf %165, %255 : vector<40x32xf32>
    %c1_111 = arith.constant 1 : index
    %c0_112 = arith.constant 0 : index
    %c0_113 = arith.constant 0 : index
    %257 = vector.load %arg11[%c1_111, %c0_112, %c0_113] : memref<2x1x32xf32, #tpu.memory_space<vmem>>, vector<1x1x32xf32>
    %258 = vector.shape_cast %257 : vector<1x1x32xf32> to vector<1x32xf32>
    %c1_114 = arith.constant 1 : index
    %c0_115 = arith.constant 0 : index
    %c0_116 = arith.constant 0 : index
    %259 = vector.load %arg12[%c1_114, %c0_115, %c0_116] : memref<2x1x32xf32, #tpu.memory_space<vmem>>, vector<1x1x32xf32>
    %260 = vector.shape_cast %259 : vector<1x1x32xf32> to vector<1x32xf32>
    %cst_117 = arith.constant dense<0.000000e+00> : vector<40xf32>
    %261 = vector.multi_reduction <add>, %256, %cst_117 [1] : vector<40x32xf32> to vector<40xf32>
    %262 = vector.shape_cast %261 : vector<40xf32> to vector<40x1xf32>
    %cst_118 = arith.constant 3.200000e+01 : f32
    %263 = vector.broadcast %cst_118 : f32 to vector<40x1xf32>
    %264 = arith.divf %262, %263 : vector<40x1xf32>
    %265 = arith.mulf %256, %256 : vector<40x32xf32>
    %cst_119 = arith.constant dense<0.000000e+00> : vector<40xf32>
    %266 = vector.multi_reduction <add>, %265, %cst_119 [1] : vector<40x32xf32> to vector<40xf32>
    %267 = vector.shape_cast %266 : vector<40xf32> to vector<40x1xf32>
    %cst_120 = arith.constant 3.200000e+01 : f32
    %268 = vector.broadcast %cst_120 : f32 to vector<40x1xf32>
    %269 = arith.divf %267, %268 : vector<40x1xf32>
    %270 = vector.broadcast %264 : vector<40x1xf32> to vector<40x32xf32>
    %271 = arith.subf %256, %270 : vector<40x32xf32>
    %272 = arith.mulf %264, %264 : vector<40x1xf32>
    %273 = arith.subf %269, %272 : vector<40x1xf32>
    %cst_121 = arith.constant 9.99999974E-6 : f32
    %274 = vector.broadcast %cst_121 : f32 to vector<40x1xf32>
    %275 = arith.addf %273, %274 : vector<40x1xf32>
    %276 = math.rsqrt %275 : vector<40x1xf32>
    %277 = vector.broadcast %276 : vector<40x1xf32> to vector<40x32xf32>
    %278 = arith.mulf %271, %277 : vector<40x32xf32>
    %279 = vector.broadcast %258 : vector<1x32xf32> to vector<40x32xf32>
    %280 = arith.mulf %278, %279 : vector<40x32xf32>
    %281 = vector.broadcast %260 : vector<1x32xf32> to vector<40x32xf32>
    %282 = arith.addf %280, %281 : vector<40x32xf32>
    %c1_122 = arith.constant 1 : index
    %c0_123 = arith.constant 0 : index
    %c0_124 = arith.constant 0 : index
    %283 = vector.load %arg13[%c1_122, %c0_123, %c0_124] : memref<2x32x64xf32, #tpu.memory_space<vmem>>, vector<1x32x64xf32>
    %284 = vector.shape_cast %283 : vector<1x32x64xf32> to vector<32x64xf32>
    %cst_125 = arith.constant dense<0.000000e+00> : vector<40x64xf32>
    %285 = tpu.matmul %282, %284, %cst_125 {dimension_numbers = #tpu.dot_dimension_numbers<[1], [0], [0], [1], [0, 0, 1, 1], [], []>} : vector<40x32xf32>, vector<32x64xf32>, vector<40x64xf32> -> vector<40x64xf32>
    %c1_126 = arith.constant 1 : index
    %c0_127 = arith.constant 0 : index
    %c0_128 = arith.constant 0 : index
    %286 = vector.load %arg14[%c1_126, %c0_127, %c0_128] : memref<2x1x64xf32, #tpu.memory_space<vmem>>, vector<1x1x64xf32>
    %287 = vector.shape_cast %286 : vector<1x1x64xf32> to vector<1x64xf32>
    %288 = vector.broadcast %287 : vector<1x64xf32> to vector<40x64xf32>
    %289 = arith.addf %285, %288 : vector<40x64xf32>
    %cst_129 = arith.constant 0.000000e+00 : f32
    %290 = vector.broadcast %cst_129 : f32 to vector<40x64xf32>
    %291 = arith.maximumf %289, %290 : vector<40x64xf32>
    %c1_130 = arith.constant 1 : index
    %c0_131 = arith.constant 0 : index
    %c0_132 = arith.constant 0 : index
    %292 = vector.load %arg15[%c1_130, %c0_131, %c0_132] : memref<2x64x32xf32, #tpu.memory_space<vmem>>, vector<1x64x32xf32>
    %293 = vector.shape_cast %292 : vector<1x64x32xf32> to vector<64x32xf32>
    %cst_133 = arith.constant dense<0.000000e+00> : vector<40x32xf32>
    %294 = tpu.matmul %291, %293, %cst_133 {dimension_numbers = #tpu.dot_dimension_numbers<[1], [0], [0], [1], [0, 0, 1, 1], [], []>} : vector<40x64xf32>, vector<64x32xf32>, vector<40x32xf32> -> vector<40x32xf32>
    %c1_134 = arith.constant 1 : index
    %c0_135 = arith.constant 0 : index
    %c0_136 = arith.constant 0 : index
    %295 = vector.load %arg16[%c1_134, %c0_135, %c0_136] : memref<2x1x32xf32, #tpu.memory_space<vmem>>, vector<1x1x32xf32>
    %296 = vector.shape_cast %295 : vector<1x1x32xf32> to vector<1x32xf32>
    %297 = vector.broadcast %296 : vector<1x32xf32> to vector<40x32xf32>
    %298 = arith.addf %294, %297 : vector<40x32xf32>
    %299 = arith.addf %282, %298 : vector<40x32xf32>
    %c1_137 = arith.constant 1 : index
    %c0_138 = arith.constant 0 : index
    %c0_139 = arith.constant 0 : index
    %300 = vector.load %arg17[%c1_137, %c0_138, %c0_139] : memref<2x1x32xf32, #tpu.memory_space<vmem>>, vector<1x1x32xf32>
    %301 = vector.shape_cast %300 : vector<1x1x32xf32> to vector<1x32xf32>
    %c1_140 = arith.constant 1 : index
    %c0_141 = arith.constant 0 : index
    %c0_142 = arith.constant 0 : index
    %302 = vector.load %arg18[%c1_140, %c0_141, %c0_142] : memref<2x1x32xf32, #tpu.memory_space<vmem>>, vector<1x1x32xf32>
    %303 = vector.shape_cast %302 : vector<1x1x32xf32> to vector<1x32xf32>
    %cst_143 = arith.constant dense<0.000000e+00> : vector<40xf32>
    %304 = vector.multi_reduction <add>, %299, %cst_143 [1] : vector<40x32xf32> to vector<40xf32>
    %305 = vector.shape_cast %304 : vector<40xf32> to vector<40x1xf32>
    %cst_144 = arith.constant 3.200000e+01 : f32
    %306 = vector.broadcast %cst_144 : f32 to vector<40x1xf32>
    %307 = arith.divf %305, %306 : vector<40x1xf32>
    %308 = arith.mulf %299, %299 : vector<40x32xf32>
    %cst_145 = arith.constant dense<0.000000e+00> : vector<40xf32>
    %309 = vector.multi_reduction <add>, %308, %cst_145 [1] : vector<40x32xf32> to vector<40xf32>
    %310 = vector.shape_cast %309 : vector<40xf32> to vector<40x1xf32>
    %cst_146 = arith.constant 3.200000e+01 : f32
    %311 = vector.broadcast %cst_146 : f32 to vector<40x1xf32>
    %312 = arith.divf %310, %311 : vector<40x1xf32>
    %313 = vector.broadcast %307 : vector<40x1xf32> to vector<40x32xf32>
    %314 = arith.subf %299, %313 : vector<40x32xf32>
    %315 = arith.mulf %307, %307 : vector<40x1xf32>
    %316 = arith.subf %312, %315 : vector<40x1xf32>
    %cst_147 = arith.constant 9.99999974E-6 : f32
    %317 = vector.broadcast %cst_147 : f32 to vector<40x1xf32>
    %318 = arith.addf %316, %317 : vector<40x1xf32>
    %319 = math.rsqrt %318 : vector<40x1xf32>
    %320 = vector.broadcast %319 : vector<40x1xf32> to vector<40x32xf32>
    %321 = arith.mulf %314, %320 : vector<40x32xf32>
    %322 = vector.broadcast %301 : vector<1x32xf32> to vector<40x32xf32>
    %323 = arith.mulf %321, %322 : vector<40x32xf32>
    %324 = vector.broadcast %303 : vector<1x32xf32> to vector<40x32xf32>
    %325 = arith.addf %323, %324 : vector<40x32xf32>
    %c0_148 = arith.constant 0 : index
    %c0_149 = arith.constant 0 : index
    %326 = vector.load %arg19[%c0_148, %c0_149] : memref<1x32xf32, #tpu.memory_space<vmem>>, vector<1x32xf32>
    %c0_150 = arith.constant 0 : index
    %c0_151 = arith.constant 0 : index
    %327 = vector.load %arg20[%c0_150, %c0_151] : memref<1x32xf32, #tpu.memory_space<vmem>>, vector<1x32xf32>
    %cst_152 = arith.constant dense<0.000000e+00> : vector<40xf32>
    %328 = vector.multi_reduction <add>, %325, %cst_152 [1] : vector<40x32xf32> to vector<40xf32>
    %329 = vector.shape_cast %328 : vector<40xf32> to vector<40x1xf32>
    %cst_153 = arith.constant 3.200000e+01 : f32
    %330 = vector.broadcast %cst_153 : f32 to vector<40x1xf32>
    %331 = arith.divf %329, %330 : vector<40x1xf32>
    %332 = arith.mulf %325, %325 : vector<40x32xf32>
    %cst_154 = arith.constant dense<0.000000e+00> : vector<40xf32>
    %333 = vector.multi_reduction <add>, %332, %cst_154 [1] : vector<40x32xf32> to vector<40xf32>
    %334 = vector.shape_cast %333 : vector<40xf32> to vector<40x1xf32>
    %cst_155 = arith.constant 3.200000e+01 : f32
    %335 = vector.broadcast %cst_155 : f32 to vector<40x1xf32>
    %336 = arith.divf %334, %335 : vector<40x1xf32>
    %337 = vector.broadcast %331 : vector<40x1xf32> to vector<40x32xf32>
    %338 = arith.subf %325, %337 : vector<40x32xf32>
    %339 = arith.mulf %331, %331 : vector<40x1xf32>
    %340 = arith.subf %336, %339 : vector<40x1xf32>
    %cst_156 = arith.constant 9.99999974E-6 : f32
    %341 = vector.broadcast %cst_156 : f32 to vector<40x1xf32>
    %342 = arith.addf %340, %341 : vector<40x1xf32>
    %343 = math.rsqrt %342 : vector<40x1xf32>
    %344 = vector.broadcast %343 : vector<40x1xf32> to vector<40x32xf32>
    %345 = arith.mulf %338, %344 : vector<40x32xf32>
    %346 = vector.broadcast %326 : vector<1x32xf32> to vector<40x32xf32>
    %347 = arith.mulf %345, %346 : vector<40x32xf32>
    %348 = vector.broadcast %327 : vector<1x32xf32> to vector<40x32xf32>
    %349 = arith.addf %347, %348 : vector<40x32xf32>
    %350 = vector.extract_strided_slice %349 {offsets = [0, 0], sizes = [8, 32], strides = [1, 1]} : vector<40x32xf32> to vector<8x32xf32>
    %c0_157 = arith.constant 0 : index
    %c0_158 = arith.constant 0 : index
    %c0_159 = arith.constant 0 : index
    %351 = vector.load %arg21[%c0_157, %c0_158, %c0_159] : memref<5x32x8xf32, #tpu.memory_space<vmem>>, vector<1x32x8xf32>
    %352 = vector.shape_cast %351 : vector<1x32x8xf32> to vector<32x8xf32>
    %cst_160 = arith.constant dense<0.000000e+00> : vector<8x8xf32>
    %353 = tpu.matmul %350, %352, %cst_160 {dimension_numbers = #tpu.dot_dimension_numbers<[1], [0], [0], [1], [0, 0, 1, 1], [], []>} : vector<8x32xf32>, vector<32x8xf32>, vector<8x8xf32> -> vector<8x8xf32>
    %354 = vector.extract_strided_slice %349 {offsets = [8, 0], sizes = [8, 32], strides = [1, 1]} : vector<40x32xf32> to vector<8x32xf32>
    %c1_161 = arith.constant 1 : index
    %c0_162 = arith.constant 0 : index
    %c0_163 = arith.constant 0 : index
    %355 = vector.load %arg21[%c1_161, %c0_162, %c0_163] : memref<5x32x8xf32, #tpu.memory_space<vmem>>, vector<1x32x8xf32>
    %356 = vector.shape_cast %355 : vector<1x32x8xf32> to vector<32x8xf32>
    %cst_164 = arith.constant dense<0.000000e+00> : vector<8x8xf32>
    %357 = tpu.matmul %354, %356, %cst_164 {dimension_numbers = #tpu.dot_dimension_numbers<[1], [0], [0], [1], [0, 0, 1, 1], [], []>} : vector<8x32xf32>, vector<32x8xf32>, vector<8x8xf32> -> vector<8x8xf32>
    %358 = arith.addf %353, %357 : vector<8x8xf32>
    %359 = vector.extract_strided_slice %349 {offsets = [16, 0], sizes = [8, 32], strides = [1, 1]} : vector<40x32xf32> to vector<8x32xf32>
    %c2 = arith.constant 2 : index
    %c0_165 = arith.constant 0 : index
    %c0_166 = arith.constant 0 : index
    %360 = vector.load %arg21[%c2, %c0_165, %c0_166] : memref<5x32x8xf32, #tpu.memory_space<vmem>>, vector<1x32x8xf32>
    %361 = vector.shape_cast %360 : vector<1x32x8xf32> to vector<32x8xf32>
    %cst_167 = arith.constant dense<0.000000e+00> : vector<8x8xf32>
    %362 = tpu.matmul %359, %361, %cst_167 {dimension_numbers = #tpu.dot_dimension_numbers<[1], [0], [0], [1], [0, 0, 1, 1], [], []>} : vector<8x32xf32>, vector<32x8xf32>, vector<8x8xf32> -> vector<8x8xf32>
    %363 = arith.addf %358, %362 : vector<8x8xf32>
    %364 = vector.extract_strided_slice %349 {offsets = [24, 0], sizes = [8, 32], strides = [1, 1]} : vector<40x32xf32> to vector<8x32xf32>
    %c3 = arith.constant 3 : index
    %c0_168 = arith.constant 0 : index
    %c0_169 = arith.constant 0 : index
    %365 = vector.load %arg21[%c3, %c0_168, %c0_169] : memref<5x32x8xf32, #tpu.memory_space<vmem>>, vector<1x32x8xf32>
    %366 = vector.shape_cast %365 : vector<1x32x8xf32> to vector<32x8xf32>
    %cst_170 = arith.constant dense<0.000000e+00> : vector<8x8xf32>
    %367 = tpu.matmul %364, %366, %cst_170 {dimension_numbers = #tpu.dot_dimension_numbers<[1], [0], [0], [1], [0, 0, 1, 1], [], []>} : vector<8x32xf32>, vector<32x8xf32>, vector<8x8xf32> -> vector<8x8xf32>
    %368 = arith.addf %363, %367 : vector<8x8xf32>
    %369 = vector.extract_strided_slice %349 {offsets = [32, 0], sizes = [8, 32], strides = [1, 1]} : vector<40x32xf32> to vector<8x32xf32>
    %c4 = arith.constant 4 : index
    %c0_171 = arith.constant 0 : index
    %c0_172 = arith.constant 0 : index
    %370 = vector.load %arg21[%c4, %c0_171, %c0_172] : memref<5x32x8xf32, #tpu.memory_space<vmem>>, vector<1x32x8xf32>
    %371 = vector.shape_cast %370 : vector<1x32x8xf32> to vector<32x8xf32>
    %cst_173 = arith.constant dense<0.000000e+00> : vector<8x8xf32>
    %372 = tpu.matmul %369, %371, %cst_173 {dimension_numbers = #tpu.dot_dimension_numbers<[1], [0], [0], [1], [0, 0, 1, 1], [], []>} : vector<8x32xf32>, vector<32x8xf32>, vector<8x8xf32> -> vector<8x8xf32>
    %373 = arith.addf %368, %372 : vector<8x8xf32>
    %c0_174 = arith.constant 0 : index
    %c0_175 = arith.constant 0 : index
    %374 = vector.load %arg22[%c0_174, %c0_175] : memref<1x8xf32, #tpu.memory_space<vmem>>, vector<1x8xf32>
    %375 = vector.broadcast %374 : vector<1x8xf32> to vector<8x8xf32>
    %376 = arith.addf %373, %375 : vector<8x8xf32>
    %c0_176 = arith.constant 0 : index
    %c0_177 = arith.constant 0 : index
    %377 = vector.load %arg0[%c0_176, %c0_177] : memref<8x20xf32, #tpu.memory_space<vmem>>, vector<8x20xf32>
    %c0_178 = arith.constant 0 : index
    %c0_179 = arith.constant 0 : index
    %378 = vector.load %arg23[%c0_178, %c0_179] : memref<20x8xf32, #tpu.memory_space<vmem>>, vector<20x8xf32>
    %cst_180 = arith.constant dense<0.000000e+00> : vector<8x8xf32>
    %379 = tpu.matmul %377, %378, %cst_180 {dimension_numbers = #tpu.dot_dimension_numbers<[1], [0], [0], [1], [0, 0, 1, 1], [], []>} : vector<8x20xf32>, vector<20x8xf32>, vector<8x8xf32> -> vector<8x8xf32>
    %c0_181 = arith.constant 0 : index
    %c0_182 = arith.constant 0 : index
    %380 = vector.load %arg24[%c0_181, %c0_182] : memref<1x8xf32, #tpu.memory_space<vmem>>, vector<1x8xf32>
    %381 = vector.broadcast %380 : vector<1x8xf32> to vector<8x8xf32>
    %382 = arith.addf %379, %381 : vector<8x8xf32>
    %c0_183 = arith.constant 0 : index
    %c0_184 = arith.constant 0 : index
    %383 = vector.load %arg3[%c0_183, %c0_184] : memref<8x1xf32, #tpu.memory_space<vmem>>, vector<8x1xf32>
    %384 = vector.broadcast %383 : vector<8x1xf32> to vector<8x8xf32>
    %385 = arith.mulf %376, %384 : vector<8x8xf32>
    %386 = arith.addf %382, %385 : vector<8x8xf32>
    %c0_185 = arith.constant 0 : index
    %c0_186 = arith.constant 0 : index
    %387 = vector.load %arg2[%c0_185, %c0_186] : memref<8x1xf32, #tpu.memory_space<vmem>>, vector<8x1xf32>
    %388 = vector.broadcast %387 : vector<8x1xf32> to vector<8x8xf32>
    %389 = arith.addf %386, %388 : vector<8x8xf32>
    %c0_187 = arith.constant 0 : index
    %c0_188 = arith.constant 0 : index
    %390 = vector.load %arg25[%c0_187, %c0_188] : memref<8x8xf32, #tpu.memory_space<vmem>>, vector<8x8xf32>
    tpu.vector_store %arg25[%c0_187, %c0_188], %389 {strides = array<i32>} : memref<8x8xf32, #tpu.memory_space<vmem>>, vector<8x8xf32>,
    return
  }
}

</mosaic_0001>

<bundles_post_ra>
// kernel: _lambda_.1
= control target key start
LH: loop header
LB: loop body
LE: loop exit
PB: predicated region body
PF: predicated region fallthrough
CT: control target
= control target key end

     0   :  { %s5791_s0 = inlined_call_operand.vmem [shape: f32[8,20], index: 0, kind: input, shape index: {}]   ;;  %s5792_s1 = inlined_call_operand.vmem [shape: f32[40,4], index: 1, kind: input, shape index: {}]   ;;  %s5793_s2 = inlined_call_operand.vmem [shape: f32[8,1], index: 2, kind: input, shape index: {}]   ;;  %s5794_s3 = inlined_call_operand.vmem [shape: f32[8,1], index: 3, kind: input, shape index: {}]   ;;  %s5795_s4 = inlined_call_operand.hbm [shape: f32[40,40], index: 4, kind: input, shape index: {}]   ;;  %s5796_s5 = inlined_call_operand.hbm [shape: f32[40,32], index: 5, kind: input, shape index: {}]   ;;  %s5797_s6 = inlined_call_operand.vmem [shape: f32[4,32], index: 6, kind: input, shape index: {}]   ;;  %s5798_s7 = inlined_call_operand.vmem [shape: f32[2,32,96], index: 7, kind: input, shape index: {}]   ;;  %s5799_s8 = inlined_call_operand.vmem [shape: f32[2,1,96], index: 8, kind: input, shape index: {}]   ;;  %s5800_s9 = inlined_call_operand.hbm [shape: f32[2,32,32], index: 9, kind: input, shape index: {}]   ;;  %s5801_s10 = inlined_call_operand.vmem [shape: f32[2,1,32], index: 10, kind: input, shape index: {}, may-alias: {10,12,16,18}]   ;;  %s5802_s11 = inlined_call_operand.vmem [shape: f32[2,1,32], index: 11, kind: input, shape index: {}, may-alias: {11,17}]   ;;  %s5803_s12 = inlined_call_operand.vmem [shape: f32[2,1,32], index: 12, kind: input, shape index: {}, may-alias: {10,12,16,18}]   ;;  %s5804_s13 = inlined_call_operand.hbm [shape: f32[2,32,64], index: 13, kind: input, shape index: {}]   ;;  %s5805_s14 = inlined_call_operand.vmem [shape: f32[2,1,64], index: 14, kind: input, shape index: {}]   ;;  %s5806_s15 = inlined_call_operand.vmem [shape: f32[2,64,32], index: 15, kind: input, shape index: {}]   ;;  %s5807_s16 = inlined_call_operand.vmem [shape: f32[2,1,32], index: 16, kind: input, shape index: {}, may-alias: {10,12,16,18}]   ;;  %s5808_s17 = inlined_call_operand.vmem [shape: f32[2,1,32], index: 17, kind: input, shape index: {}, may-alias: {11,17}]   ;;  %s5809_s18 = inlined_call_operand.vmem [shape: f32[2,1,32], index: 18, kind: input, shape index: {}, may-alias: {10,12,16,18}]   ;;  %s5810_s19 = inlined_call_operand.vmem [shape: f32[1,32], index: 19, kind: input, shape index: {}]   ;;  %s5811_s20 = inlined_call_operand.vmem [shape: f32[1,32], index: 20, kind: input, shape index: {}]   ;;  %s5812_s21 = inlined_call_operand.vmem [shape: f32[5,32,8], index: 21, kind: input, shape index: {}]   ;;  %s5813_s22 = inlined_call_operand.vmem [shape: f32[1,8], index: 22, kind: input, shape index: {}, may-alias: {22,24}]   ;;  %s5814_s23 = inlined_call_operand.vmem [shape: f32[20,8], index: 23, kind: input, shape index: {}]   ;;  %s5815_s24 = inlined_call_operand.vmem [shape: f32[1,8], index: 24, kind: input, shape index: {}, may-alias: {22,24}]   ;;  %s5816_s25 = inlined_call_operand.hbm [shape: f32[8,8], index: 25, kind: output, shape index: {}]  }
   0x1   :  { %5824 = sst [smem:[#allocation15_spill]] %s5791_s0 }
   0x2   :  { %5825 = sst [smem:[#allocation16_spill]] %s5792_s1 }
   0x3   :  { %5826 = sst [smem:[#allocation17_spill]] %s5793_s2 }
   0x4   :  { %5827 = sst [smem:[#allocation18_spill]] %s5794_s3 }
   0x5   :  { %5828 = sst [smem:[#allocation19_spill]] %s5795_s4 }
   0x6   :  { %5829 = sst [smem:[#allocation20_spill]] %s5796_s5 }
   0x7   :  { %5830 = sst [smem:[#allocation21_spill]] %s5797_s6 }
   0x8   :  { %5831 = sst [smem:[#allocation22_spill]] %s5798_s7 }
   0x9   :  { %5832 = sst [smem:[#allocation23_spill]] %s5799_s8 }
   0xa   :  { %5833 = sst [smem:[#allocation24_spill]] %s5800_s9 }
   0xb   :  { %5834 = sst [smem:[#allocation25_spill]] %s5813_s22 }
   0xc   :  { %5835 = sst [smem:[#allocation26_spill]] %s5815_s24 }
   0xd   :  { %5836 = sst [smem:[#allocation27_spill]] %s5816_s25 }
   0xe   :  { %30 = vsyncpa [#allocation3], 0 }
   0xf   :  { %31 = vsyncpa [#allocation6], 0 }
  0x10   :  { %32 = vsyncpa [#allocation9], 0 }
  0x11   :  { %33 = vsyncpa [#allocation4], 0  ;;  %s5837_s6 = sld [smem:[#allocation20_spill]]  ;;  %s4141_s7 = smov [#allocation5]  }
  0x12   :  { %s61_s3 = sshll.u32 %s4141_s7, 4  ;;  %s5838_s8 = sld [smem:[#allocation19_spill]]  ;;  %s62_s3 = int_to_ptr.vmem [resolvable:$true] %s61_s3 }
  0x13   :  { %s4142_s4 = smov 128   ;;  %s4143_s28 = smov 8  }
  0x14   :  { %s4144_s9 = smov [#allocation2]   ;;  %s5839_s22 = sld [smem:[#allocation24_spill]] }
  0x15   :  { %s48_s5 = sshll.u32 %s4144_s9, 4  ;;  %s4145_s7 = smov [#allocation7]   ;;  %s49_s5 = int_to_ptr.vmem [resolvable:$true] %s48_s5 }
  0x16   :  { %s80_s26 = sshll.u32 %s4145_s7, 4  ;;  %s81_s26 = int_to_ptr.vmem [resolvable:$true] %s80_s26 }
  0x17   :  { %s59_s30 = sshll.u32 %s5837_s6, 4  ;;  %s97_s6 = sshll.u32 %s5804_s13, 4  ;;  %s60_s30 = int_to_ptr.hbm [resolvable:$true] %s59_s30  ;;  %s98_s6 = int_to_ptr.hbm [resolvable:$true] %s97_s6 }
  0x18   :  { %s46_s27 = sshll.u32 %s5838_s8, 4  ;;  %s47_s27 = int_to_ptr.hbm [resolvable:$true] %s46_s27 }
  0x19   :  { %67 = dma.hbm_to_vmem [thread:$0]  %s60_s30, 640, %s62_s3, [#allocation6], %s4142_s4, %s4142_s4, %s4143_s28  }
  0x1a   :  { %s78_s24 = sshll.u32 %s5839_s22, 4  ;;  %s4146_s30 = smov [#allocation8]   ;;  %s79_s24 = int_to_ptr.hbm [resolvable:$true] %s78_s24 }
  0x1b   :  { %54 = dma.hbm_to_vmem [thread:$0]  %s47_s27, 640, %s49_s5, [#allocation3], %s4142_s4, %s4142_s4, %s4143_s28  }
  0x1c   :  { %86 = dma.hbm_to_vmem [thread:$0]  %s79_s24, 1024, %s81_s26, [#allocation6], %s4142_s4, %s4142_s4, %s4143_s28  }
  0x1d   :  { %s99_s3 = sshll.u32 %s4146_s30, 4  ;;  %s100_s3 = int_to_ptr.vmem [resolvable:$true] %s99_s3 }
  0x1e   :  { %105 = dma.hbm_to_vmem [thread:$0]  %s98_s6, 1024, %s100_s3, [#allocation9], %s4142_s4, %s4142_s4, %s4143_s28  }
  0x1f   :  { %4133 = dma.done.wait [#allocation3], 640  }
  0x20   :  { %4134 = vsyncadd [#allocation3], 4294966656 }
  0x21   :  { %4135 = dma.done.wait [#allocation6], 1664  }
  0x22   :  { %4136 = vsyncadd [#allocation6], 4294965632 }
  0x23   :  { %4137 = dma.done.wait [#allocation9], 1024  }
  0x24   :  { %4138 = vsyncadd [#allocation9], 4294966272  ;;  %vm176_vm0 = vcmask 1043456   ;;  %vm160_vm1 = vcmask 31744   ;;  %s5840_s13 = sld [smem:[#allocation21_spill]]  ;;  %v155_v10 = vld [vmem:[#allocation5] sm:$0xff] }
  0x25   :  { %s5841_s27 = sld [smem:[#allocation16_spill]]  ;;  %vm220_vm2 = vcmask 261120   ;;  %v156_v13 = vld [vmem:[#allocation5 + $0x8] sm:$0xff]  ;;  %v157_v16 = vld [vmem:[#allocation5 + $0x10] sm:$0xff]  ;;  %v158_v19 = vld [vmem:[#allocation5 + $0x18] sm:$0xff]  ;;  %s4147_s4 = smov 96  }
  0x26   :  { %s5842_s28 = sld [smem:[#allocation22_spill]]  ;;  %v159_v22 = vld [vmem:[#allocation5 + $0x20] sm:$0xff]  ;;  %vm287_vm3 = vcmask 64512   ;;  %v4397_v41 = vld [vmem:[#allocation2] sm:$0xff]  ;;  %vm340_vm4 = vcmask 326656   ;;  %v4405_v49 = vld [vmem:[#allocation2 + $0x10] sm:$0xff] }
  0x27   :  { %s5843_s24 = sld [smem:[#allocation23_spill]]  ;;  %v4401_v45 = vld [vmem:[#allocation2 + $0x8] sm:$0xff]  ;;  %v4409_v53 = vld [vmem:[#allocation2 + $0x18] sm:$0xff]  ;;  %v4413_v57 = vld [vmem:[#allocation2 + $0x20] sm:$0xff]  ;;  %s4148_s9 = smov 64  }
  0x28   :  { %s4149_s5 = smov 88   ;;  %s4150_s0 = smov 120  }
  0x29   :  { %s4151_s29 = smov 72   ;;  %s4152_s2 = smov 80  }
  0x2a   :  { %v154_v0 = vld [vmem:[%s5840_s13] sm:$0xf]  ;;  %s4153_s6 = smov 104   ;;  %s4154_s7 = smov 112  }
  0x2b   :  { %v149_v1 = vld [vmem:[%s5841_s27] sm:$0xff]  ;;  %3434 = vmatpush.msk.msra.mxu0 %vm176_vm0, %v154_v0  ;;  %v150_v4 = vld [vmem:[%s5841_s27 + $0x8] sm:$0xff]  ;;  %v151_v5 = vld [vmem:[%s5841_s27 + $0x10] sm:$0xff]  ;;  %s4155_s26 = smov 56   ;;  %s5822_s30 = smov 48  }
  0x2c   :  { %3435 = vmatmul.msk.f32.vlgmr.msra.gmra.mxu0 %vm160_vm1, %v149_v1  ;;  %v215_v2 = vld [vmem:[%s5842_s28 + $0x18] sm:$0xff]  ;;  %v214_v3 = vld [vmem:[%s5842_s28 + $0x10] sm:$0xff]  ;;  %v153_v7 = vld [vmem:[%s5841_s27 + $0x20] sm:$0xff]  ;;  %s5820_s3 = smov 40  }
  0x2d   :  { %248 = vmatpush.msra.mxu1 %v215_v2  ;;  %v152_v6 = vld [vmem:[%s5841_s27 + $0x18] sm:$0xff]  ;;  %v213_v8 = vld [vmem:[%s5842_s28 + $0x8] sm:$0xff]  ;;  %v212_v9 = vld [vmem:[%s5842_s28] sm:$0xff] }
  0x2e   :  { %v3776_v25 = vld [vmem:[%s5843_s24] ss:$0 sm:$0xff] }
  0x2f   :  { %249 = vmatpush.msra.mxu1 %v214_v3 }
  0x31   :  { %250 = vmatpush.msra.mxu1 %v213_v8 }
  0x33   :  { %251 = vmatpush.msra.mxu1 %v212_v9 }
  0x34   :  { %3436 = vmatmul.msk.f32.gmra.mxu0 %vm160_vm1, %v150_v4 }
  0x3c   :  { %3437 = vmatmul.msk.f32.gmra.mxu0 %vm160_vm1, %v151_v5 }
  0x44   :  { %3438 = vmatmul.msk.f32.gmra.mxu0 %vm160_vm1, %v152_v6 }
  0x4c   :  { %3439 = vmatmul.msk.f32.gmra.mxu0 %vm160_vm1, %v153_v7 }
  0xa9   :  { %v197_v11 = vpop.f32.mrf.mxu0 }
  0xaa   :  { %v4339_v12 = vadd.f32 %v197_v11, %v155_v10 }
  0xac   :  { %3440 = vmatmul.msk.f32.vlgmr.msra.gmra.mxu1 %vm220_vm2, %v4339_v12 }
  0xb1   :  { %v200_v14 = vpop.f32.mrf.mxu0 }
  0xb2   :  { %v4343_v15 = vadd.f32 %v200_v14, %v156_v13 }
  0xb4   :  { %3441 = vmatmul.msk.f32.gmra.mxu1 %vm220_vm2, %v4343_v15 }
  0xb9   :  { %v203_v17 = vpop.f32.mrf.mxu0 }
  0xba   :  { %v4347_v18 = vadd.f32 %v203_v17, %v157_v16 }
  0xbc   :  { %3442 = vmatmul.msk.f32.gmra.mxu1 %vm220_vm2, %v4347_v18 }
  0xc1   :  { %v206_v20 = vpop.f32.mrf.mxu0 }
  0xc2   :  { %v4351_v21 = vadd.f32 %v206_v20, %v158_v19 }
  0xc4   :  { %3443 = vmatmul.msk.f32.gmra.mxu1 %vm220_vm2, %v4351_v21 }
  0xc9   :  { %v209_v23 = vpop.f32.mrf.mxu0 }
  0xca   :  { %v4355_v24 = vadd.f32 %v209_v23, %v159_v22 }
  0xcc   :  { %3444 = vmatmul.msk.f32.gmra.mxu1 %vm220_vm2, %v4355_v24 }
 0x129   :  { %v253_v26 = vpop.f32.mrf.mxu1 }
 0x12a   :  { %v4362_v27 = vadd.f32 %v3776_v25, %v253_v26 }
 0x12c   :  { %277 = vrot.lane.b32.xlu2 %v4362_v27, %s4147_s4 }
 0x131   :  { %v256_v28 = vpop.f32.mrf.mxu1 }
 0x132   :  { %v4370_v32 = vadd.f32 %v3776_v25, %v256_v28 }
 0x139   :  { %v259_v29 = vpop.f32.mrf.mxu1 }
 0x13a   :  { %v4366_v30 = vadd.f32 %v3776_v25, %v259_v29 }
 0x13c   :  { %281 = vrot.lane.b32.xlu1 %v4366_v30, %s4147_s4  ;;  %v4425_v62 = vpack.i.bf16 %v4370_v32, %v4366_v30 }
 0x141   :  { %v262_v31 = vpop.f32.mrf.mxu1 }
 0x142   :  { %v4378_v35 = vadd.f32 %v3776_v25, %v262_v31 }
 0x144   :  { %279 = vrot.lane.b32.xlu1 %v4370_v32, %s4147_s4 }
 0x149   :  { %v265_v33 = vpop.f32.mrf.mxu1 }
 0x14a   :  { %v4374_v34 = vadd.f32 %v3776_v25, %v265_v33 }
 0x14c   :  { %285 = vrot.lane.b32.xlu0 %v4374_v34, %s4147_s4  ;;  %v4419_v61 = vpack.i.bf16 %v4378_v35, %v4374_v34 }
 0x154   :  { %283 = vrot.lane.b32.xlu0 %v4378_v35, %s4147_s4 }
 0x186   :  { %v278_v40 = vpop.permute.xlu2 %277 }
 0x1ae   :  { %v282_v37 = vpop.permute.xlu1 %281 }
 0x1b6   :  { %v280_v39 = vpop.permute.xlu1 %279 }
 0x1be   :  { %v286_v36 = vpop.permute.xlu0 %285 }
 0x1bf   :  { %3445 = vmatpush.xpose.msk.msra.mxu2 %vm287_vm3, %v286_v36 }
 0x1c6   :  { %v284_v38 = vpop.permute.xlu0 %283 }
 0x1c7   :  { %3446 = vmatpush.xpose.msk.msra.mxu2 %vm287_vm3, %v284_v38 }
 0x1cb   :  { %3447 = vmatpush.xpose.msk.msra.mxu2 %vm287_vm3, %v282_v37 }
 0x1cf   :  { %3448 = vmatpush.xpose.msk.msra.mxu2 %vm287_vm3, %v280_v39 }
 0x1d3   :  { %3449 = vmatpush.xpose.msk.msra.mxu2 %vm287_vm3, %v278_v40 }
 0x1d6   :  { %3450 = vmatmul.msk.f32.vlgmr.msra.gmra.mxu2 %vm287_vm3, %v4362_v27 }
 0x1de   :  { %3451 = vmatmul.msk.f32.gmra.mxu2 %vm287_vm3, %v4370_v32 }
 0x1e6   :  { %3452 = vmatmul.msk.f32.gmra.mxu2 %vm287_vm3, %v4366_v30 }
 0x1ee   :  { %3453 = vmatmul.msk.f32.gmra.mxu2 %vm287_vm3, %v4378_v35 }
 0x1f6   :  { %3454 = vmatmul.msk.f32.gmra.mxu2 %vm287_vm3, %v4374_v34 }
 0x259   :  { %v325_v42 = vpop.f32.mrf.mxu2 }
 0x25a   :  { %v326_v43 = vadd.f32 %v325_v42, %v4397_v41 }
 0x25c   :  { %v341_v44 = vsel %vm340_vm4, %v326_v43, -inf }
 0x25d   :  { %342 = vmax.xlane.f32.xlu2 %v341_v44  ;;  %v268_v44 = vld [vmem:[#allocation7] sm:$0xff] }
 0x25e   :  { %724 = vmatpush.msrb.mxu2 %v268_v44 }
 0x261   :  { %v328_v46 = vpop.f32.mrf.mxu2 }
 0x262   :  { %v329_v47 = vadd.f32 %v328_v46, %v4401_v45 }
 0x264   :  { %v344_v48 = vsel %vm340_vm4, %v329_v47, -inf }
 0x265   :  { %345 = vmax.xlane.f32.xlu0 %v344_v48 }
 0x269   :  { %v331_v50 = vpop.f32.mrf.mxu2 }
 0x26a   :  { %v332_v51 = vadd.f32 %v331_v50, %v4405_v49 }
 0x26c   :  { %v347_v52 = vsel %vm340_vm4, %v332_v51, -inf }
 0x26d   :  { %348 = vmax.xlane.f32.xlu1 %v347_v52 }
 0x271   :  { %v334_v54 = vpop.f32.mrf.mxu2 }
 0x272   :  { %v335_v55 = vadd.f32 %v334_v54, %v4409_v53 }
 0x274   :  { %v350_v56 = vsel %vm340_vm4, %v335_v55, -inf }
 0x275   :  { %351 = vmax.xlane.f32.xlu2 %v350_v56 }
 0x279   :  { %v337_v58 = vpop.f32.mrf.mxu2 }
 0x27a   :  { %v338_v59 = vadd.f32 %v337_v58, %v4413_v57 }
 0x27c   :  { %v353_v60 = vsel %vm340_vm4, %v338_v59, -inf }
 0x27d   :  { %354 = vmax.xlane.f32.xlu2 %v353_v60 }
 0x286   :  { %3694 = vrot.lane.b32.xlu1 %v4419_v61, %s4148_s9 }
 0x295   :  { %3699 = vrot.lane.b32.xlu2 %v4425_v62, %s4148_s9 }
 0x2d0   :  { %v343_v63 = vpop.xlane.xlu2 %342 }
 0x2d1   :  { %v356_v0 = vsub.f32 %v326_v43, %v343_v63 }
 0x2d3   :  { %v361_v1 = vmul.f32 1.442695, %v356_v0 }
 0x2d5   :  { %3796 = vpow2.f32 %v361_v1 }
 0x2d8   :  { %v346_v2 = vpop.xlane.xlu0 %345 }
 0x2d9   :  { %v357_v3 = vsub.f32 %v329_v47, %v346_v2 }
 0x2db   :  { %v4429_v4 = vpop.eup %3796  ;;  %v363_v5 = vmul.f32 1.442695, %v357_v3 }
 0x2dc   :  { %v371_v6 = vsel %vm340_vm4, %v4429_v4, 0.0 }
 0x2dd   :  { %3798 = vpow2.f32 %v363_v5  ;;  %372 = vadd.xlane.f32.xlu0 %v371_v6 }
 0x2e0   :  { %v349_v7 = vpop.xlane.xlu1 %348 }
 0x2e1   :  { %v358_v8 = vsub.f32 %v332_v51, %v349_v7 }
 0x2e3   :  { %v4433_v9 = vpop.eup %3798  ;;  %v365_v10 = vmul.f32 1.442695, %v358_v8 }
 0x2e4   :  { %v374_v11 = vsel %vm340_vm4, %v4433_v9, 0.0 }
 0x2e5   :  { %3800 = vpow2.f32 %v365_v10  ;;  %375 = vadd.xlane.f32.xlu0 %v374_v11 }
 0x2e8   :  { %v352_v13 = vpop.xlane.xlu2 %351 }
 0x2e9   :  { %v359_v14 = vsub.f32 %v335_v55, %v352_v13 }
 0x2eb   :  { %v4437_v16 = vpop.eup %3800  ;;  %v367_v17 = vmul.f32 1.442695, %v359_v14 }
 0x2ec   :  { %v377_v19 = vsel %vm340_vm4, %v4437_v16, 0.0 }
 0x2ed   :  { %3802 = vpow2.f32 %v367_v17  ;;  %378 = vadd.xlane.f32.xlu1 %v377_v19 }
 0x2f0   :  { %v355_v20 = vpop.xlane.xlu2 %354 }
 0x2f1   :  { %v360_v36 = vsub.f32 %v338_v59, %v355_v20 }
 0x2f3   :  { %v4441_v22 = vpop.eup %3802  ;;  %v369_v37 = vmul.f32 1.442695, %v360_v36 }
 0x2f4   :  { %v380_v23 = vsel %vm340_vm4, %v4441_v22, 0.0 }
 0x2f5   :  { %381 = vadd.xlane.f32.xlu2 %v380_v23  ;;  %3804 = vpow2.f32 %v369_v37 }
 0x2f8   :  { %v3695_v25 = vpop.permute.xlu1 %3694  ;;  %v3700_v28 = vpop.permute.xlu2 %3699 }
 0x2f9   :  { %396 = vrot.lane.b32.xlu0 %v4362_v27, %s4148_s9  ;;  %v3696_v26 = vunpack.i.l.bf16 %v3695_v25  ;;  %v3697_v29 = vunpack.i.h.bf16 %v3695_v25  ;;  %v3701_v31 = vunpack.i.l.bf16 %v3700_v28  ;;  %v3702_v33 = vunpack.i.h.bf16 %v3700_v28 }
 0x2fb   :  { %437 = vmatpush.msra.mxu3 %v3696_v26  ;;  %v4461_v38 = vpop.eup %3804 }
 0x2fc   :  { %v383_v39 = vsel %vm340_vm4, %v4461_v38, 0.0 }
 0x2fd   :  { %438 = vmatpush.msra.mxu3 %v3697_v29 }
 0x2ff   :  { %439 = vmatpush.msra.mxu3 %v3701_v31 }
 0x301   :  { %440 = vmatpush.msra.mxu3 %v3702_v33 }
 0x306   :  { %476 = vrot.lane.b32.xlu1 %v4374_v34, %s4149_s5 }
 0x30d   :  { %474 = vrot.lane.b32.xlu2 %v4378_v35, %s4149_s5 }
 0x30e   :  { %470 = vrot.lane.b32.xlu1 %v4370_v32, %s4149_s5 }
 0x315   :  { %468 = vrot.lane.b32.xlu2 %v4362_v27, %s4149_s5 }
 0x316   :  { %460 = vrot.lane.b32.xlu1 %v4370_v32, %s4150_s0 }
 0x31d   :  { %462 = vrot.lane.b32.xlu2 %v4366_v30, %s4150_s0 }
 0x31e   :  { %1000 = vrot.lane.b32.xlu1 %v4374_v34, %s4151_s29 }
 0x323   :  { %384 = vadd.xlane.f32.xlu0 %v383_v39 }
 0x325   :  { %464 = vrot.lane.b32.xlu2 %v4378_v35, %s4150_s0 }
 0x326   :  { %998 = vrot.lane.b32.xlu1 %v4378_v35, %s4151_s29 }
 0x32d   :  { %755 = vrot.lane.b32.xlu2 %v4366_v30, %s4152_s2 }
 0x32e   :  { %466 = vrot.lane.b32.xlu1 %v4374_v34, %s4150_s0 }
 0x335   :  { %753 = vrot.lane.b32.xlu2 %v4370_v32, %s4152_s2 }
 0x336   :  { %751 = vrot.lane.b32.xlu1 %v4362_v27, %s4152_s2 }
 0x337   :  { %472 = vrot.lane.b32.xlu0 %v4366_v30, %s4149_s5 }
 0x33d   :  { %992 = vrot.lane.b32.xlu2 %v4362_v27, %s4151_s29 }
 0x33e   :  { %982 = vrot.lane.b32.xlu1 %v4362_v27, %s4153_s6 }
 0x33f   :  { %458 = vrot.lane.b32.xlu0 %v4362_v27, %s4150_s0 }
 0x345   :  { %743 = vrot.lane.b32.xlu2 %v4370_v32, %s4154_s7 }
 0x346   :  { %745 = vrot.lane.b32.xlu1 %v4366_v30, %s4154_s7 }
 0x347   :  { %759 = vrot.lane.b32.xlu0 %v4374_v34, %s4152_s2 }
 0x34d   :  { %986 = vrot.lane.b32.xlu2 %v4366_v30, %s4153_s6 }
 0x34e   :  { %988 = vrot.lane.b32.xlu1 %v4378_v35, %s4153_s6 }
 0x34f   :  { %757 = vrot.lane.b32.xlu0 %v4378_v35, %s4152_s2 }
 0x350   :  { %v373_v40 = vpop.xlane.xlu0 %372 }
 0x351   :  { %3806 = vrcp.f32 %v373_v40 }
 0x355   :  { %749 = vrot.lane.b32.xlu2 %v4374_v34, %s4154_s7 }
 0x357   :  { %996 = vrot.lane.b32.xlu0 %v4366_v30, %s4151_s29  ;;  %v3807_v43 = vpop.eup %3806 }
 0x358   :  { %v376_v42 = vpop.xlane.xlu0 %375  ;;  %v391_v47 = vmul.f32 %v3807_v43, %v4429_v4 }
 0x359   :  { %3808 = vrcp.f32 %v376_v42 }
 0x35f   :  { %994 = vrot.lane.b32.xlu0 %v4370_v32, %s4151_s29  ;;  %v3809_v48 = vpop.eup %3808 }
 0x360   :  { %v379_v30 = vpop.xlane.xlu1 %378  ;;  %v392_v51 = vmul.f32 %v3809_v48, %v4433_v9 }
 0x361   :  { %3810 = vrcp.f32 %v379_v30 }
 0x367   :  { %741 = vrot.lane.b32.xlu0 %v4362_v27, %s4154_s7  ;;  %v3811_v52 = vpop.eup %3810 }
 0x368   :  { %v382_v50 = vpop.xlane.xlu2 %381  ;;  %v393_v55 = vmul.f32 %v3811_v52, %v4437_v16 }
 0x369   :  { %3812 = vrcp.f32 %v382_v50 }
 0x36b   :  { %v397_v46 = vpop.permute.xlu0 %396 }
 0x36c   :  { %441 = vmatpush.msra.mxu3 %v397_v46 }
 0x36d   :  { %3455 = vmatmul.msk.f32.vlgmr.msra.gmra.mxu3 %vm340_vm4, %v391_v47 }
 0x36f   :  { %984 = vrot.lane.b32.xlu0 %v4370_v32, %s4153_s6  ;;  %v3813_v32 = vpop.eup %3812 }
 0x370   :  { %v475_v56 = vpop.permute.xlu2 %474  ;;  %v394_v59 = vmul.f32 %v3813_v32, %v4441_v22 }
 0x375   :  { %3456 = vmatmul.msk.f32.gmra.mxu3 %vm340_vm4, %v392_v51 }
 0x377   :  { %747 = vrot.lane.b32.xlu0 %v4378_v35, %s4154_s7 }
 0x378   :  { %v477_v54 = vpop.permute.xlu1 %476 }
 0x379   :  { %3460 = vmatpush.xpose.msk.msrb.mxu0 %vm287_vm3, %v477_v54 }
 0x37d   :  { %3457 = vmatmul.msk.f32.gmra.mxu3 %vm340_vm4, %v393_v55  ;;  %3461 = vmatpush.xpose.msk.msrb.mxu0 %vm287_vm3, %v475_v56 }
 0x37f   :  { %990 = vrot.lane.b32.xlu0 %v4374_v34, %s4153_s6  ;;  %v469_v34 = vpop.permute.xlu2 %468 }
 0x380   :  { %v471_v58 = vpop.permute.xlu1 %470 }
 0x385   :  { %3458 = vmatmul.msk.f32.gmra.mxu3 %vm340_vm4, %v394_v59 }
 0x387   :  { %v463_v4 = vpop.permute.xlu2 %462 }
 0x388   :  { %v461_v35 = vpop.permute.xlu1 %460 }
 0x38f   :  { %v465_v6 = vpop.permute.xlu2 %464 }
 0x390   :  { %v1001_v60 = vpop.permute.xlu1 %1000 }
 0x391   :  { %3505 = vmatpush.xpose.msk.msra.mxu2 %vm287_vm3, %v1001_v60 }
 0x396   :  { %v385_v63 = vpop.xlane.xlu0 %384 }
 0x397   :  { %3814 = vrcp.f32 %v385_v63  ;;  %v756_v8 = vpop.permute.xlu2 %755 }
 0x398   :  { %v999_v0 = vpop.permute.xlu1 %998 }
 0x399   :  { %3506 = vmatpush.xpose.msk.msra.mxu2 %vm287_vm3, %v999_v0 }
 0x39d   :  { %v3815_v1 = vpop.eup %3814 }
 0x39e   :  { %v395_v2 = vmul.f32 %v3815_v1, %v4461_v38 }
 0x39f   :  { %v754_v11 = vpop.permute.xlu2 %753 }
 0x3a0   :  { %3459 = vmatmul.msk.f32.gmra.mxu3 %vm340_vm4, %v395_v2  ;;  %v467_v10 = vpop.permute.xlu1 %466 }
 0x3a7   :  { %v993_v17 = vpop.permute.xlu2 %992 }
 0x3a8   :  { %v752_v14 = vpop.permute.xlu1 %751 }
 0x3a9   :  { %v473_v3 = vpop.permute.xlu0 %472 }
 0x3aa   :  { %3462 = vmatpush.xpose.msk.msrb.mxu0 %vm287_vm3, %v473_v3 }
 0x3ae   :  { %3463 = vmatpush.xpose.msk.msrb.mxu0 %vm287_vm3, %v471_v58 }
 0x3af   :  { %v744_v22 = vpop.permute.xlu2 %743 }
 0x3b0   :  { %v983_v20 = vpop.permute.xlu1 %982 }
 0x3b1   :  { %v459_v5 = vpop.permute.xlu0 %458 }
 0x3b2   :  { %3464 = vmatpush.xpose.msk.msrb.mxu0 %vm287_vm3, %v469_v34 }
 0x3b5   :  { %3465 = vmatmul.msk.f32.vlgmr.msrb.gmra.mxu0 %vm287_vm3, %v459_v5 }
 0x3b7   :  { %v987_v28 = vpop.permute.xlu2 %986 }
 0x3b8   :  { %v746_v25 = vpop.permute.xlu1 %745 }
 0x3b9   :  { %v760_v7 = vpop.permute.xlu0 %759 }
 0x3ba   :  { %3485 = vmatpush.xpose.msk.msra.mxu0 %vm287_vm3, %v760_v7 }
 0x3bd   :  { %3466 = vmatmul.msk.f32.gmra.mxu0 %vm287_vm3, %v461_v35 }
 0x3bf   :  { %v750_v33 = vpop.permute.xlu2 %749 }
 0x3c0   :  { %v989_v30 = vpop.permute.xlu1 %988 }
 0x3c1   :  { %v758_v9 = vpop.permute.xlu0 %757 }
 0x3c2   :  { %3486 = vmatpush.xpose.msk.msra.mxu0 %vm287_vm3, %v758_v9 }
 0x3c5   :  { %3467 = vmatmul.msk.f32.gmra.mxu0 %vm287_vm3, %v463_v4 }
 0x3c6   :  { %3487 = vmatpush.xpose.msk.msra.mxu0 %vm287_vm3, %v756_v8 }
 0x3c9   :  { %v997_v13 = vpop.permute.xlu0 %996 }
 0x3ca   :  { %3488 = vmatpush.xpose.msk.msra.mxu0 %vm287_vm3, %v754_v11  ;;  %3507 = vmatpush.xpose.msk.msra.mxu2 %vm287_vm3, %v997_v13 }
 0x3cd   :  { %3468 = vmatmul.msk.f32.gmra.mxu0 %vm287_vm3, %v465_v6 }
 0x3ce   :  { %3489 = vmatpush.xpose.msk.msra.mxu0 %vm287_vm3, %v752_v14 }
 0x3d1   :  { %v995_v16 = vpop.permute.xlu0 %994 }
 0x3d2   :  { %3508 = vmatpush.xpose.msk.msra.mxu2 %vm287_vm3, %v995_v16 }
 0x3d5   :  { %3469 = vmatmul.msk.f32.gmra.mxu0 %vm287_vm3, %v467_v10 }
 0x3d6   :  { %3509 = vmatpush.xpose.msk.msra.mxu2 %vm287_vm3, %v993_v17 }
 0x3d9   :  { %v742_v19 = vpop.permute.xlu0 %741 }
 0x3dd   :  { %3490 = vmatmul.msk.f32.vlgmr.msra.gmra.mxu0 %vm287_vm3, %v742_v19 }
 0x3e1   :  { %v985_v23 = vpop.permute.xlu0 %984 }
 0x3e5   :  { %3491 = vmatmul.msk.f32.gmra.mxu0 %vm287_vm3, %v744_v22 }
 0x3e9   :  { %v748_v29 = vpop.permute.xlu0 %747 }
 0x3ed   :  { %3492 = vmatmul.msk.f32.gmra.mxu0 %vm287_vm3, %v746_v25 }
 0x3f0   :  { %v443_v26 = vpop.f32.mrf.mxu3 }
 0x3f1   :  { %3480 = vmatmul.msk.f32.vlgmr.msrb.gmra.mxu2 %vm287_vm3, %v443_v26  ;;  %v991_v52 = vpop.permute.xlu0 %990 }
 0x3f5   :  { %3493 = vmatmul.msk.f32.gmra.mxu0 %vm287_vm3, %v748_v29 }
 0x3f8   :  { %v446_v31 = vpop.f32.mrf.mxu3 }
 0x3f9   :  { %3481 = vmatmul.msk.f32.gmra.mxu2 %vm287_vm3, %v446_v31 }
 0x3fd   :  { %3494 = vmatmul.msk.f32.gmra.mxu0 %vm287_vm3, %v750_v33 }
 0x400   :  { %v449_v36 = vpop.f32.mrf.mxu3 }
 0x401   :  { %3482 = vmatmul.msk.f32.gmra.mxu2 %vm287_vm3, %v449_v36 }
 0x408   :  { %v452_v37 = vpop.f32.mrf.mxu3 }
 0x409   :  { %3483 = vmatmul.msk.f32.gmra.mxu2 %vm287_vm3, %v452_v37 }
 0x423   :  { %v455_v38 = vpop.f32.mrf.mxu3 }
 0x424   :  { %3484 = vmatmul.msk.f32.gmra.mxu2 %vm287_vm3, %v455_v38 }
 0x42c   :  { %3510 = vmatmul.msk.f32.vlgmr.msra.gmra.mxu2 %vm287_vm3, %v983_v20 }
 0x432   :  { %v515_v39 = vpop.f32.mrf.mxu0 }
 0x433   :  { %v516_v40 = vadd.f32 %v515_v39, %v4397_v41 }
 0x434   :  { %3511 = vmatmul.msk.f32.gmra.mxu2 %vm287_vm3, %v985_v23 }
 0x435   :  { %v530_v42 = vsel %vm340_vm4, %v516_v40, -inf }
 0x436   :  { %531 = vmax.xlane.f32.xlu1 %v530_v42 }
 0x43a   :  { %v518_v43 = vpop.f32.mrf.mxu0 }
 0x43b   :  { %v519_v44 = vadd.f32 %v518_v43, %v4401_v45 }
 0x43c   :  { %3512 = vmatmul.msk.f32.gmra.mxu2 %vm287_vm3, %v987_v28 }
 0x43d   :  { %v533_v46 = vsel %vm340_vm4, %v519_v44, -inf }
 0x43e   :  { %534 = vmax.xlane.f32.xlu2 %v533_v46 }
 0x442   :  { %v521_v47 = vpop.f32.mrf.mxu0 }
 0x443   :  { %v4559_v48 = vadd.f32 %v521_v47, %v4405_v49 }
 0x444   :  { %3513 = vmatmul.msk.f32.gmra.mxu2 %vm287_vm3, %v989_v30 }
 0x445   :  { %v536_v50 = vsel %vm340_vm4, %v4559_v48, -inf }
 0x446   :  { %537 = vmax.xlane.f32.xlu0 %v536_v50 }
 0x44a   :  { %v524_v51 = vpop.f32.mrf.mxu0 }
 0x44b   :  { %v525_v54 = vadd.f32 %v524_v51, %v4409_v53 }
 0x44c   :  { %3514 = vmatmul.msk.f32.gmra.mxu2 %vm287_vm3, %v991_v52 }
 0x44d   :  { %v539_v55 = vsel %vm340_vm4, %v525_v54, -inf }
 0x44e   :  { %540 = vmax.xlane.f32.xlu1 %v539_v55 }
 0x452   :  { %v527_v56 = vpop.f32.mrf.mxu0 }
 0x453   :  { %v4568_v32 = vadd.f32 %v527_v56, %v4413_v57 }
 0x455   :  { %v542_v58 = vsel %vm340_vm4, %v4568_v32, -inf }
 0x456   :  { %543 = vmax.xlane.f32.xlu2 %v542_v58 }
 0x45a   :  { %v798_v59 = vpop.f32.mrf.mxu0 }
 0x45b   :  { %v4573_v35 = vadd.f32 %v798_v59, %v4397_v41 }
 0x45d   :  { %v813_v60 = vsel %vm340_vm4, %v4573_v35, -inf }
 0x45e   :  { %814 = vmax.xlane.f32.xlu0 %v813_v60 }
 0x462   :  { %v801_v63 = vpop.f32.mrf.mxu0 }
 0x463   :  { %v4578_v0 = vadd.f32 %v801_v63, %v4401_v45 }
 0x465   :  { %v816_v1 = vsel %vm340_vm4, %v4578_v0, -inf }
 0x466   :  { %817 = vmax.xlane.f32.xlu1 %v816_v1 }
 0x46a   :  { %v804_v2 = vpop.f32.mrf.mxu0 }
 0x46b   :  { %v4583_v34 = vadd.f32 %v804_v2, %v4405_v49 }
 0x46d   :  { %v819_v3 = vsel %vm340_vm4, %v4583_v34, -inf }
 0x46e   :  { %820 = vmax.xlane.f32.xlu2 %v819_v3 }
 0x472   :  { %v807_v5 = vpop.f32.mrf.mxu0 }
 0x473   :  { %v4594_v6 = vadd.f32 %v807_v5, %v4409_v53 }
 0x474   :  { %v4591_v4 = vpop.f32.mrf.mxu2 }
 0x475   :  { %v822_v8 = vsel %vm340_vm4, %v4594_v6, -inf }
 0x47a   :  { %v810_v9 = vpop.f32.mrf.mxu0 }
 0x47b   :  { %v4601_v13 = vadd.f32 %v810_v9, %v4413_v57 }
 0x47c   :  { %v4596_v7 = vpop.f32.mrf.mxu2 }
 0x47d   :  { %v825_v17 = vsel %vm340_vm4, %v4601_v13, -inf }
 0x47f   :  { %3704 = vrot.lane.b32.xlu1 %v4419_v61, %s4155_s26 }
 0x484   :  { %v4603_v16 = vpop.f32.mrf.mxu2 }
 0x486   :  { %3709 = vrot.lane.b32.xlu2 %v4425_v62, %s4155_s26 }
 0x48c   :  { %v4611_v26 = vpop.f32.mrf.mxu2 }
 0x4a7   :  { %v4617_v33 = vpop.f32.mrf.mxu2 }
 0x4a9   :  { %v532_v10 = vpop.xlane.xlu1 %531  ;;  %823 = vmax.xlane.f32.xlu1 %v822_v8 }
 0x4aa   :  { %v545_v11 = vsub.f32 %v516_v40, %v532_v10 }
 0x4ac   :  { %v550_v14 = vmul.f32 1.442695, %v545_v11 }
 0x4ae   :  { %3816 = vpow2.f32 %v550_v14 }
 0x4af   :  { %v1039_v39 = vpop.f32.mrf.mxu2 }
 0x4b1   :  { %826 = vmax.xlane.f32.xlu1 %v825_v17  ;;  %v535_v19 = vpop.xlane.xlu2 %534 }
 0x4b2   :  { %v546_v20 = vsub.f32 %v519_v44, %v535_v19 }
 0x4b4   :  { %v4607_v22 = vpop.eup %3816  ;;  %v552_v23 = vmul.f32 1.442695, %v546_v20 }
 0x4b5   :  { %v560_v25 = vsel %vm340_vm4, %v4607_v22, 0.0 }
 0x4b6   :  { %3818 = vpow2.f32 %v552_v23  ;;  %561 = vadd.xlane.f32.xlu0 %v560_v25 }
 0x4b7   :  { %v4627_v42 = vpop.f32.mrf.mxu2 }
 0x4b9   :  { %v538_v46 = vpop.xlane.xlu0 %537 }
 0x4ba   :  { %v547_v50 = vsub.f32 %v4559_v48, %v538_v46 }
 0x4bc   :  { %v4613_v28 = vpop.eup %3818  ;;  %v554_v52 = vmul.f32 1.442695, %v547_v50 }
 0x4bd   :  { %v563_v29 = vsel %vm340_vm4, %v4613_v28, 0.0 }
 0x4be   :  { %564 = vadd.xlane.f32.xlu0 %v563_v29 }
 0x4bf   :  { %v1045_v43 = vpop.f32.mrf.mxu2 }
 0x4c1   :  { %v541_v31 = vpop.xlane.xlu1 %540 }
 0x4c2   :  { %v548_v36 = vsub.f32 %v525_v54, %v541_v31  ;;  %v4673_v31 = vadd.f32 %v1045_v43, %v4405_v49 }
 0x4c4   :  { %v556_v37 = vmul.f32 1.442695, %v548_v36  ;;  %v1060_v36 = vsel %vm340_vm4, %v4673_v31, -inf }
 0x4c6   :  { %3820 = vpow2.f32 %v556_v37 }
 0x4c7   :  { %v1048_v51 = vpop.f32.mrf.mxu2  ;;  %3822 = vpow2.f32 %v554_v52 }
 0x4c8   :  { %v4635_v54 = vadd.f32 %v1048_v51, %v4409_v53 }
 0x4c9   :  { %v544_v44 = vpop.xlane.xlu2 %543 }
 0x4ca   :  { %3714 = vrot.lane.b32.xlu1 %v4419_v61, %s5822_s30  ;;  %v549_v56 = vsub.f32 %v4568_v32, %v544_v44  ;;  %v1063_v60 = vsel %vm340_vm4, %v4635_v54, -inf }
 0x4cc   :  { %v4621_v38 = vpop.eup %3820  ;;  %v558_v2 = vmul.f32 1.442695, %v549_v56 }
 0x4cd   :  { %v569_v40 = vsel %vm340_vm4, %v4621_v38, 0.0  ;;  %v4643_v53 = vpop.eup %3822 }
 0x4ce   :  { %570 = vadd.xlane.f32.xlu2 %v569_v40  ;;  %3824 = vpow2.f32 %v558_v2  ;;  %v566_v8 = vsel %vm340_vm4, %v4643_v53, 0.0 }
 0x4cf   :  { %v1051_v63 = vpop.f32.mrf.mxu2 }
 0x4d0   :  { %v4641_v3 = vadd.f32 %v1051_v63, %v4413_v57 }
 0x4d1   :  { %v815_v32 = vpop.xlane.xlu0 %814 }
 0x4d2   :  { %585 = vrot.lane.b32.xlu0 %v4362_v27, %s4155_s26  ;;  %v1066_v9 = vsel %vm340_vm4, %v4641_v3, -inf  ;;  %v828_v10 = vsub.f32 %v4573_v35, %v815_v32 }
 0x4d4   :  { %v4650_v11 = vpop.eup %3824  ;;  %v833_v57 = vmul.f32 1.442695, %v828_v10 }
 0x4d5   :  { %v572_v14 = vsel %vm340_vm4, %v4650_v11, 0.0 }
 0x4d6   :  { %3826 = vpow2.f32 %v833_v57 }
 0x4d9   :  { %v818_v47 = vpop.xlane.xlu1 %817 }
 0x4da   :  { %v829_v17 = vsub.f32 %v4578_v0, %v818_v47  ;;  %v4668_v0 = vadd.f32 %v1039_v39, %v4397_v41  ;;  %v4683_v41 = vadd.f32 %v4627_v42, %v4401_v45 }
 0x4dc   :  { %v835_v19 = vmul.f32 1.442695, %v829_v17  ;;  %v4655_v20 = vpop.eup %3826  ;;  %v1054_v29 = vsel %vm340_vm4, %v4668_v0, -inf  ;;  %v1057_v49 = vsel %vm340_vm4, %v4683_v41, -inf }
 0x4dd   :  { %v843_v23 = vsel %vm340_vm4, %v4655_v20, 0.0 }
 0x4de   :  { %3828 = vpow2.f32 %v835_v19 }
 0x4e1   :  { %v4631_v30 = vpop.xlane.xlu2 %820 }
 0x4e2   :  { %v830_v42 = vsub.f32 %v4583_v34, %v4631_v30 }
 0x4e4   :  { %v4659_v25 = vpop.eup %3828  ;;  %v837_v56 = vmul.f32 1.442695, %v830_v42 }
 0x4e5   :  { %v846_v35 = vsel %vm340_vm4, %v4659_v25, 0.0 }
 0x4e6   :  { %868 = vrot.lane.b32.xlu2 %v4362_v27, %s5822_s30 }
 0x4e9   :  { %v3710_v59 = vpop.permute.xlu2 %3709 }
 0x4ea   :  { %v3711_v48 = vunpack.i.l.bf16 %v3710_v59  ;;  %v3712_v5 = vunpack.i.h.bf16 %v3710_v59 }
 0x4f1   :  { %v3705_v55 = vpop.permute.xlu1 %3704 }
 0x4f2   :  { %v3706_v58 = vunpack.i.l.bf16 %v3705_v55  ;;  %v3707_v1 = vunpack.i.h.bf16 %v3705_v55 }
 0x4f4   :  { %626 = vmatpush.msrb.mxu1 %v3706_v58  ;;  %1064 = vmax.xlane.f32.xlu1 %v1063_v60 }
 0x4f6   :  { %627 = vmatpush.msrb.mxu1 %v3707_v1 }
 0x4f8   :  { %628 = vmatpush.msrb.mxu1 %v3711_v48 }
 0x4fa   :  { %629 = vmatpush.msrb.mxu1 %v3712_v5 }
 0x4fc   :  { %567 = vadd.xlane.f32.xlu0 %v566_v8  ;;  %1067 = vmax.xlane.f32.xlu1 %v1066_v9 }
 0x504   :  { %573 = vadd.xlane.f32.xlu0 %v572_v14 }
 0x50f   :  { %844 = vadd.xlane.f32.xlu2 %v843_v23 }
 0x515   :  { %3729 = vrot.lane.b32.xlu1 %v4425_v62, %s5820_s3 }
 0x517   :  { %847 = vadd.xlane.f32.xlu2 %v846_v35 }
 0x518   :  { %3719 = vrot.lane.b32.xlu0 %v4425_v62, %s5822_s30  ;;  %s5851_s30 = sld [smem:[#allocation27_spill]] }
 0x51c   :  { %v4677_v37 = vpop.xlane.xlu1 %823 }
 0x51f   :  { %1055 = vmax.xlane.f32.xlu2 %v1054_v29 }
 0x524   :  { %v4679_v44 = vpop.xlane.xlu1 %826 }
 0x527   :  { %1061 = vmax.xlane.f32.xlu2 %v1060_v36 }
 0x529   :  { %v562_v40 = vpop.xlane.xlu0 %561 }
 0x52a   :  { %3830 = vrcp.f32 %v562_v40 }
 0x530   :  { %v3831_v39 = vpop.eup %3830 }
 0x531   :  { %v565_v62 = vpop.xlane.xlu0 %564  ;;  %v580_v47 = vmul.f32 %v3831_v39, %v4607_v22 }
 0x532   :  { %3832 = vrcp.f32 %v565_v62  ;;  %v269_v62 = vld [vmem:[#allocation7 + $0x8] sm:$0xff] }
 0x533   :  { %677 = vmatpush.msrb.mxu3 %v269_v62 }
 0x538   :  { %v3833_v52 = vpop.eup %3832 }
 0x539   :  { %v581_v45 = vmul.f32 %v3833_v52, %v4613_v28 }
 0x53c   :  { %v3715_v43 = vpop.permute.xlu1 %3714 }
 0x53d   :  { %v3716_v50 = vunpack.i.l.bf16 %v3715_v43  ;;  %v3717_v51 = vunpack.i.h.bf16 %v3715_v43 }
 0x541   :  { %v571_v22 = vpop.xlane.xlu2 %570 }
 0x542   :  { %1058 = vmax.xlane.f32.xlu0 %v1057_v49 }
 0x544   :  { %v586_v46 = vpop.permute.xlu0 %585 }
 0x545   :  { %630 = vmatpush.msrb.mxu1 %v586_v46  ;;  %v832_v46 = vsub.f32 %v4601_v13, %v4679_v44 }
 0x546   :  { %3470 = vmatmul.msk.f32.vlgmr.msrb.gmra.mxu1 %vm340_vm4, %v580_v47 }
 0x547   :  { %909 = vmatpush.msra.mxu1 %v3716_v50  ;;  %v841_v50 = vmul.f32 1.442695, %v832_v46 }
 0x549   :  { %910 = vmatpush.msra.mxu1 %v3717_v51  ;;  %v869_v28 = vpop.permute.xlu2 %868 }
 0x54e   :  { %3471 = vmatmul.msk.f32.gmra.mxu1 %vm340_vm4, %v581_v45 }
 0x556   :  { %3724 = vrot.lane.b32.xlu0 %v4419_v61, %s5820_s3 }
 0x567   :  { %v1065_v19 = vpop.xlane.xlu1 %1064 }
 0x56f   :  { %v568_v55 = vpop.xlane.xlu0 %567  ;;  %v1068_v51 = vpop.xlane.xlu1 %1067 }
 0x570   :  { %3834 = vrcp.f32 %v568_v55  ;;  %v1073_v45 = vsub.f32 %v4641_v3, %v1068_v51 }
 0x571   :  { %3836 = vpow2.f32 %v837_v56 }
 0x572   :  { %3838 = vrcp.f32 %v571_v22  ;;  %v1082_v22 = vmul.f32 1.442695, %v1073_v45 }
 0x576   :  { %v3835_v58 = vpop.eup %3834 }
 0x577   :  { %v582_v59 = vmul.f32 %v3835_v58, %v4643_v53  ;;  %v4697_v60 = vpop.eup %3836  ;;  %v574_v63 = vpop.xlane.xlu0 %573 }
 0x578   :  { %v3839_v1 = vpop.eup %3838  ;;  %3840 = vrcp.f32 %v574_v63  ;;  %v849_v61 = vsel %vm340_vm4, %v4697_v60, 0.0  ;;  %v831_v63 = vsub.f32 %v4594_v6, %v4677_v37 }
 0x579   :  { %3472 = vmatmul.msk.f32.gmra.mxu1 %vm340_vm4, %v582_v59  ;;  %v583_v34 = vmul.f32 %v3839_v1, %v4621_v38 }
 0x57e   :  { %v3841_v2 = vpop.eup %3840 }
 0x57f   :  { %v584_v48 = vmul.f32 %v3841_v2, %v4650_v11 }
 0x580   :  { %850 = vadd.xlane.f32.xlu0 %v849_v61 }
 0x581   :  { %3473 = vmatmul.msk.f32.gmra.mxu1 %vm340_vm4, %v583_v34  ;;  %v839_v34 = vmul.f32 1.442695, %v831_v63  ;;  %v3777_v63 = vld [vmem:[%s5801_s10] ss:$0 sm:$0xff] }
 0x582   :  { %v845_v30 = vpop.xlane.xlu2 %844 }
 0x583   :  { %3842 = vrcp.f32 %v845_v30 }
 0x587   :  { %v3730_v56 = vpop.permute.xlu1 %3729 }
 0x588   :  { %v3731_v3 = vunpack.i.l.bf16 %v3730_v56  ;;  %v3732_v1 = vunpack.i.h.bf16 %v3730_v56 }
 0x589   :  { %3474 = vmatmul.msk.f32.gmra.mxu1 %vm340_vm4, %v584_v48  ;;  %v3843_v8 = vpop.eup %3842  ;;  %v270_v48 = vld [vmem:[#allocation7 + $0x10] sm:$0xff] }
 0x58a   :  { %v3720_v53 = vpop.permute.xlu0 %3719  ;;  %v848_v5 = vpop.xlane.xlu2 %847  ;;  %v863_v38 = vmul.f32 %v3843_v8, %v4655_v20  ;;  %v1072_v20 = vsub.f32 %v4635_v54, %v1065_v19  ;;  %960 = vmatpush.msra.mxu3 %v270_v48 }
 0x58b   :  { %v3721_v32 = vunpack.i.l.bf16 %v3720_v53  ;;  %v3722_v9 = vunpack.i.h.bf16 %v3720_v53  ;;  %3844 = vrcp.f32 %v848_v5 }
 0x58d   :  { %911 = vmatpush.msra.mxu1 %v3721_v32 }
 0x58f   :  { %912 = vmatpush.msra.mxu1 %v3722_v9 }
 0x591   :  { %913 = vmatpush.msra.mxu1 %v869_v28  ;;  %v3845_v14 = vpop.eup %3844 }
 0x592   :  { %3495 = vmatmul.msk.f32.vlgmr.msra.gmra.mxu1 %vm340_vm4, %v863_v38  ;;  %v1056_v10 = vpop.xlane.xlu2 %1055  ;;  %v864_v17 = vmul.f32 %v3845_v14, %v4659_v25 }
 0x593   :  { %v1069_v57 = vsub.f32 %v4668_v0, %v1056_v10  ;;  %v1080_v0 = vmul.f32 1.442695, %v1072_v20 }
 0x595   :  { %v1074_v11 = vmul.f32 1.442695, %v1069_v57 }
 0x597   :  { %3846 = vpow2.f32 %v1074_v11 }
 0x59a   :  { %3496 = vmatmul.msk.f32.gmra.mxu1 %vm340_vm4, %v864_v17  ;;  %v1062_v23 = vpop.xlane.xlu2 %1061 }
 0x59b   :  { %v1071_v35 = vsub.f32 %v4673_v31, %v1062_v23 }
 0x59d   :  { %v4711_v29 = vpop.eup %3846  ;;  %v1078_v36 = vmul.f32 1.442695, %v1071_v35 }
 0x59e   :  { %v1084_v40 = vsel %vm340_vm4, %v4711_v29, 0.0 }
 0x59f   :  { %3848 = vpow2.f32 %v1078_v36  ;;  %1085 = vadd.xlane.f32.xlu2 %v1084_v40 }
 0x5a0   :  { %3850 = vpow2.f32 %v1080_v0 }
 0x5a5   :  { %v4716_v25 = vpop.eup %3848 }
 0x5a6   :  { %v1090_v39 = vsel %vm340_vm4, %v4716_v25, 0.0  ;;  %v4720_v31 = vpop.eup %3850 }
 0x5a7   :  { %1091 = vadd.xlane.f32.xlu0 %v1090_v39  ;;  %v1093_v54 = vsel %vm340_vm4, %v4720_v31, 0.0 }
 0x5af   :  { %1094 = vadd.xlane.f32.xlu0 %v1093_v54 }
 0x5b5   :  { %v1059_v49 = vpop.xlane.xlu0 %1058 }
 0x5b6   :  { %v1070_v43 = vsub.f32 %v4683_v41, %v1059_v49 }
 0x5b7   :  { %1109 = vrot.lane.b32.xlu2 %v4362_v27, %s5820_s3  ;;  %s3422_s3 = sshll.u32 %s5851_s30, 4  ;;  %s3423_s3 = int_to_ptr.hbm [resolvable:$true] %s3422_s3 }
 0x5b8   :  { %v1076_v47 = vmul.f32 1.442695, %v1070_v43 }
 0x5ba   :  { %3852 = vpow2.f32 %v1076_v47 }
 0x5bb   :  { %3854 = vpow2.f32 %v841_v50  ;;  %v271_v50 = vld [vmem:[#allocation7 + $0x18] sm:$0xff] }
 0x5bc   :  { %3856 = vpow2.f32 %v1082_v22  ;;  %1201 = vmatpush.msrb.mxu1 %v271_v50 }
 0x5bd   :  { %3858 = vpow2.f32 %v839_v34 }
 0x5c0   :  { %v3853_v52 = vpop.eup %3852 }
 0x5c1   :  { %v1087_v42 = vsel %vm340_vm4, %v3853_v52, 0.0  ;;  %v4732_v41 = vpop.eup %3854 }
 0x5c2   :  { %1088 = vadd.xlane.f32.xlu1 %v1087_v42  ;;  %v855_v44 = vsel %vm340_vm4, %v4732_v41, 0.0  ;;  %v3857_v28 = vpop.eup %3856 }
 0x5c3   :  { %v632_v55 = vpop.f32.mrf.mxu1  ;;  %v1096_v61 = vsel %vm340_vm4, %v3857_v28, 0.0  ;;  %v3859_v30 = vpop.eup %3858 }
 0x5c4   :  { %3475 = vmatmul.msk.f32.vlgmr.msrb.gmra.mxu3 %vm287_vm3, %v632_v55  ;;  %v852_v2 = vsel %vm340_vm4, %v3859_v30, 0.0 }
 0x5c8   :  { %v3725_v27 = vpop.permute.xlu0 %3724 }
 0x5c9   :  { %v3726_v13 = vunpack.i.l.bf16 %v3725_v27  ;;  %v3727_v58 = vunpack.i.h.bf16 %v3725_v27 }
 0x5ca   :  { %856 = vadd.xlane.f32.xlu1 %v855_v44 }
 0x5cb   :  { %v635_v59 = vpop.f32.mrf.mxu1  ;;  %1150 = vmatpush.msrb.mxu0 %v3726_v13 }
 0x5cc   :  { %3476 = vmatmul.msk.f32.gmra.mxu3 %vm287_vm3, %v635_v59 }
 0x5cd   :  { %1151 = vmatpush.msrb.mxu0 %v3727_v58 }
 0x5cf   :  { %1152 = vmatpush.msrb.mxu0 %v3731_v3 }
 0x5d1   :  { %1153 = vmatpush.msrb.mxu0 %v3732_v1 }
 0x5d2   :  { %1097 = vadd.xlane.f32.xlu1 %v1096_v61 }
 0x5e0   :  { %853 = vadd.xlane.f32.xlu2 %v852_v2 }
 0x5f3   :  { %v851_v53 = vpop.xlane.xlu0 %850 }
 0x5f4   :  { %3860 = vrcp.f32 %v851_v53 }
 0x5f6   :  { %v638_v5 = vpop.f32.mrf.mxu1 }
 0x5f7   :  { %3477 = vmatmul.msk.f32.gmra.mxu3 %vm287_vm3, %v638_v5 }
 0x5fa   :  { %v3861_v6 = vpop.eup %3860 }
 0x5fb   :  { %v865_v37 = vmul.f32 %v3861_v6, %v4697_v60 }
 0x5fd   :  { %3497 = vmatmul.msk.f32.gmra.mxu1 %vm340_vm4, %v865_v37 }
 0x5fe   :  { %v641_v32 = vpop.f32.mrf.mxu1 }
 0x5ff   :  { %3478 = vmatmul.msk.f32.gmra.mxu3 %vm287_vm3, %v641_v32 }
 0x606   :  { %v644_v8 = vpop.f32.mrf.mxu1 }
 0x607   :  { %3479 = vmatmul.msk.f32.gmra.mxu3 %vm287_vm3, %v644_v8 }
 0x60f   :  { %v915_v9 = vpop.f32.mrf.mxu1 }
 0x610   :  { %3500 = vmatmul.msk.f32.vlgmr.msra.gmra.mxu3 %vm287_vm3, %v915_v9 }
 0x612   :  { %v1086_v38 = vpop.xlane.xlu2 %1085 }
 0x613   :  { %3862 = vrcp.f32 %v1086_v38 }
 0x617   :  { %v918_v10 = vpop.f32.mrf.mxu1 }
 0x618   :  { %3501 = vmatmul.msk.f32.gmra.mxu3 %vm287_vm3, %v918_v10 }
 0x619   :  { %v3863_v57 = vpop.eup %3862 }
 0x61a   :  { %v1104_v14 = vmul.f32 %v3863_v57, %v4711_v29  ;;  %v1110_v60 = vpop.permute.xlu2 %1109  ;;  %v1092_v17 = vpop.xlane.xlu0 %1091 }
 0x61b   :  { %1154 = vmatpush.msrb.mxu0 %v1110_v60 }
 0x61c   :  { %3515 = vmatmul.msk.f32.vlgmr.msrb.gmra.mxu0 %vm340_vm4, %v1104_v14 }
 0x622   :  { %v1095_v20 = vpop.xlane.xlu0 %1094 }
 0x635   :  { %v1089_v11 = vpop.xlane.xlu1 %1088 }
 0x636   :  { %3864 = vrcp.f32 %v1089_v11 }
 0x637   :  { %3866 = vrcp.f32 %v1092_v17 }
 0x638   :  { %3868 = vrcp.f32 %v1095_v20 }
 0x63c   :  { %v3865_v19 = vpop.eup %3864 }
 0x63d   :  { %v1105_v23 = vmul.f32 %v3865_v19, %v3853_v52  ;;  %v857_v35 = vpop.xlane.xlu1 %856  ;;  %v3867_v36 = vpop.eup %3866 }
 0x63e   :  { %v1106_v40 = vmul.f32 %v3867_v36, %v4716_v25  ;;  %v3869_v0 = vpop.eup %3868 }
 0x63f   :  { %3516 = vmatmul.msk.f32.gmra.mxu0 %vm340_vm4, %v1105_v23  ;;  %v1107_v62 = vmul.f32 %v3869_v0, %v4720_v31 }
 0x645   :  { %v1098_v29 = vpop.xlane.xlu1 %1097 }
 0x646   :  { %3870 = vrcp.f32 %v1098_v29 }
 0x647   :  { %3517 = vmatmul.msk.f32.gmra.mxu0 %vm340_vm4, %v1106_v40  ;;  %v679_v27 = vpop.f32.mrf.mxu3 }
 0x648   :  { %v727_v3 = vadd.f32 %v4591_v4, %v679_v27  ;;  %v1383_v27 = vld [vmem:[#allocation8 + $0x8] sm:$0xff] }
 0x64c   :  { %v3871_v39 = vpop.eup %3870 }
 0x64d   :  { %v1108_v49 = vmul.f32 %v3871_v39, %v3857_v28 }
 0x64f   :  { %3518 = vmatmul.msk.f32.gmra.mxu0 %vm340_vm4, %v1107_v62  ;;  %v682_v13 = vpop.f32.mrf.mxu3 }
 0x650   :  { %v730_v5 = vadd.f32 %v4596_v7, %v682_v13 }
 0x653   :  { %v854_v54 = vpop.xlane.xlu2 %853 }
 0x654   :  { %3872 = vrcp.f32 %v854_v54 }
 0x655   :  { %3874 = vrcp.f32 %v857_v35 }
 0x657   :  { %3519 = vmatmul.msk.f32.gmra.mxu0 %vm340_vm4, %v1108_v49 }
 0x65a   :  { %v3873_v43 = vpop.eup %3872 }
 0x65b   :  { %v866_v46 = vmul.f32 %v3873_v43, %v3859_v30  ;;  %v3875_v25 = vpop.eup %3874 }
 0x65c   :  { %v867_v47 = vmul.f32 %v3875_v25, %v4732_v41 }
 0x65d   :  { %3498 = vmatmul.msk.f32.gmra.mxu1 %vm340_vm4, %v866_v46 }
 0x665   :  { %3499 = vmatmul.msk.f32.gmra.mxu1 %vm340_vm4, %v867_v47 }
 0x67a   :  { %v921_v31 = vpop.f32.mrf.mxu1  ;;  %v685_v44 = vpop.f32.mrf.mxu3 }
 0x67b   :  { %3502 = vmatmul.msk.f32.gmra.mxu3 %vm287_vm3, %v921_v31 }
 0x682   :  { %v688_v56 = vpop.f32.mrf.mxu3 }
 0x683   :  { %v736_v35 = vadd.f32 %v4611_v26, %v688_v56 }
 0x68a   :  { %v691_v58 = vpop.f32.mrf.mxu3 }
 0x693   :  { %v962_v59 = vpop.f32.mrf.mxu3 }
 0x694   :  { %v977_v28 = vadd.f32 %v962_v59, %v727_v3 }
 0x699   :  { %v1156_v51 = vpop.f32.mrf.mxu0 }
 0x69a   :  { %3520 = vmatmul.msk.f32.vlgmr.msrb.gmra.mxu1 %vm287_vm3, %v1156_v51  ;;  %v4158_v51 = vmov 32.0  }
 0x69b   :  { %v965_v53 = vpop.f32.mrf.mxu3  ;;  %3876 = vrcp.f32 %v4158_v51 }
 0x69c   :  { %v978_v6 = vadd.f32 %v965_v53, %v730_v5 }
 0x6bc   :  { %v1159_v52 = vpop.f32.mrf.mxu0 }
 0x6bd   :  { %3521 = vmatmul.msk.f32.gmra.mxu1 %vm287_vm3, %v1159_v52  ;;  %v3877_v52 = vpop.eup %3876 }
 0x6be   :  { %vm1259_vm5 = vweird.f32 %v3877_v52 }
 0x6c4   :  { %v1162_v45 = vpop.f32.mrf.mxu0 }
 0x6c5   :  { %3522 = vmatmul.msk.f32.gmra.mxu1 %vm287_vm3, %v1162_v45  ;;  %v1255_v45 = vmul.f32 32.0, %v3877_v52 }
 0x6cc   :  { %v1165_v42 = vpop.f32.mrf.mxu0 }
 0x6cd   :  { %3523 = vmatmul.msk.f32.gmra.mxu1 %vm287_vm3, %v1165_v42  ;;  %v1256_v42 = vsub.f32 1.0, %v1255_v45 }
 0x6d4   :  { %v1168_v55 = vpop.f32.mrf.mxu0 }
 0x6d5   :  { %3524 = vmatmul.msk.f32.gmra.mxu1 %vm287_vm3, %v1168_v55  ;;  %v1257_v55 = vmul.f32 %v3877_v52, %v1256_v42 }
 0x6da   :  { %v924_v22 = vpop.f32.mrf.mxu1 }
 0x6db   :  { %3503 = vmatmul.msk.f32.gmra.mxu3 %vm287_vm3, %v924_v22  ;;  %v1258_v22 = vadd.f32 %v3877_v52, %v1257_v55 }
 0x6dd   :  { %v4815_v13 = vsel %vm1259_vm5, %v3877_v52, %v1258_v22 }
 0x6e2   :  { %v927_v41 = vpop.f32.mrf.mxu1 }
 0x6e3   :  { %3504 = vmatmul.msk.f32.gmra.mxu3 %vm287_vm3, %v927_v41  ;;  %v1385_v41 = vld [vmem:[#allocation8 + $0x18] sm:$0xff] }
 0x6e4   :  { %1417 = vmatpush.msrb.mxu3 %v1385_v41 }
 0x6fe   :  { %v968_v9 = vpop.f32.mrf.mxu3 }
 0x717   :  { %v1203_v1 = vpop.f32.mrf.mxu1 }
 0x718   :  { %v1218_v61 = vadd.f32 %v1203_v1, %v977_v28 }
 0x71a   :  { %v1227_v34 = vadd.f32 %v3777_v63, %v1218_v61 }
 0x71c   :  { %v4772_v30 = vadd.f32 %v1227_v34, %v4339_v12  ;;  %v733_v12 = vadd.f32 %v4603_v16, %v685_v44  ;;  %v1382_v44 = vld [vmem:[#allocation8] sm:$0xff] }
 0x71e   :  { %v1239_v2 = vsel %vm220_vm2, %v4772_v30, 0.0  ;;  %v1266_v48 = vmul.f32 %v4772_v30, %v4772_v30  ;;  %v979_v10 = vadd.f32 %v968_v9, %v733_v12 }
 0x71f   :  { %1240 = vadd.xlane.f32.xlu0 %v1239_v2 }
 0x720   :  { %v1271_v4 = vsel %vm220_vm2, %v1266_v48, 0.0 }
 0x721   :  { %1272 = vadd.xlane.f32.xlu2 %v1271_v4 }
 0x73a   :  { %v1206_v37 = vpop.f32.mrf.mxu1 }
 0x73b   :  { %v1219_v32 = vadd.f32 %v1206_v37, %v978_v6  ;;  %v4823_v6 = vld [vmem:[%s5802_s11] ss:$0 sm:$0xff] }
 0x73d   :  { %v1228_v8 = vadd.f32 %v3777_v63, %v1219_v32 }
 0x73f   :  { %v4782_v38 = vadd.f32 %v1228_v8, %v4343_v15  ;;  %v4828_v8 = vld [vmem:[%s5803_s12] ss:$0 sm:$0xff] }
 0x741   :  { %v1242_v57 = vsel %vm220_vm2, %v4782_v38, 0.0  ;;  %v1267_v14 = vmul.f32 %v4782_v38, %v4782_v38 }
 0x742   :  { %v1209_v60 = vpop.f32.mrf.mxu1  ;;  %1243 = vadd.xlane.f32.xlu1 %v1242_v57 }
 0x743   :  { %v1220_v7 = vadd.f32 %v1209_v60, %v979_v10  ;;  %v1274_v11 = vsel %vm220_vm2, %v1267_v14, 0.0 }
 0x744   :  { %1275 = vadd.xlane.f32.xlu0 %v1274_v11 }
 0x745   :  { %v1229_v17 = vadd.f32 %v3777_v63, %v1220_v7 }
 0x747   :  { %v4790_v19 = vadd.f32 %v1229_v17, %v4347_v18  ;;  %v739_v18 = vadd.f32 %v4617_v33, %v691_v58 }
 0x749   :  { %v1245_v15 = vsel %vm220_vm2, %v4790_v19, 0.0  ;;  %v1268_v16 = vmul.f32 %v4790_v19, %v4790_v19 }
 0x74a   :  { %1246 = vadd.xlane.f32.xlu2 %v1245_v15  ;;  %v1212_v20 = vpop.f32.mrf.mxu1 }
 0x74b   :  { %v1277_v23 = vsel %vm220_vm2, %v1268_v16, 0.0 }
 0x74c   :  { %1278 = vadd.xlane.f32.xlu1 %v1277_v23 }
 0x752   :  { %v1215_v46 = vpop.f32.mrf.mxu1 }
 0x75e   :  { %v971_v36 = vpop.f32.mrf.mxu3 }
 0x75f   :  { %v980_v40 = vadd.f32 %v971_v36, %v736_v35 }
 0x761   :  { %v1221_v29 = vadd.f32 %v1212_v20, %v980_v40 }
 0x763   :  { %v1230_v0 = vadd.f32 %v3777_v63, %v1221_v29 }
 0x765   :  { %v4800_v62 = vadd.f32 %v1230_v0, %v4351_v21 }
 0x766   :  { %v974_v39 = vpop.f32.mrf.mxu3 }
 0x767   :  { %v981_v54 = vadd.f32 %v974_v39, %v739_v18  ;;  %v1248_v49 = vsel %vm220_vm2, %v4800_v62, 0.0  ;;  %v1269_v43 = vmul.f32 %v4800_v62, %v4800_v62 }
 0x768   :  { %1249 = vadd.xlane.f32.xlu0 %v1248_v49 }
 0x769   :  { %v1222_v26 = vadd.f32 %v1215_v46, %v981_v54  ;;  %v1280_v25 = vsel %vm220_vm2, %v1269_v43, 0.0 }
 0x76a   :  { %1281 = vadd.xlane.f32.xlu2 %v1280_v25 }
 0x76b   :  { %v1231_v47 = vadd.f32 %v3777_v63, %v1222_v26 }
 0x76d   :  { %v4808_v33 = vadd.f32 %v1231_v47, %v4355_v24  ;;  %v1384_v24 = vld [vmem:[#allocation8 + $0x10] sm:$0xff] }
 0x76e   :  { %1418 = vmatpush.msrb.mxu3 %v1384_v24 }
 0x76f   :  { %v1251_v21 = vsel %vm220_vm2, %v4808_v33, 0.0  ;;  %v1270_v50 = vmul.f32 %v4808_v33, %v4808_v33 }
 0x770   :  { %1252 = vadd.xlane.f32.xlu1 %v1251_v21  ;;  %1419 = vmatpush.msrb.mxu3 %v1383_v27 }
 0x771   :  { %v1283_v31 = vsel %vm220_vm2, %v1270_v50, 0.0 }
 0x772   :  { %1284 = vadd.xlane.f32.xlu0 %v1283_v31  ;;  %1420 = vmatpush.msrb.mxu3 %v1382_v44 }
 0x792   :  { %v1241_v56 = vpop.xlane.xlu0 %1240 }
 0x793   :  { %v1261_v58 = vmul.f32 %v4815_v13, %v1241_v56 }
 0x794   :  { %v1273_v59 = vpop.xlane.xlu2 %1272 }
 0x795   :  { %v1296_v3 = vmul.f32 %v1261_v58, %v1261_v58  ;;  %v1286_v28 = vmul.f32 %v1273_v59, %v4815_v13  ;;  %v1291_v5 = vsub.f32 %v4772_v30, %v1261_v58 }
 0x797   :  { %v1301_v63 = vsub.f32 %v1286_v28, %v1296_v3  ;;  %v1449_v28 = vld [vmem:[%s5806_s15 + $0x38] sm:$0xff] }
 0x798   :  { %1478 = vmatpush.msrb.mxu2 %v1449_v28 }
 0x799   :  { %v1306_v1 = vadd.f32 1e-05, %v1301_v63  ;;  %v1448_v63 = vld [vmem:[%s5806_s15 + $0x30] sm:$0xff] }
 0x79a   :  { %1479 = vmatpush.msrb.mxu2 %v1448_v63 }
 0x79b   :  { %3878 = vrsqrt.f32 %v1306_v1  ;;  %vm1317_vm7 = vweird.f32 %v1306_v1 }
 0x7a1   :  { %v3879_v61 = vpop.eup %3878 }
 0x7a2   :  { %v1312_v34 = vmul.f32 %v3879_v61, %v1306_v1  ;;  %vm1318_vm6 = vweird.f32 %v3879_v61 }
 0x7a3   :  { %vm1319_vm8 = vmor %vm1317_vm7, %vm1318_vm6 }
 0x7a4   :  { %v1313_v2 = vmul.f32 %v3879_v61, %v1312_v34 }
 0x7a6   :  { %v1314_v48 = vmul.f32 0.5, %v1313_v2  ;;  %v1447_v2 = vld [vmem:[%s5806_s15 + $0x28] sm:$0xff] }
 0x7a7   :  { %1480 = vmatpush.msrb.mxu2 %v1447_v2 }
 0x7a8   :  { %v1315_v4 = vsub.f32 1.5, %v1314_v48 }
 0x7aa   :  { %v1316_v53 = vmul.f32 %v3879_v61, %v1315_v4  ;;  %v1446_v4 = vld [vmem:[%s5806_s15 + $0x20] sm:$0xff] }
 0x7ab   :  { %1481 = vmatpush.msrb.mxu2 %v1446_v4 }
 0x7ac   :  { %v1320_v37 = vsel %vm1319_vm8, %v3879_v61, %v1316_v53 }
 0x7ad   :  { %v1361_v32 = vmul.f32 %v1320_v37, %v1291_v5  ;;  %v1445_v37 = vld [vmem:[%s5806_s15 + $0x18] sm:$0xff] }
 0x7ae   :  { %1482 = vmatpush.msrb.mxu2 %v1445_v37 }
 0x7af   :  { %v1369_v9 = vmul.f32 %v4823_v6, %v1361_v32 }
 0x7b1   :  { %v4832_v12 = vadd.f32 %v4828_v8, %v1369_v9 }
 0x7b3   :  { %3525 = vmatmul.msk.f32.vlgmr.msrb.gmra.mxu3 %vm220_vm2, %v4832_v12 }
 0x7b5   :  { %v1244_v30 = vpop.xlane.xlu1 %1243 }
 0x7b6   :  { %v1262_v10 = vmul.f32 %v4815_v13, %v1244_v30 }
 0x7b7   :  { %v1276_v57 = vpop.xlane.xlu0 %1275 }
 0x7b8   :  { %v1297_v14 = vmul.f32 %v1262_v10, %v1262_v10  ;;  %v1287_v60 = vmul.f32 %v1276_v57, %v4815_v13  ;;  %v1292_v46 = vsub.f32 %v4782_v38, %v1262_v10 }
 0x7ba   :  { %v1302_v7 = vsub.f32 %v1287_v60, %v1297_v14 }
 0x7bc   :  { %v1307_v11 = vadd.f32 1e-05, %v1302_v7 }
 0x7bd   :  { %v1247_v17 = vpop.xlane.xlu2 %1246 }
 0x7be   :  { %3880 = vrsqrt.f32 %v1307_v11  ;;  %v1263_v15 = vmul.f32 %v4815_v13, %v1247_v17  ;;  %vm1327_vm10 = vweird.f32 %v1307_v11 }
 0x7bf   :  { %v1279_v16 = vpop.xlane.xlu1 %1278 }
 0x7c0   :  { %v1298_v23 = vmul.f32 %v1263_v15, %v1263_v15  ;;  %v1288_v35 = vmul.f32 %v1279_v16, %v4815_v13  ;;  %v1293_v45 = vsub.f32 %v4790_v19, %v1263_v15 }
 0x7c2   :  { %v1303_v20 = vsub.f32 %v1288_v35, %v1298_v23 }
 0x7c4   :  { %v3881_v36 = vpop.eup %3880  ;;  %v1308_v40 = vadd.f32 1e-05, %v1303_v20 }
 0x7c5   :  { %v1322_v29 = vmul.f32 %v3881_v36, %v1307_v11  ;;  %vm1328_vm9 = vweird.f32 %v3881_v36 }
 0x7c6   :  { %3882 = vrsqrt.f32 %v1308_v40  ;;  %vm1329_vm11 = vmor %vm1327_vm10, %vm1328_vm9  ;;  %vm1337_vm13 = vweird.f32 %v1308_v40  ;;  %vm1454_vm9 = vcmask 523264  }
 0x7c7   :  { %v1323_v0 = vmul.f32 %v3881_v36, %v1322_v29 }
 0x7c9   :  { %v1324_v18 = vmul.f32 0.5, %v1323_v0 }
 0x7cb   :  { %v1325_v39 = vsub.f32 1.5, %v1324_v18 }
 0x7cc   :  { %v3883_v54 = vpop.eup %3882 }
 0x7cd   :  { %v1326_v49 = vmul.f32 %v3881_v36, %v1325_v39  ;;  %v1332_v43 = vmul.f32 %v3883_v54, %v1308_v40  ;;  %vm1338_vm12 = vweird.f32 %v3883_v54  ;;  %v1444_v39 = vld [vmem:[%s5806_s15 + $0x10] sm:$0xff] }
 0x7ce   :  { %vm1339_vm14 = vmor %vm1337_vm13, %vm1338_vm12  ;;  %1483 = vmatpush.msrb.mxu2 %v1444_v39 }
 0x7cf   :  { %v1333_v26 = vmul.f32 %v3883_v54, %v1332_v43  ;;  %v1330_v25 = vsel %vm1329_vm11, %v3881_v36, %v1326_v49 }
 0x7d0   :  { %v1362_v47 = vmul.f32 %v1330_v25, %v1292_v46 }
 0x7d1   :  { %v1334_v21 = vmul.f32 0.5, %v1333_v26 }
 0x7d2   :  { %v1370_v50 = vmul.f32 %v4823_v6, %v1362_v47 }
 0x7d3   :  { %v1335_v31 = vsub.f32 1.5, %v1334_v21 }
 0x7d4   :  { %v4843_v51 = vadd.f32 %v4828_v8, %v1370_v50 }
 0x7d5   :  { %v1336_v52 = vmul.f32 %v3883_v54, %v1335_v31 }
 0x7d6   :  { %3526 = vmatmul.msk.f32.gmra.mxu3 %vm220_vm2, %v4843_v51 }
 0x7d7   :  { %v1340_v38 = vsel %vm1339_vm14, %v3883_v54, %v1336_v52 }
 0x7d8   :  { %v1363_v42 = vmul.f32 %v1340_v38, %v1293_v45 }
 0x7da   :  { %v1371_v55 = vmul.f32 %v4823_v6, %v1363_v42 }
 0x7db   :  { %v1250_v22 = vpop.xlane.xlu0 %1249 }
 0x7dc   :  { %v1264_v41 = vmul.f32 %v4815_v13, %v1250_v22  ;;  %v4851_v24 = vadd.f32 %v4828_v8, %v1371_v55  ;;  %v3781_v22 = vld [vmem:[%s5807_s16] ss:$0 sm:$0xff] }
 0x7dd   :  { %v1282_v27 = vpop.xlane.xlu2 %1281 }
 0x7de   :  { %v1299_v44 = vmul.f32 %v1264_v41, %v1264_v41  ;;  %v1289_v56 = vmul.f32 %v1282_v27, %v4815_v13  ;;  %3527 = vmatmul.msk.f32.gmra.mxu3 %vm220_vm2, %v4851_v24  ;;  %v1294_v7 = vsub.f32 %v4800_v62, %v1264_v41 }
 0x7e0   :  { %v1304_v19 = vsub.f32 %v1289_v56, %v1299_v44 }
 0x7e2   :  { %v1309_v58 = vadd.f32 1e-05, %v1304_v19 }
 0x7e3   :  { %v1253_v59 = vpop.xlane.xlu1 %1252 }
 0x7e4   :  { %3884 = vrsqrt.f32 %v1309_v58  ;;  %v1265_v3 = vmul.f32 %v4815_v13, %v1253_v59  ;;  %vm1347_vm1 = vweird.f32 %v1309_v58 }
 0x7e5   :  { %v1285_v1 = vpop.xlane.xlu0 %1284 }
 0x7e6   :  { %v1300_v61 = vmul.f32 %v1265_v3, %v1265_v3  ;;  %v1290_v34 = vmul.f32 %v1285_v1, %v4815_v13  ;;  %v1295_v40 = vsub.f32 %v4808_v33, %v1265_v3  ;;  %v1443_v33 = vld [vmem:[%s5806_s15 + $0x8] sm:$0xff] }
 0x7e7   :  { %1484 = vmatpush.msrb.mxu2 %v1443_v33 }
 0x7e8   :  { %v1305_v48 = vsub.f32 %v1290_v34, %v1300_v61 }
 0x7ea   :  { %v3885_v53 = vpop.eup %3884  ;;  %v1310_v5 = vadd.f32 1e-05, %v1305_v48 }
 0x7eb   :  { %v1342_v32 = vmul.f32 %v3885_v53, %v1309_v58  ;;  %vm1348_vm15 = vweird.f32 %v3885_v53 }
 0x7ec   :  { %3886 = vrsqrt.f32 %v1310_v5  ;;  %vm1349_vm5 = vmor %vm1347_vm1, %vm1348_vm15  ;;  %vm1357_vm7 = vweird.f32 %v1310_v5 }
 0x7ed   :  { %v1343_v9 = vmul.f32 %v3885_v53, %v1342_v32 }
 0x7ef   :  { %v1344_v30 = vmul.f32 0.5, %v1343_v9 }
 0x7f1   :  { %v1345_v10 = vsub.f32 1.5, %v1344_v30 }
 0x7f2   :  { %v3887_v57 = vpop.eup %3886 }
 0x7f3   :  { %v1346_v14 = vmul.f32 %v3885_v53, %v1345_v10  ;;  %v1352_v60 = vmul.f32 %v3887_v57, %v1310_v5  ;;  %vm1358_vm6 = vweird.f32 %v3887_v57 }
 0x7f4   :  { %vm1359_vm8 = vmor %vm1357_vm7, %vm1358_vm6 }
 0x7f5   :  { %v1353_v11 = vmul.f32 %v3887_v57, %v1352_v60  ;;  %v1350_v17 = vsel %vm1349_vm5, %v3885_v53, %v1346_v14 }
 0x7f6   :  { %v1364_v15 = vmul.f32 %v1350_v17, %v1294_v7  ;;  %v3537_v17 = vld [vmem:[%s5842_s28 + $0x30] sm:$0xff] }
 0x7f7   :  { %v1354_v16 = vmul.f32 0.5, %v1353_v11  ;;  %v3538_v11 = vld [vmem:[%s5842_s28 + $0x38] sm:$0xff] }
 0x7f8   :  { %v1372_v23 = vmul.f32 %v4823_v6, %v1364_v15  ;;  %1682 = vmatpush.msra.mxu0 %v3538_v11  ;;  %v3536_v15 = vld [vmem:[%s5842_s28 + $0x28] sm:$0xff] }
 0x7f9   :  { %v1355_v35 = vsub.f32 1.5, %v1354_v16  ;;  %v3535_v16 = vld [vmem:[%s5842_s28 + $0x20] sm:$0xff] }
 0x7fa   :  { %v4876_v20 = vadd.f32 %v4828_v8, %v1372_v23  ;;  %1683 = vmatpush.msra.mxu0 %v3537_v17 }
 0x7fb   :  { %v1356_v36 = vmul.f32 %v3887_v57, %v1355_v35 }
 0x7fc   :  { %3528 = vmatmul.msk.f32.gmra.mxu3 %vm220_vm2, %v4876_v20  ;;  %1684 = vmatpush.msra.mxu0 %v3536_v15 }
 0x7fd   :  { %v1360_v62 = vsel %vm1359_vm8, %v3887_v57, %v1356_v36 }
 0x7fe   :  { %v1365_v29 = vmul.f32 %v1360_v62, %v1295_v40  ;;  %1685 = vmatpush.msra.mxu0 %v3535_v16 }
 0x800   :  { %v1373_v0 = vmul.f32 %v4823_v6, %v1365_v29  ;;  %v1442_v6 = vld [vmem:[%s5806_s15] sm:$0xff] }
 0x801   :  { %1485 = vmatpush.msrb.mxu2 %v1442_v6 }
 0x802   :  { %v4883_v18 = vadd.f32 %v4828_v8, %v1373_v0  ;;  %v3780_v8 = vld [vmem:[%s5805_s14] ss:$0 sm:$0xff] }
 0x804   :  { %3529 = vmatmul.msk.f32.gmra.mxu3 %vm220_vm2, %v4883_v18 }
 0x836   :  { %v1422_v54 = vpop.f32.mrf.mxu3 }
 0x837   :  { %v1423_v49 = vadd.f32 %v3780_v8, %v1422_v54 }
 0x839   :  { %v1437_v43 = vmax.f32 %v1423_v49, 0.0  ;;  %v4965_v49 = vld [vmem:[%s5808_s17] ss:$0 sm:$0xff] }
 0x83b   :  { %3530 = vmatmul.msk.f32.vlgmr.msrb.gmra.mxu2 %vm1454_vm9, %v1437_v43 }
 0x859   :  { %v1425_v46 = vpop.f32.mrf.mxu3 }
 0x85a   :  { %v1426_v26 = vadd.f32 %v3780_v8, %v1425_v46 }
 0x85c   :  { %v1438_v25 = vmax.f32 %v1426_v26, 0.0  ;;  %v4970_v26 = vld [vmem:[%s5809_s18] ss:$0 sm:$0xff] }
 0x85e   :  { %3531 = vmatmul.msk.f32.gmra.mxu2 %vm1454_vm9, %v1438_v25 }
 0x861   :  { %v1428_v47 = vpop.f32.mrf.mxu3 }
 0x862   :  { %v1429_v21 = vadd.f32 %v3780_v8, %v1428_v47 }
 0x864   :  { %v1439_v50 = vmax.f32 %v1429_v21, 0.0 }
 0x866   :  { %3532 = vmatmul.msk.f32.gmra.mxu2 %vm1454_vm9, %v1439_v50 }
 0x87f   :  { %v1431_v31 = vpop.f32.mrf.mxu3 }
 0x880   :  { %v1432_v52 = vadd.f32 %v3780_v8, %v1431_v31 }
 0x882   :  { %v1440_v45 = vmax.f32 %v1432_v52, 0.0 }
 0x884   :  { %3533 = vmatmul.msk.f32.gmra.mxu2 %vm1454_vm9, %v1440_v45 }
 0x887   :  { %v1434_v38 = vpop.f32.mrf.mxu3 }
 0x888   :  { %v1435_v42 = vadd.f32 %v3780_v8, %v1434_v38 }
 0x88a   :  { %v1441_v55 = vmax.f32 %v1435_v42, 0.0 }
 0x88c   :  { %3534 = vmatmul.msk.f32.gmra.mxu2 %vm1454_vm9, %v1441_v55 }
 0x8be   :  { %v1487_v41 = vpop.f32.mrf.mxu2 }
 0x8bf   :  { %v1488_v27 = vadd.f32 %v3781_v22, %v1487_v41 }
 0x8c1   :  { %v4908_v44 = vadd.f32 %v1488_v27, %v4832_v12 }
 0x8c3   :  { %v1509_v56 = vsel %vm220_vm2, %v4908_v44, 0.0  ;;  %v1529_v19 = vmul.f32 %v4908_v44, %v4908_v44 }
 0x8c4   :  { %1510 = vadd.xlane.f32.xlu2 %v1509_v56 }
 0x8c5   :  { %v1534_v58 = vsel %vm220_vm2, %v1529_v19, 0.0 }
 0x8c6   :  { %1535 = vadd.xlane.f32.xlu1 %v1534_v58 }
 0x8e1   :  { %v1490_v59 = vpop.f32.mrf.mxu2 }
 0x8e2   :  { %v1491_v3 = vadd.f32 %v3781_v22, %v1490_v59 }
 0x8e4   :  { %v4916_v28 = vadd.f32 %v1491_v3, %v4843_v51 }
 0x8e6   :  { %v1512_v63 = vsel %vm220_vm2, %v4916_v28, 0.0  ;;  %v1530_v12 = vmul.f32 %v4916_v28, %v4916_v28 }
 0x8e7   :  { %1513 = vadd.xlane.f32.xlu0 %v1512_v63 }
 0x8e8   :  { %v1537_v1 = vsel %vm220_vm2, %v1530_v12, 0.0 }
 0x8e9   :  { %v1493_v61 = vpop.f32.mrf.mxu2  ;;  %1538 = vadd.xlane.f32.xlu2 %v1537_v1 }
 0x8ea   :  { %v1494_v34 = vadd.f32 %v3781_v22, %v1493_v61 }
 0x8ec   :  { %v4924_v2 = vadd.f32 %v1494_v34, %v4851_v24 }
 0x8ee   :  { %v1515_v48 = vsel %vm220_vm2, %v4924_v2, 0.0  ;;  %v1531_v51 = vmul.f32 %v4924_v2, %v4924_v2 }
 0x8ef   :  { %1516 = vadd.xlane.f32.xlu1 %v1515_v48 }
 0x8f0   :  { %v1540_v4 = vsel %vm220_vm2, %v1531_v51, 0.0 }
 0x8f1   :  { %1541 = vadd.xlane.f32.xlu0 %v1540_v4 }
 0x907   :  { %v1496_v53 = vpop.f32.mrf.mxu2 }
 0x908   :  { %v1497_v5 = vadd.f32 %v3781_v22, %v1496_v53 }
 0x90a   :  { %v4932_v37 = vadd.f32 %v1497_v5, %v4876_v20 }
 0x90c   :  { %v1518_v32 = vsel %vm220_vm2, %v4932_v37, 0.0  ;;  %v1532_v24 = vmul.f32 %v4932_v37, %v4932_v37 }
 0x90d   :  { %1519 = vadd.xlane.f32.xlu2 %v1518_v32 }
 0x90e   :  { %v1543_v9 = vsel %vm220_vm2, %v1532_v24, 0.0 }
 0x90f   :  { %1544 = vadd.xlane.f32.xlu1 %v1543_v9  ;;  %v1499_v30 = vpop.f32.mrf.mxu2 }
 0x910   :  { %v1500_v10 = vadd.f32 %v3781_v22, %v1499_v30 }
 0x912   :  { %v4940_v57 = vadd.f32 %v1500_v10, %v4883_v18 }
 0x914   :  { %v1521_v14 = vsel %vm220_vm2, %v4940_v57, 0.0  ;;  %v1533_v60 = vmul.f32 %v4940_v57, %v4940_v57 }
 0x915   :  { %1522 = vadd.xlane.f32.xlu0 %v1521_v14 }
 0x916   :  { %v1546_v7 = vsel %vm220_vm2, %v1533_v60, 0.0 }
 0x917   :  { %1547 = vadd.xlane.f32.xlu2 %v1546_v7 }
 0x937   :  { %v1511_v23 = vpop.xlane.xlu2 %1510 }
 0x938   :  { %v1524_v35 = vmul.f32 %v1511_v23, %v4815_v13 }
 0x939   :  { %v1536_v20 = vpop.xlane.xlu1 %1535 }
 0x93a   :  { %v1559_v36 = vmul.f32 %v1524_v35, %v1524_v35  ;;  %v1549_v40 = vmul.f32 %v1536_v20, %v4815_v13  ;;  %v1554_v54 = vsub.f32 %v4908_v44, %v1524_v35 }
 0x93c   :  { %v1564_v62 = vsub.f32 %v1549_v40, %v1559_v36 }
 0x93e   :  { %v1569_v29 = vadd.f32 1e-05, %v1564_v62 }
 0x940   :  { %3888 = vrsqrt.f32 %v1569_v29  ;;  %vm1580_vm11 = vweird.f32 %v1569_v29 }
 0x946   :  { %v3889_v0 = vpop.eup %3888 }
 0x947   :  { %v1575_v18 = vmul.f32 %v3889_v0, %v1569_v29  ;;  %vm1581_vm10 = vweird.f32 %v3889_v0 }
 0x948   :  { %vm1582_vm12 = vmor %vm1580_vm11, %vm1581_vm10 }
 0x949   :  { %v1576_v39 = vmul.f32 %v3889_v0, %v1575_v18 }
 0x94b   :  { %v1577_v33 = vmul.f32 0.5, %v1576_v39 }
 0x94d   :  { %v1578_v6 = vsub.f32 1.5, %v1577_v33 }
 0x94f   :  { %v1579_v8 = vmul.f32 %v3889_v0, %v1578_v6 }
 0x951   :  { %v1583_v43 = vsel %vm1582_vm12, %v3889_v0, %v1579_v8 }
 0x952   :  { %v1624_v46 = vmul.f32 %v1583_v43, %v1554_v54 }
 0x954   :  { %v1632_v25 = vmul.f32 %v4965_v49, %v1624_v46 }
 0x956   :  { %v4974_v47 = vadd.f32 %v4970_v26, %v1632_v25 }
 0x958   :  { %3540 = vmatmul.msk.f32.vlgmr.msra.gmra.mxu0 %vm220_vm2, %v4974_v47 }
 0x95a   :  { %v1514_v21 = vpop.xlane.xlu0 %1513 }
 0x95b   :  { %v1525_v50 = vmul.f32 %v1514_v21, %v4815_v13 }
 0x95c   :  { %v1539_v31 = vpop.xlane.xlu2 %1538 }
 0x95d   :  { %v1560_v52 = vmul.f32 %v1525_v50, %v1525_v50  ;;  %v1550_v45 = vmul.f32 %v1539_v31, %v4815_v13  ;;  %v1555_v48 = vsub.f32 %v4916_v28, %v1525_v50 }
 0x95f   :  { %v1565_v38 = vsub.f32 %v1550_v45, %v1560_v52 }
 0x961   :  { %v1570_v42 = vadd.f32 1e-05, %v1565_v38 }
 0x962   :  { %v1517_v55 = vpop.xlane.xlu1 %1516 }
 0x963   :  { %3890 = vrsqrt.f32 %v1570_v42  ;;  %v1526_v22 = vmul.f32 %v1517_v55, %v4815_v13  ;;  %vm1590_vm14 = vweird.f32 %v1570_v42 }
 0x964   :  { %v1542_v41 = vpop.xlane.xlu0 %1541 }
 0x965   :  { %v1561_v27 = vmul.f32 %v1526_v22, %v1526_v22  ;;  %v1551_v44 = vmul.f32 %v1542_v41, %v4815_v13  ;;  %v1556_v10 = vsub.f32 %v4924_v2, %v1526_v22 }
 0x967   :  { %v1566_v56 = vsub.f32 %v1551_v44, %v1561_v27 }
 0x969   :  { %v3891_v19 = vpop.eup %3890  ;;  %v1571_v58 = vadd.f32 1e-05, %v1566_v56 }
 0x96a   :  { %v1585_v59 = vmul.f32 %v3891_v19, %v1570_v42  ;;  %vm1591_vm13 = vweird.f32 %v3891_v19 }
 0x96b   :  { %3892 = vrsqrt.f32 %v1571_v58  ;;  %vm1592_vm15 = vmor %vm1590_vm14, %vm1591_vm13  ;;  %vm1600_vm5 = vweird.f32 %v1571_v58 }
 0x96c   :  { %v1586_v3 = vmul.f32 %v3891_v19, %v1585_v59 }
 0x96e   :  { %v1587_v63 = vmul.f32 0.5, %v1586_v3 }
 0x970   :  { %v1588_v12 = vsub.f32 1.5, %v1587_v63 }
 0x971   :  { %v3893_v1 = vpop.eup %3892 }
 0x972   :  { %v1589_v61 = vmul.f32 %v3891_v19, %v1588_v12  ;;  %v1595_v34 = vmul.f32 %v3893_v1, %v1571_v58  ;;  %vm1601_vm1 = vweird.f32 %v3893_v1 }
 0x973   :  { %vm1602_vm6 = vmor %vm1600_vm5, %vm1601_vm1 }
 0x974   :  { %v1596_v51 = vmul.f32 %v3893_v1, %v1595_v34  ;;  %v1593_v4 = vsel %vm1592_vm15, %v3891_v19, %v1589_v61 }
 0x975   :  { %v1625_v53 = vmul.f32 %v1593_v4, %v1555_v48 }
 0x976   :  { %v1597_v5 = vmul.f32 0.5, %v1596_v51 }
 0x977   :  { %v1633_v32 = vmul.f32 %v4965_v49, %v1625_v53 }
 0x978   :  { %v1598_v24 = vsub.f32 1.5, %v1597_v5 }
 0x979   :  { %v4985_v9 = vadd.f32 %v4970_v26, %v1633_v32  ;;  %v5052_v32 = vld [vmem:[#allocation2] sm:$0xff] }
 0x97a   :  { %v1599_v30 = vmul.f32 %v3893_v1, %v1598_v24 }
 0x97b   :  { %3541 = vmatmul.msk.f32.gmra.mxu0 %vm220_vm2, %v4985_v9 }
 0x97c   :  { %v1603_v28 = vsel %vm1602_vm6, %v3893_v1, %v1599_v30 }
 0x97d   :  { %v1626_v14 = vmul.f32 %v1603_v28, %v1556_v10  ;;  %v5056_v28 = vld [vmem:[#allocation2 + $0x8] sm:$0xff] }
 0x97f   :  { %v1634_v60 = vmul.f32 %v4965_v49, %v1626_v14 }
 0x980   :  { %v1520_v7 = vpop.xlane.xlu2 %1519 }
 0x981   :  { %v1527_v11 = vmul.f32 %v1520_v7, %v4815_v13  ;;  %v4993_v17 = vadd.f32 %v4970_v26, %v1634_v60 }
 0x982   :  { %v1545_v15 = vpop.xlane.xlu1 %1544 }
 0x983   :  { %v1562_v16 = vmul.f32 %v1527_v11, %v1527_v11  ;;  %v1552_v23 = vmul.f32 %v1545_v15, %v4815_v13  ;;  %3542 = vmatmul.msk.f32.gmra.mxu0 %vm220_vm2, %v4993_v17  ;;  %v1557_v21 = vsub.f32 %v4932_v37, %v1527_v11  ;;  %v5060_v11 = vld [vmem:[#allocation2 + $0x10] sm:$0xff] }
 0x985   :  { %v1567_v2 = vsub.f32 %v1552_v23, %v1562_v16 }
 0x987   :  { %v1572_v35 = vadd.f32 1e-05, %v1567_v2  ;;  %v5064_v2 = vld [vmem:[#allocation2 + $0x18] sm:$0xff] }
 0x988   :  { %v1523_v20 = vpop.xlane.xlu0 %1522 }
 0x989   :  { %3894 = vrsqrt.f32 %v1572_v35  ;;  %v1528_v36 = vmul.f32 %v1523_v20, %v4815_v13  ;;  %vm1610_vm8 = vweird.f32 %v1572_v35 }
 0x98a   :  { %v1548_v40 = vpop.xlane.xlu2 %1547 }
 0x98b   :  { %v1563_v62 = vmul.f32 %v1528_v36, %v1528_v36  ;;  %v1553_v29 = vmul.f32 %v1548_v40, %v4815_v13  ;;  %v1558_v41 = vsub.f32 %v4940_v57, %v1528_v36  ;;  %v3784_v57 = vld [vmem:[%s5843_s24 + $0x1] ss:$0 sm:$0xff]  ;;  %s5844_s24 = smov 48  }
 0x98c   :  { %v5068_v40 = vld [vmem:[#allocation2 + $0x20] sm:$0xff] }
 0x98d   :  { %v1568_v0 = vsub.f32 %v1553_v29, %v1563_v62 }
 0x98f   :  { %v3895_v18 = vpop.eup %3894  ;;  %v1573_v39 = vadd.f32 1e-05, %v1568_v0 }
 0x990   :  { %v1605_v33 = vmul.f32 %v3895_v18, %v1572_v35  ;;  %vm1611_vm7 = vweird.f32 %v3895_v18 }
 0x991   :  { %3896 = vrsqrt.f32 %v1573_v39  ;;  %vm1612_vm10 = vmor %vm1610_vm8, %vm1611_vm7  ;;  %vm1620_vm12 = vweird.f32 %v1573_v39 }
 0x992   :  { %v1606_v6 = vmul.f32 %v3895_v18, %v1605_v33 }
 0x994   :  { %v1607_v8 = vmul.f32 0.5, %v1606_v6 }
 0x996   :  { %v1608_v54 = vsub.f32 1.5, %v1607_v8 }
 0x997   :  { %v3897_v43 = vpop.eup %3896 }
 0x998   :  { %v1609_v46 = vmul.f32 %v3895_v18, %v1608_v54  ;;  %v1615_v25 = vmul.f32 %v3897_v43, %v1573_v39  ;;  %vm1621_vm11 = vweird.f32 %v3897_v43 }
 0x999   :  { %vm1622_vm13 = vmor %vm1620_vm12, %vm1621_vm11 }
 0x99a   :  { %v1616_v50 = vmul.f32 %v3897_v43, %v1615_v25  ;;  %v1613_v31 = vsel %vm1612_vm10, %v3895_v18, %v1609_v46 }
 0x99b   :  { %v1627_v52 = vmul.f32 %v1613_v31, %v1557_v21 }
 0x99c   :  { %v1617_v45 = vmul.f32 0.5, %v1616_v50 }
 0x99d   :  { %v1635_v38 = vmul.f32 %v4965_v49, %v1627_v52 }
 0x99e   :  { %v1618_v42 = vsub.f32 1.5, %v1617_v45 }
 0x99f   :  { %v5003_v55 = vadd.f32 %v4970_v26, %v1635_v38 }
 0x9a0   :  { %v1619_v22 = vmul.f32 %v3897_v43, %v1618_v42 }
 0x9a1   :  { %3543 = vmatmul.msk.f32.gmra.mxu0 %vm220_vm2, %v5003_v55 }
 0x9a2   :  { %v1623_v37 = vsel %vm1622_vm13, %v3897_v43, %v1619_v22 }
 0x9a3   :  { %v1628_v27 = vmul.f32 %v1623_v37, %v1558_v41 }
 0x9a5   :  { %v1636_v44 = vmul.f32 %v4965_v49, %v1628_v27 }
 0x9a7   :  { %v5010_v56 = vadd.f32 %v4970_v26, %v1636_v44 }
 0x9a9   :  { %3544 = vmatmul.msk.f32.gmra.mxu0 %vm220_vm2, %v5010_v56 }
 0x9d5   :  { %v1687_v19 = vpop.f32.mrf.mxu0 }
 0x9d6   :  { %v5033_v61 = vadd.f32 %v3784_v57, %v1687_v19 }
 0x9f8   :  { %v1690_v58 = vpop.f32.mrf.mxu0 }
 0x9f9   :  { %v5025_v12 = vadd.f32 %v3784_v57, %v1690_v58 }
 0xa00   :  { %v1693_v59 = vpop.f32.mrf.mxu0 }
 0xa01   :  { %v5017_v3 = vadd.f32 %v3784_v57, %v1693_v59 }
 0xa03   :  { %1716 = vrot.lane.b32.xlu2 %v5017_v3, %s4147_s4  ;;  %v5080_v18 = vpack.i.bf16 %v5025_v12, %v5017_v3 }
 0xa1e   :  { %v1696_v63 = vpop.f32.mrf.mxu0 }
 0xa1f   :  { %v5021_v49 = vadd.f32 %v3784_v57, %v1696_v63 }
 0xa21   :  { %1718 = vrot.lane.b32.xlu0 %v5021_v49, %s4147_s4 }
 0xa26   :  { %v1699_v26 = vpop.f32.mrf.mxu0 }
 0xa27   :  { %v5027_v1 = vadd.f32 %v3784_v57, %v1699_v26 }
 0xa29   :  { %1720 = vrot.lane.b32.xlu1 %v5027_v1, %s4147_s4  ;;  %1714 = vrot.lane.b32.xlu0 %v5025_v12, %s4147_s4  ;;  %v5074_v0 = vpack.i.bf16 %v5021_v49, %v5027_v1 }
 0xa31   :  { %1712 = vrot.lane.b32.xlu1 %v5033_v61, %s4147_s4  ;;  %s5845_s4 = smov 40  }
 0xa5d   :  { %v1717_v51 = vpop.permute.xlu2 %1716 }
 0xa93   :  { %v1719_v48 = vpop.permute.xlu0 %1718 }
 0xa9b   :  { %v1721_v34 = vpop.permute.xlu1 %1720  ;;  %v1715_v4 = vpop.permute.xlu0 %1714 }
 0xa9c   :  { %3545 = vmatpush.xpose.msk.msra.mxu1 %vm287_vm3, %v1721_v34 }
 0xaa0   :  { %3546 = vmatpush.xpose.msk.msra.mxu1 %vm287_vm3, %v1719_v48 }
 0xaa3   :  { %v1713_v53 = vpop.permute.xlu1 %1712 }
 0xaa4   :  { %3547 = vmatpush.xpose.msk.msra.mxu1 %vm287_vm3, %v1717_v51 }
 0xaa8   :  { %3548 = vmatpush.xpose.msk.msra.mxu1 %vm287_vm3, %v1715_v4 }
 0xaac   :  { %3549 = vmatpush.xpose.msk.msra.mxu1 %vm287_vm3, %v1713_v53 }
 0xaaf   :  { %3550 = vmatmul.msk.f32.vlgmr.msra.gmra.mxu1 %vm287_vm3, %v5033_v61 }
 0xab7   :  { %3551 = vmatmul.msk.f32.gmra.mxu1 %vm287_vm3, %v5025_v12 }
 0xabf   :  { %3552 = vmatmul.msk.f32.gmra.mxu1 %vm287_vm3, %v5017_v3 }
 0xac7   :  { %3553 = vmatmul.msk.f32.gmra.mxu1 %vm287_vm3, %v5021_v49 }
 0xacf   :  { %3554 = vmatmul.msk.f32.gmra.mxu1 %vm287_vm3, %v5027_v1 }
 0xb2c   :  { %v1759_v5 = vpop.f32.mrf.mxu1 }
 0xb2d   :  { %v1760_v24 = vadd.f32 %v5052_v32, %v1759_v5 }
 0xb2f   :  { %v1774_v30 = vsel %vm340_vm4, %v1760_v24, -inf }
 0xb30   :  { %1775 = vmax.xlane.f32.xlu2 %v1774_v30 }
 0xb34   :  { %v1762_v10 = vpop.f32.mrf.mxu1 }
 0xb35   :  { %v1763_v14 = vadd.f32 %v5056_v28, %v1762_v10 }
 0xb37   :  { %v1777_v60 = vsel %vm340_vm4, %v1763_v14, -inf }
 0xb38   :  { %1778 = vmax.xlane.f32.xlu0 %v1777_v60 }
 0xb3c   :  { %v1765_v7 = vpop.f32.mrf.mxu1 }
 0xb3d   :  { %v1766_v15 = vadd.f32 %v5060_v11, %v1765_v7 }
 0xb3f   :  { %v1780_v16 = vsel %vm340_vm4, %v1766_v15, -inf }
 0xb40   :  { %1781 = vmax.xlane.f32.xlu1 %v1780_v16 }
 0xb44   :  { %v1768_v23 = vpop.f32.mrf.mxu1 }
 0xb45   :  { %v1769_v35 = vadd.f32 %v5064_v2, %v1768_v23 }
 0xb47   :  { %v1783_v20 = vsel %vm340_vm4, %v1769_v35, -inf }
 0xb48   :  { %1784 = vmax.xlane.f32.xlu2 %v1783_v20 }
 0xb4c   :  { %v1771_v36 = vpop.f32.mrf.mxu1 }
 0xb4d   :  { %v1772_v62 = vadd.f32 %v5068_v40, %v1771_v36 }
 0xb4f   :  { %v1786_v29 = vsel %vm340_vm4, %v1772_v62, -inf }
 0xb50   :  { %1787 = vmax.xlane.f32.xlu0 %v1786_v29 }
 0xb60   :  { %3734 = vrot.lane.b32.xlu2 %v5074_v0, %s4148_s9 }
 0xb64   :  { %3739 = vrot.lane.b32.xlu0 %v5080_v18, %s4148_s9 }
 0xba3   :  { %v1776_v39 = vpop.xlane.xlu2 %1775 }
 0xba4   :  { %v1789_v33 = vsub.f32 %v1760_v24, %v1776_v39 }
 0xba6   :  { %v1794_v6 = vmul.f32 1.442695, %v1789_v33 }
 0xba8   :  { %3898 = vpow2.f32 %v1794_v6 }
 0xbab   :  { %v1779_v8 = vpop.xlane.xlu0 %1778 }
 0xbac   :  { %v1790_v54 = vsub.f32 %v1763_v14, %v1779_v8 }
 0xbae   :  { %v5084_v43 = vpop.eup %3898  ;;  %v1796_v46 = vmul.f32 1.442695, %v1790_v54 }
 0xbaf   :  { %v1804_v25 = vsel %vm340_vm4, %v5084_v43, 0.0 }
 0xbb0   :  { %3900 = vpow2.f32 %v1796_v46  ;;  %1805 = vadd.xlane.f32.xlu1 %v1804_v25 }
 0xbb3   :  { %v1782_v21 = vpop.xlane.xlu1 %1781 }
 0xbb4   :  { %v1791_v50 = vsub.f32 %v1766_v15, %v1782_v21 }
 0xbb6   :  { %v5088_v31 = vpop.eup %3900  ;;  %v1798_v52 = vmul.f32 1.442695, %v1791_v50 }
 0xbb7   :  { %v1807_v45 = vsel %vm340_vm4, %v5088_v31, 0.0 }
 0xbb8   :  { %3902 = vpow2.f32 %v1798_v52  ;;  %1808 = vadd.xlane.f32.xlu1 %v1807_v45 }
 0xbbb   :  { %v1785_v38 = vpop.xlane.xlu2 %1784 }
 0xbbc   :  { %v1792_v42 = vsub.f32 %v1769_v35, %v1785_v38 }
 0xbbe   :  { %v5092_v22 = vpop.eup %3902  ;;  %v1800_v41 = vmul.f32 1.442695, %v1792_v42 }
 0xbbf   :  { %v1810_v37 = vsel %vm340_vm4, %v5092_v22, 0.0 }
 0xbc0   :  { %3904 = vpow2.f32 %v1800_v41  ;;  %1811 = vadd.xlane.f32.xlu0 %v1810_v37 }
 0xbc3   :  { %v3735_v27 = vpop.permute.xlu2 %3734  ;;  %v1788_v59 = vpop.xlane.xlu0 %1787 }
 0xbc4   :  { %v3736_v44 = vunpack.i.l.bf16 %v3735_v27  ;;  %v3737_v58 = vunpack.i.h.bf16 %v3735_v27  ;;  %v1793_v48 = vsub.f32 %v1772_v62, %v1788_v59 }
 0xbc6   :  { %v5096_v19 = vpop.eup %3904  ;;  %1870 = vmatpush.msra.mxu3 %v3736_v44  ;;  %v1802_v51 = vmul.f32 1.442695, %v1793_v48 }
 0xbc7   :  { %v1813_v57 = vsel %vm340_vm4, %v5096_v19, 0.0 }
 0xbc8   :  { %1814 = vadd.xlane.f32.xlu2 %v1813_v57  ;;  %1871 = vmatpush.msra.mxu3 %v3737_v58  ;;  %3906 = vpow2.f32 %v1802_v51 }
 0xbce   :  { %v3907_v4 = vpop.eup %3906 }
 0xbcf   :  { %v1816_v53 = vsel %vm340_vm4, %v3907_v4, 0.0 }
 0xbd1   :  { %1829 = vrot.lane.b32.xlu1 %v5033_v61, %s4148_s9 }
 0xbd4   :  { %1909 = vrot.lane.b32.xlu0 %v5027_v1, %s4149_s5 }
 0xbd6   :  { %v3740_v63 = vpop.permute.xlu0 %3739 }
 0xbd7   :  { %v3741_v26 = vunpack.i.l.bf16 %v3740_v63  ;;  %v3742_v34 = vunpack.i.h.bf16 %v3740_v63 }
 0xbd9   :  { %1872 = vmatpush.msra.mxu3 %v3741_v26 }
 0xbdb   :  { %1873 = vmatpush.msra.mxu3 %v3742_v34 }
 0xbdc   :  { %1903 = vrot.lane.b32.xlu0 %v5025_v12, %s4149_s5 }
 0xbe0   :  { %1907 = vrot.lane.b32.xlu2 %v5021_v49, %s4149_s5 }
 0xbe4   :  { %1891 = vrot.lane.b32.xlu0 %v5033_v61, %s4150_s0 }
 0xbe8   :  { %1901 = vrot.lane.b32.xlu2 %v5033_v61, %s4149_s5 }
 0xbec   :  { %1895 = vrot.lane.b32.xlu0 %v5017_v3, %s4150_s0 }
 0xbf0   :  { %1893 = vrot.lane.b32.xlu2 %v5025_v12, %s4150_s0 }
 0xbf4   :  { %2431 = vrot.lane.b32.xlu0 %v5021_v49, %s4151_s29 }
 0xbf8   :  { %2192 = vrot.lane.b32.xlu2 %v5027_v1, %s4152_s2 }
 0xbfb   :  { %1817 = vadd.xlane.f32.xlu1 %v1816_v53 }
 0xbfc   :  { %2429 = vrot.lane.b32.xlu0 %v5017_v3, %s4151_s29 }
 0xc00   :  { %2190 = vrot.lane.b32.xlu2 %v5021_v49, %s4152_s2 }
 0xc04   :  { %1899 = vrot.lane.b32.xlu0 %v5027_v1, %s4150_s0 }
 0xc08   :  { %2427 = vrot.lane.b32.xlu2 %v5025_v12, %s4151_s29 }
 0xc0c   :  { %2415 = vrot.lane.b32.xlu0 %v5033_v61, %s4153_s6 }
 0xc10   :  { %2425 = vrot.lane.b32.xlu2 %v5033_v61, %s4151_s29 }
 0xc14   :  { %2417 = vrot.lane.b32.xlu0 %v5025_v12, %s4153_s6  ;;  %1905 = vrot.lane.b32.xlu1 %v5017_v3, %s4149_s5 }
 0xc18   :  { %2174 = vrot.lane.b32.xlu2 %v5033_v61, %s4154_s7 }
 0xc1c   :  { %2178 = vrot.lane.b32.xlu0 %v5017_v3, %s4154_s7  ;;  %2433 = vrot.lane.b32.xlu1 %v5027_v1, %s4151_s29  ;;  %s5848_s29 = sld [smem:[#allocation18_spill]] }
 0xc20   :  { %2419 = vrot.lane.b32.xlu2 %v5017_v3, %s4153_s6 }
 0xc23   :  { %v1806_v5 = vpop.xlane.xlu1 %1805 }
 0xc24   :  { %2423 = vrot.lane.b32.xlu0 %v5027_v1, %s4153_s6  ;;  %1897 = vrot.lane.b32.xlu1 %v5021_v49, %s4150_s0  ;;  %3908 = vrcp.f32 %v1806_v5 }
 0xc28   :  { %2180 = vrot.lane.b32.xlu2 %v5021_v49, %s4154_s7 }
 0xc2a   :  { %v3909_v10 = vpop.eup %3908 }
 0xc2b   :  { %v1809_v24 = vpop.xlane.xlu1 %1808  ;;  %v1824_v60 = vmul.f32 %v3909_v10, %v5084_v43 }
 0xc2c   :  { %2188 = vrot.lane.b32.xlu1 %v5017_v3, %s4152_s2  ;;  %3910 = vrcp.f32 %v1809_v24 }
 0xc32   :  { %v3911_v15 = vpop.eup %3910 }
 0xc33   :  { %v1812_v30 = vpop.xlane.xlu0 %1811  ;;  %v1825_v23 = vmul.f32 %v3911_v15, %v5088_v31 }
 0xc34   :  { %2186 = vrot.lane.b32.xlu1 %v5025_v12, %s4152_s2  ;;  %3912 = vrcp.f32 %v1812_v30 }
 0xc3a   :  { %v3913_v35 = vpop.eup %3912 }
 0xc3b   :  { %v1815_v14 = vpop.xlane.xlu2 %1814 }
 0xc3c   :  { %2184 = vrot.lane.b32.xlu1 %v5033_v61, %s4152_s2  ;;  %3914 = vrcp.f32 %v1815_v14 }
 0xc42   :  { %v3915_v20 = vpop.eup %3914 }
 0xc43   :  { %v1830_v7 = vpop.permute.xlu1 %1829  ;;  %v1908_v16 = vpop.permute.xlu2 %1907  ;;  %v1827_v36 = vmul.f32 %v3915_v20, %v5096_v19 }
 0xc44   :  { %2176 = vrot.lane.b32.xlu1 %v5025_v12, %s4154_s7  ;;  %1874 = vmatpush.msra.mxu3 %v1830_v7  ;;  %v1826_v12 = vmul.f32 %v3913_v35, %v5092_v22 }
 0xc45   :  { %3555 = vmatmul.msk.f32.vlgmr.msra.gmra.mxu3 %vm340_vm4, %v1824_v60 }
 0xc46   :  { %v1910_v3 = vpop.permute.xlu0 %1909 }
 0xc47   :  { %3560 = vmatpush.xpose.msk.msra.mxu2 %vm287_vm3, %v1910_v3 }
 0xc4b   :  { %3561 = vmatpush.xpose.msk.msra.mxu2 %vm287_vm3, %v1908_v16  ;;  %v1902_v62 = vpop.permute.xlu2 %1901 }
 0xc4c   :  { %2421 = vrot.lane.b32.xlu1 %v5021_v49, %s4153_s6  ;;  %v1703_v49 = vld [vmem:[#allocation7 + $0x20] sm:$0xff]  ;;  %s4160_s6 = smov [#allocation10]  }
 0xc4d   :  { %3556 = vmatmul.msk.f32.gmra.mxu3 %vm340_vm4, %v1825_v23 }
 0xc4e   :  { %v1904_v29 = vpop.permute.xlu0 %1903  ;;  %2157 = vmatpush.msrb.mxu3 %v1703_v49 }
 0xc53   :  { %v1894_v6 = vpop.permute.xlu2 %1893 }
 0xc54   :  { %2182 = vrot.lane.b32.xlu1 %v5027_v1, %s4154_s7  ;;  %s3420_s7 = sshll.u32 %s4160_s6, 4  ;;  %s3421_s7 = int_to_ptr.vmem [resolvable:$true] %s3420_s7 }
 0xc55   :  { %3557 = vmatmul.msk.f32.gmra.mxu3 %vm340_vm4, %v1826_v12 }
 0xc56   :  { %v1892_v54 = vpop.permute.xlu0 %1891 }
 0xc5b   :  { %v2193_v1 = vpop.permute.xlu2 %2192 }
 0xc5d   :  { %3558 = vmatmul.msk.f32.gmra.mxu3 %vm340_vm4, %v1827_v36 }
 0xc5e   :  { %v1896_v43 = vpop.permute.xlu0 %1895 }
 0xc63   :  { %v2191_v25 = vpop.permute.xlu2 %2190 }
 0xc66   :  { %v2432_v21 = vpop.permute.xlu0 %2431 }
 0xc6b   :  { %v2428_v31 = vpop.permute.xlu2 %2427 }
 0xc6e   :  { %v1818_v39 = vpop.xlane.xlu1 %1817  ;;  %v2430_v52 = vpop.permute.xlu0 %2429 }
 0xc6f   :  { %3916 = vrcp.f32 %v1818_v39 }
 0xc73   :  { %v2426_v38 = vpop.permute.xlu2 %2425 }
 0xc75   :  { %v3917_v33 = vpop.eup %3916 }
 0xc76   :  { %v1828_v8 = vmul.f32 %v3917_v33, %v3907_v4  ;;  %v1900_v41 = vpop.permute.xlu0 %1899 }
 0xc78   :  { %3559 = vmatmul.msk.f32.gmra.mxu3 %vm340_vm4, %v1828_v8 }
 0xc7b   :  { %v2175_v44 = vpop.permute.xlu2 %2174 }
 0xc7e   :  { %v2416_v27 = vpop.permute.xlu0 %2415 }
 0xc83   :  { %v2420_v57 = vpop.permute.xlu2 %2419 }
 0xc86   :  { %v1906_v46 = vpop.permute.xlu1 %1905  ;;  %v2418_v19 = vpop.permute.xlu0 %2417 }
 0xc87   :  { %3562 = vmatpush.xpose.msk.msra.mxu2 %vm287_vm3, %v1906_v46 }
 0xc8b   :  { %3563 = vmatpush.xpose.msk.msra.mxu2 %vm287_vm3, %v1904_v29  ;;  %v2181_v48 = vpop.permute.xlu2 %2180 }
 0xc8e   :  { %v2434_v50 = vpop.permute.xlu1 %2433  ;;  %v2179_v63 = vpop.permute.xlu0 %2178 }
 0xc8f   :  { %3564 = vmatpush.xpose.msk.msra.mxu2 %vm287_vm3, %v1902_v62  ;;  %3605 = vmatpush.xpose.msk.msra.mxu3 %vm287_vm3, %v2434_v50 }
 0xc92   :  { %3565 = vmatmul.msk.f32.vlgmr.msra.gmra.mxu2 %vm287_vm3, %v1892_v54 }
 0xc93   :  { %3585 = vmatpush.xpose.msk.msrb.mxu2 %vm287_vm3, %v2193_v1  ;;  %3606 = vmatpush.xpose.msk.msra.mxu3 %vm287_vm3, %v2432_v21 }
 0xc96   :  { %v1898_v45 = vpop.permute.xlu1 %1897  ;;  %v2424_v3 = vpop.permute.xlu0 %2423 }
 0xc97   :  { %3586 = vmatpush.xpose.msk.msrb.mxu2 %vm287_vm3, %v2191_v25  ;;  %3607 = vmatpush.xpose.msk.msra.mxu3 %vm287_vm3, %v2430_v52 }
 0xc9a   :  { %3566 = vmatmul.msk.f32.gmra.mxu2 %vm287_vm3, %v1894_v6 }
 0xc9b   :  { %3608 = vmatpush.xpose.msk.msra.mxu3 %vm287_vm3, %v2428_v31 }
 0xc9e   :  { %v2189_v42 = vpop.permute.xlu1 %2188 }
 0xc9f   :  { %3587 = vmatpush.xpose.msk.msrb.mxu2 %vm287_vm3, %v2189_v42  ;;  %3609 = vmatpush.xpose.msk.msra.mxu3 %vm287_vm3, %v2426_v38 }
 0xca2   :  { %3567 = vmatmul.msk.f32.gmra.mxu2 %vm287_vm3, %v1896_v43 }
 0xca6   :  { %v2187_v22 = vpop.permute.xlu1 %2186 }
 0xca7   :  { %3588 = vmatpush.xpose.msk.msrb.mxu2 %vm287_vm3, %v2187_v22 }
 0xcaa   :  { %3568 = vmatmul.msk.f32.gmra.mxu2 %vm287_vm3, %v1898_v45 }
 0xcae   :  { %v2185_v37 = vpop.permute.xlu1 %2184 }
 0xcaf   :  { %3589 = vmatpush.xpose.msk.msrb.mxu2 %vm287_vm3, %v2185_v37 }
 0xcb2   :  { %3569 = vmatmul.msk.f32.gmra.mxu2 %vm287_vm3, %v1900_v41 }
 0xcb6   :  { %v2177_v58 = vpop.permute.xlu1 %2176 }
 0xcba   :  { %3590 = vmatmul.msk.f32.vlgmr.msrb.gmra.mxu2 %vm287_vm3, %v2175_v44 }
 0xcbe   :  { %v2422_v26 = vpop.permute.xlu1 %2421 }
 0xcc2   :  { %3591 = vmatmul.msk.f32.gmra.mxu2 %vm287_vm3, %v2177_v58 }
 0xcc6   :  { %v2183_v4 = vpop.permute.xlu1 %2182 }
 0xcc8   :  { %v1876_v59 = vpop.f32.mrf.mxu3 }
 0xcc9   :  { %3580 = vmatmul.msk.f32.vlgmr.msrb.gmra.mxu3 %vm287_vm3, %v1876_v59 }
 0xcca   :  { %3592 = vmatmul.msk.f32.gmra.mxu2 %vm287_vm3, %v2179_v63 }
 0xcd0   :  { %v1879_v34 = vpop.f32.mrf.mxu3 }
 0xcd1   :  { %3581 = vmatmul.msk.f32.gmra.mxu3 %vm287_vm3, %v1879_v34 }
 0xcd2   :  { %3593 = vmatmul.msk.f32.gmra.mxu2 %vm287_vm3, %v2181_v48 }
 0xcd8   :  { %v1882_v51 = vpop.f32.mrf.mxu3 }
 0xcd9   :  { %3582 = vmatmul.msk.f32.gmra.mxu3 %vm287_vm3, %v1882_v51 }
 0xcda   :  { %3594 = vmatmul.msk.f32.gmra.mxu2 %vm287_vm3, %v2183_v4 }
 0xce0   :  { %v1885_v53 = vpop.f32.mrf.mxu3 }
 0xce1   :  { %3583 = vmatmul.msk.f32.gmra.mxu3 %vm287_vm3, %v1885_v53 }
 0xcfb   :  { %v1888_v5 = vpop.f32.mrf.mxu3 }
 0xcfc   :  { %3584 = vmatmul.msk.f32.gmra.mxu3 %vm287_vm3, %v1888_v5 }
 0xd04   :  { %3610 = vmatmul.msk.f32.vlgmr.msra.gmra.mxu3 %vm287_vm3, %v2416_v27 }
 0xd0c   :  { %3611 = vmatmul.msk.f32.gmra.mxu3 %vm287_vm3, %v2418_v19 }
 0xd14   :  { %3612 = vmatmul.msk.f32.gmra.mxu3 %vm287_vm3, %v2420_v57 }
 0xd15   :  { %v1948_v24 = vpop.f32.mrf.mxu2 }
 0xd16   :  { %v1949_v30 = vadd.f32 %v5052_v32, %v1948_v24 }
 0xd18   :  { %v1963_v10 = vsel %vm340_vm4, %v1949_v30, -inf }
 0xd19   :  { %1964 = vmax.xlane.f32.xlu2 %v1963_v10 }
 0xd1c   :  { %3613 = vmatmul.msk.f32.gmra.mxu3 %vm287_vm3, %v2422_v26 }
 0xd1d   :  { %v1951_v14 = vpop.f32.mrf.mxu2 }
 0xd1e   :  { %v1952_v60 = vadd.f32 %v5056_v28, %v1951_v14 }
 0xd20   :  { %v1966_v7 = vsel %vm340_vm4, %v1952_v60, -inf }
 0xd21   :  { %1967 = vmax.xlane.f32.xlu0 %v1966_v7 }
 0xd24   :  { %3614 = vmatmul.msk.f32.gmra.mxu3 %vm287_vm3, %v2424_v3 }
 0xd25   :  { %v1954_v15 = vpop.f32.mrf.mxu2 }
 0xd26   :  { %v1955_v16 = vadd.f32 %v5060_v11, %v1954_v15 }
 0xd28   :  { %v1969_v23 = vsel %vm340_vm4, %v1955_v16, -inf }
 0xd29   :  { %1970 = vmax.xlane.f32.xlu1 %v1969_v23 }
 0xd2d   :  { %v1957_v35 = vpop.f32.mrf.mxu2 }
 0xd2e   :  { %v5214_v12 = vadd.f32 %v5064_v2, %v1957_v35 }
 0xd30   :  { %v1972_v20 = vsel %vm340_vm4, %v5214_v12, -inf }
 0xd31   :  { %1973 = vmax.xlane.f32.xlu2 %v1972_v20 }
 0xd35   :  { %v1960_v36 = vpop.f32.mrf.mxu2 }
 0xd36   :  { %v5219_v62 = vadd.f32 %v5068_v40, %v1960_v36 }
 0xd38   :  { %v1975_v29 = vsel %vm340_vm4, %v5219_v62, -inf }
 0xd39   :  { %1976 = vmax.xlane.f32.xlu0 %v1975_v29 }
 0xd3d   :  { %v2231_v39 = vpop.f32.mrf.mxu2 }
 0xd3e   :  { %v5224_v49 = vadd.f32 %v5052_v32, %v2231_v39 }
 0xd40   :  { %v2246_v33 = vsel %vm340_vm4, %v5224_v49, -inf }
 0xd41   :  { %2247 = vmax.xlane.f32.xlu2 %v2246_v33 }
 0xd45   :  { %v2234_v6 = vpop.f32.mrf.mxu2 }
 0xd46   :  { %v5229_v8 = vadd.f32 %v5056_v28, %v2234_v6 }
 0xd48   :  { %v2249_v54 = vsel %vm340_vm4, %v5229_v8, -inf }
 0xd49   :  { %2250 = vmax.xlane.f32.xlu1 %v2249_v54 }
 0xd4c   :  { %v5237_v1 = vpop.f32.mrf.mxu3 }
 0xd4d   :  { %3749 = vrot.lane.b32.xlu0 %v5080_v18, %s4155_s26  ;;  %v2237_v21 = vpop.f32.mrf.mxu2 }
 0xd4e   :  { %v5274_v51 = vadd.f32 %v5060_v11, %v2237_v21 }
 0xd50   :  { %v2252_v5 = vsel %vm340_vm4, %v5274_v51, -inf }
 0xd54   :  { %v5241_v43 = vpop.f32.mrf.mxu3 }
 0xd55   :  { %2018 = vrot.lane.b32.xlu0 %v5033_v61, %s4155_s26  ;;  %v2240_v31 = vpop.f32.mrf.mxu2 }
 0xd56   :  { %v5250_v52 = vadd.f32 %v5064_v2, %v2240_v31 }
 0xd58   :  { %v2255_v38 = vsel %vm340_vm4, %v5250_v52, -inf }
 0xd5c   :  { %v5243_v46 = vpop.f32.mrf.mxu3 }
 0xd5d   :  { %v2243_v3 = vpop.f32.mrf.mxu2 }
 0xd62   :  { %3744 = vrot.lane.b32.xlu1 %v5074_v0, %s4155_s26 }
 0xd64   :  { %v5245_v25 = vpop.f32.mrf.mxu3 }
 0xd7f   :  { %v5247_v50 = vpop.f32.mrf.mxu3 }
 0xd87   :  { %v2472_v45 = vpop.f32.mrf.mxu3 }
 0xd88   :  { %v5255_v41 = vadd.f32 %v5052_v32, %v2472_v45 }
 0xd8a   :  { %v2487_v58 = vsel %vm340_vm4, %v5255_v41, -inf }
 0xd8c   :  { %2256 = vmax.xlane.f32.xlu1 %v2255_v38  ;;  %v1965_v42 = vpop.xlane.xlu2 %1964 }
 0xd8d   :  { %v1978_v22 = vsub.f32 %v1949_v30, %v1965_v42 }
 0xd8f   :  { %v1983_v37 = vmul.f32 1.442695, %v1978_v22  ;;  %v2475_v27 = vpop.f32.mrf.mxu3 }
 0xd90   :  { %v5258_v44 = vadd.f32 %v5056_v28, %v2475_v27 }
 0xd91   :  { %3918 = vpow2.f32 %v1983_v37 }
 0xd92   :  { %v2490_v19 = vsel %vm340_vm4, %v5258_v44, -inf }
 0xd93   :  { %2491 = vmax.xlane.f32.xlu0 %v2490_v19 }
 0xd94   :  { %v1968_v57 = vpop.xlane.xlu0 %1967  ;;  %2488 = vmax.xlane.f32.xlu1 %v2487_v58 }
 0xd95   :  { %v1979_v63 = vsub.f32 %v1952_v60, %v1968_v57 }
 0xd97   :  { %v5264_v59 = vpop.eup %3918  ;;  %v2478_v32 = vpop.f32.mrf.mxu3  ;;  %v1985_v48 = vmul.f32 1.442695, %v1979_v63 }
 0xd98   :  { %v5267_v26 = vadd.f32 %v5060_v11, %v2478_v32  ;;  %v1993_v28 = vsel %vm340_vm4, %v5264_v59, 0.0 }
 0xd99   :  { %1994 = vadd.xlane.f32.xlu2 %v1993_v28  ;;  %3920 = vpow2.f32 %v1985_v48 }
 0xd9a   :  { %v2493_v34 = vsel %vm340_vm4, %v5267_v26, -inf }
 0xd9b   :  { %2494 = vmax.xlane.f32.xlu0 %v2493_v34 }
 0xd9c   :  { %v1971_v4 = vpop.xlane.xlu1 %1970 }
 0xd9d   :  { %v1980_v53 = vsub.f32 %v1955_v16, %v1971_v4  ;;  %v5290_v16 = vadd.f32 %v5068_v40, %v2243_v3 }
 0xd9f   :  { %v1987_v24 = vmul.f32 1.442695, %v1980_v53  ;;  %v5278_v30 = vpop.eup %3920  ;;  %v2258_v29 = vsel %vm340_vm4, %v5290_v16, -inf  ;;  %v2481_v21 = vpop.f32.mrf.mxu3 }
 0xda0   :  { %v1996_v10 = vsel %vm340_vm4, %v5278_v30, 0.0  ;;  %v5309_v45 = vadd.f32 %v5064_v2, %v2481_v21 }
 0xda1   :  { %2253 = vmax.xlane.f32.xlu2 %v2252_v5  ;;  %3922 = vpow2.f32 %v1987_v24 }
 0xda2   :  { %v2496_v42 = vsel %vm340_vm4, %v5309_v45, -inf }
 0xda4   :  { %v1974_v14 = vpop.xlane.xlu2 %1973 }
 0xda5   :  { %v1981_v11 = vsub.f32 %v5214_v12, %v1974_v14 }
 0xda7   :  { %v5282_v60 = vpop.eup %3922  ;;  %v1989_v15 = vmul.f32 1.442695, %v1981_v11  ;;  %v2484_v22 = vpop.f32.mrf.mxu3 }
 0xda8   :  { %v1999_v7 = vsel %vm340_vm4, %v5282_v60, 0.0  ;;  %v5314_v37 = vadd.f32 %v5068_v40, %v2484_v22 }
 0xda9   :  { %1997 = vadd.xlane.f32.xlu2 %v1996_v10  ;;  %3924 = vpow2.f32 %v1989_v15 }
 0xdaa   :  { %v2499_v63 = vsel %vm340_vm4, %v5314_v37, -inf }
 0xdac   :  { %v1977_v23 = vpop.xlane.xlu0 %1976 }
 0xdad   :  { %v1982_v36 = vsub.f32 %v5219_v62, %v1977_v23 }
 0xdaf   :  { %3759 = vrot.lane.b32.xlu0 %v5074_v0, %s5844_s24  ;;  %v1991_v39 = vmul.f32 1.442695, %v1982_v36  ;;  %v5296_v33 = vpop.eup %3924 }
 0xdb0   :  { %v2002_v54 = vsel %vm340_vm4, %v5296_v33, 0.0 }
 0xdb1   :  { %2000 = vadd.xlane.f32.xlu2 %v1999_v7 }
 0xdb4   :  { %v2248_v35 = vpop.xlane.xlu2 %2247 }
 0xdb5   :  { %v2261_v20 = vsub.f32 %v5224_v49, %v2248_v35 }
 0xdb7   :  { %v2266_v12 = vmul.f32 1.442695, %v2261_v20 }
 0xdb9   :  { %3926 = vpow2.f32 %v2266_v12  ;;  %2259 = vmax.xlane.f32.xlu2 %v2258_v29 }
 0xdba   :  { %3928 = vpow2.f32 %v1991_v39 }
 0xdbc   :  { %v2251_v38 = vpop.xlane.xlu1 %2250 }
 0xdbd   :  { %v2262_v34 = vsub.f32 %v5229_v8, %v2251_v38 }
 0xdbf   :  { %v5298_v6 = vpop.eup %3926  ;;  %v3750_v27 = vpop.permute.xlu0 %3749  ;;  %v2268_v4 = vmul.f32 1.442695, %v2262_v34 }
 0xdc0   :  { %v2276_v49 = vsel %vm340_vm4, %v5298_v6, 0.0  ;;  %v5304_v62 = vpop.eup %3928  ;;  %v3751_v32 = vunpack.i.l.bf16 %v3750_v27  ;;  %v3752_v2 = vunpack.i.h.bf16 %v3750_v27 }
 0xdc1   :  { %2003 = vadd.xlane.f32.xlu2 %v2002_v54  ;;  %2277 = vadd.xlane.f32.xlu1 %v2276_v49  ;;  %v2005_v31 = vsel %vm340_vm4, %v5304_v62, 0.0  ;;  %3930 = vpow2.f32 %v2268_v4 }
 0xdc7   :  { %v2019_v28 = vpop.permute.xlu0 %2018  ;;  %v5333_v7 = vpop.eup %3930 }
 0xdc9   :  { %2006 = vadd.xlane.f32.xlu2 %v2005_v31 }
 0xdd1   :  { %2497 = vmax.xlane.f32.xlu2 %v2496_v42 }
 0xdd4   :  { %v3745_v19 = vpop.permute.xlu1 %3744 }
 0xdd5   :  { %v3746_v58 = vunpack.i.l.bf16 %v3745_v19  ;;  %v3747_v57 = vunpack.i.h.bf16 %v3745_v19 }
 0xdd7   :  { %2059 = vmatpush.msrb.mxu0 %v3746_v58 }
 0xdd9   :  { %2060 = vmatpush.msrb.mxu0 %v3747_v57  ;;  %2500 = vmax.xlane.f32.xlu0 %v2499_v63 }
 0xdda   :  { %3764 = vrot.lane.b32.xlu1 %v5080_v18, %s5845_s4 }
 0xddb   :  { %2061 = vmatpush.msrb.mxu0 %v3751_v32 }
 0xddd   :  { %2062 = vmatpush.msrb.mxu0 %v3752_v2 }
 0xddf   :  { %2063 = vmatpush.msrb.mxu0 %v2019_v28 }
 0xde2   :  { %2542 = vrot.lane.b32.xlu1 %v5033_v61, %s5845_s4 }
 0xde9   :  { %3754 = vrot.lane.b32.xlu2 %v5074_v0, %s5845_s4 }
 0xdea   :  { %2301 = vrot.lane.b32.xlu1 %v5033_v61, %s5844_s24 }
 0xded   :  { %3769 = vrot.lane.b32.xlu0 %v5080_v18, %s5844_s24 }
 0xdff   :  { %v2257_v40 = vpop.xlane.xlu1 %2256 }
 0xe00   :  { %v2264_v14 = vsub.f32 %v5250_v52, %v2257_v40 }
 0xe02   :  { %v2272_v8 = vmul.f32 1.442695, %v2264_v14 }
 0xe06   :  { %v2492_v48 = vpop.xlane.xlu0 %2491 }
 0xe07   :  { %v2489_v53 = vpop.xlane.xlu1 %2488  ;;  %v2503_v24 = vsub.f32 %v5258_v44, %v2492_v48 }
 0xe08   :  { %v2502_v5 = vsub.f32 %v5255_v41, %v2489_v53 }
 0xe09   :  { %v2509_v61 = vmul.f32 1.442695, %v2503_v24 }
 0xe0a   :  { %v2507_v10 = vmul.f32 1.442695, %v2502_v5 }
 0xe0c   :  { %3932 = vpow2.f32 %v2507_v10  ;;  %v1995_v0 = vpop.xlane.xlu2 %1994 }
 0xe0d   :  { %3934 = vrcp.f32 %v1995_v0 }
 0xe0e   :  { %v2495_v11 = vpop.xlane.xlu0 %2494  ;;  %3936 = vpow2.f32 %v2509_v61 }
 0xe0f   :  { %v2504_v18 = vsub.f32 %v5267_v26, %v2495_v11  ;;  %v2279_v26 = vsel %vm340_vm4, %v5333_v7, 0.0 }
 0xe11   :  { %v2511_v3 = vmul.f32 1.442695, %v2504_v18 }
 0xe12   :  { %v5335_v15 = vpop.eup %3932 }
 0xe13   :  { %v3935_v41 = vpop.eup %3934  ;;  %3938 = vpow2.f32 %v2511_v3  ;;  %v2517_v44 = vsel %vm340_vm4, %v5335_v15, 0.0 }
 0xe14   :  { %v2013_v23 = vmul.f32 %v3935_v41, %v5264_v59  ;;  %v2254_v52 = vpop.xlane.xlu2 %2253  ;;  %2518 = vadd.xlane.f32.xlu2 %v2517_v44  ;;  %3940 = vpow2.f32 %v2272_v8  ;;  %v5344_v36 = vpop.eup %3936 }
 0xe15   :  { %v2263_v35 = vsub.f32 %v5274_v51, %v2254_v52  ;;  %v2520_v51 = vsel %vm340_vm4, %v5344_v36, 0.0 }
 0xe16   :  { %3570 = vmatmul.msk.f32.vlgmr.msrb.gmra.mxu0 %vm340_vm4, %v2013_v23 }
 0xe17   :  { %v2270_v20 = vmul.f32 1.442695, %v2263_v35  ;;  %2280 = vadd.xlane.f32.xlu0 %v2279_v26 }
 0xe19   :  { %v5346_v12 = vpop.eup %3938  ;;  %3942 = vpow2.f32 %v2270_v20 }
 0xe1a   :  { %v2523_v59 = vsel %vm340_vm4, %v5346_v12, 0.0  ;;  %v5350_v29 = vpop.eup %3940 }
 0xe1b   :  { %2524 = vadd.xlane.f32.xlu1 %v2523_v59  ;;  %v2285_v54 = vsel %vm340_vm4, %v5350_v29, 0.0 }
 0xe1c   :  { %v1998_v39 = vpop.xlane.xlu2 %1997  ;;  %2521 = vadd.xlane.f32.xlu2 %v2520_v51 }
 0xe1d   :  { %3944 = vrcp.f32 %v1998_v39  ;;  %v1704_v39 = vld [vmem:[#allocation7 + $0x28] sm:$0xff] }
 0xe1e   :  { %2110 = vmatpush.msrb.mxu1 %v1704_v39  ;;  %v3785_v39 = vld [vmem:[%s5801_s10 + $0x1] ss:$0 sm:$0xff] }
 0xe1f   :  { %2286 = vadd.xlane.f32.xlu0 %v2285_v54  ;;  %v5356_v49 = vpop.eup %3942 }
 0xe20   :  { %v2282_v42 = vsel %vm340_vm4, %v5356_v49, 0.0 }
 0xe21   :  { %v3760_v21 = vpop.permute.xlu0 %3759 }
 0xe22   :  { %v3761_v31 = vunpack.i.l.bf16 %v3760_v21  ;;  %v3762_v19 = vunpack.i.h.bf16 %v3760_v21 }
 0xe23   :  { %v3945_v38 = vpop.eup %3944 }
 0xe24   :  { %v2001_v22 = vpop.xlane.xlu2 %2000  ;;  %2342 = vmatpush.msra.mxu0 %v3761_v31  ;;  %2283 = vadd.xlane.f32.xlu2 %v2282_v42  ;;  %v2014_v27 = vmul.f32 %v3945_v38, %v5278_v30 }
 0xe25   :  { %3946 = vrcp.f32 %v2001_v22 }
 0xe26   :  { %3571 = vmatmul.msk.f32.gmra.mxu0 %vm340_vm4, %v2014_v27 }
 0xe27   :  { %2343 = vmatpush.msra.mxu0 %v3762_v19 }
 0xe2b   :  { %v3947_v58 = vpop.eup %3946 }
 0xe2c   :  { %v2260_v57 = vpop.xlane.xlu2 %2259  ;;  %v2015_v63 = vmul.f32 %v3947_v58, %v5282_v60 }
 0xe2d   :  { %v2265_v32 = vsub.f32 %v5290_v16, %v2260_v57 }
 0xe2e   :  { %3572 = vmatmul.msk.f32.gmra.mxu0 %vm340_vm4, %v2015_v63 }
 0xe2f   :  { %v2274_v2 = vmul.f32 1.442695, %v2265_v32 }
 0xe31   :  { %3948 = vpow2.f32 %v2274_v2 }
 0xe34   :  { %v2004_v28 = vpop.xlane.xlu2 %2003  ;;  %v2278_v5 = vpop.xlane.xlu1 %2277 }
 0xe35   :  { %3950 = vrcp.f32 %v2004_v28 }
 0xe37   :  { %v5365_v40 = vpop.eup %3948 }
 0xe38   :  { %v2288_v30 = vsel %vm340_vm4, %v5365_v40, 0.0 }
 0xe39   :  { %2289 = vadd.xlane.f32.xlu0 %v2288_v30 }
 0xe3b   :  { %v3951_v34 = vpop.eup %3950 }
 0xe3c   :  { %v2007_v48 = vpop.xlane.xlu2 %2006  ;;  %v2016_v4 = vmul.f32 %v3951_v34, %v5296_v33 }
 0xe3d   :  { %3952 = vrcp.f32 %v2007_v48 }
 0xe3e   :  { %3573 = vmatmul.msk.f32.gmra.mxu0 %vm340_vm4, %v2016_v4 }
 0xe43   :  { %v3953_v60 = vpop.eup %3952 }
 0xe44   :  { %v2498_v16 = vpop.xlane.xlu2 %2497  ;;  %v2017_v53 = vmul.f32 %v3953_v60, %v5304_v62 }
 0xe45   :  { %v2505_v24 = vsub.f32 %v5309_v45, %v2498_v16 }
 0xe46   :  { %3574 = vmatmul.msk.f32.gmra.mxu0 %vm340_vm4, %v2017_v53 }
 0xe47   :  { %v2513_v10 = vmul.f32 1.442695, %v2505_v24 }
 0xe49   :  { %3954 = vpow2.f32 %v2513_v10 }
 0xe4c   :  { %v3755_v0 = vpop.permute.xlu2 %3754  ;;  %v2501_v14 = vpop.xlane.xlu0 %2500 }
 0xe4d   :  { %v3756_v61 = vunpack.i.l.bf16 %v3755_v0  ;;  %v2506_v11 = vsub.f32 %v5314_v37, %v2501_v14  ;;  %v3765_v33 = vpop.permute.xlu1 %3764  ;;  %v3757_v8 = vunpack.i.h.bf16 %v3755_v0 }
 0xe4e   :  { %v3766_v45 = vunpack.i.l.bf16 %v3765_v33  ;;  %v3767_v41 = vunpack.i.h.bf16 %v3765_v33 }
 0xe4f   :  { %v5375_v18 = vpop.eup %3954  ;;  %v2515_v3 = vmul.f32 1.442695, %v2506_v11  ;;  %2583 = vmatpush.msra.mxu2 %v3756_v61  ;;  %v1706_v61 = vld [vmem:[#allocation7 + $0x38] sm:$0xff] }
 0xe50   :  { %v2526_v62 = vsel %vm340_vm4, %v5375_v18, 0.0 }
 0xe51   :  { %3956 = vpow2.f32 %v2515_v3  ;;  %2584 = vmatpush.msra.mxu2 %v3757_v8  ;;  %2527 = vadd.xlane.f32.xlu2 %v2526_v62 }
 0xe52   :  { %3958 = vrcp.f32 %v2278_v5 }
 0xe53   :  { %2585 = vmatpush.msra.mxu2 %v3766_v45 }
 0xe55   :  { %2586 = vmatpush.msra.mxu2 %v3767_v41  ;;  %v2543_v44 = vpop.permute.xlu1 %2542 }
 0xe57   :  { %v5379_v23 = vpop.eup %3956  ;;  %2587 = vmatpush.msra.mxu2 %v2543_v44 }
 0xe58   :  { %v2529_v37 = vsel %vm340_vm4, %v5379_v23, 0.0  ;;  %v3959_v26 = vpop.eup %3958 }
 0xe59   :  { %2530 = vadd.xlane.f32.xlu2 %v2529_v37  ;;  %v2296_v59 = vmul.f32 %v3959_v26, %v5298_v6 }
 0xe5d   :  { %v2302_v51 = vpop.permute.xlu1 %2301 }
 0xe5f   :  { %v3770_v52 = vpop.permute.xlu0 %3769 }
 0xe60   :  { %v3771_v35 = vunpack.i.l.bf16 %v3770_v52  ;;  %v3772_v20 = vunpack.i.h.bf16 %v3770_v52 }
 0xe62   :  { %2344 = vmatpush.msra.mxu0 %v3771_v35 }
 0xe64   :  { %2345 = vmatpush.msra.mxu0 %v3772_v20 }
 0xe66   :  { %2346 = vmatpush.msra.mxu0 %v2302_v51 }
 0xe67   :  { %3595 = vmatmul.msk.f32.vlgmr.msra.gmra.mxu0 %vm340_vm4, %v2296_v59 }
 0xe68   :  { %2634 = vmatpush.msrb.mxu0 %v1706_v61 }
 0xe87   :  { %v2519_v54 = vpop.xlane.xlu2 %2518 }
 0xe88   :  { %3960 = vrcp.f32 %v2519_v54 }
 0xe8a   :  { %v2281_v21 = vpop.xlane.xlu0 %2280 }
 0xe8b   :  { %3962 = vrcp.f32 %v2281_v21 }
 0xe8e   :  { %v3961_v31 = vpop.eup %3960  ;;  %v2525_v27 = vpop.xlane.xlu1 %2524 }
 0xe8f   :  { %v2537_v38 = vmul.f32 %v3961_v31, %v5335_v15  ;;  %v2522_v42 = vpop.xlane.xlu2 %2521 }
 0xe90   :  { %3964 = vrcp.f32 %v2522_v42 }
 0xe91   :  { %v3963_v22 = vpop.eup %3962  ;;  %3615 = vmatmul.msk.f32.vlgmr.msra.gmra.mxu2 %vm340_vm4, %v2537_v38  ;;  %3966 = vrcp.f32 %v2525_v27 }
 0xe92   :  { %v2297_v6 = vmul.f32 %v3963_v22, %v5333_v7  ;;  %v2287_v15 = vpop.xlane.xlu0 %2286 }
 0xe93   :  { %v2065_v19 = vpop.f32.mrf.mxu0 }
 0xe94   :  { %3575 = vmatmul.msk.f32.vlgmr.msrb.gmra.mxu1 %vm287_vm3, %v2065_v19  ;;  %3596 = vmatmul.msk.f32.gmra.mxu0 %vm340_vm4, %v2297_v6 }
 0xe96   :  { %v3965_v58 = vpop.eup %3964 }
 0xe97   :  { %v2284_v57 = vpop.xlane.xlu2 %2283  ;;  %v2538_v63 = vmul.f32 %v3965_v58, %v5344_v36  ;;  %v3967_v32 = vpop.eup %3966 }
 0xe98   :  { %3968 = vrcp.f32 %v2284_v57  ;;  %v2539_v28 = vmul.f32 %v3967_v32, %v5346_v12 }
 0xe99   :  { %3616 = vmatmul.msk.f32.gmra.mxu2 %vm340_vm4, %v2538_v63  ;;  %3970 = vrcp.f32 %v2287_v15 }
 0xe9e   :  { %v3969_v2 = vpop.eup %3968 }
 0xe9f   :  { %v2298_v7 = vmul.f32 %v3969_v2, %v5356_v49  ;;  %v3971_v34 = vpop.eup %3970 }
 0xea0   :  { %v2299_v36 = vmul.f32 %v3971_v34, %v5350_v29  ;;  %v1705_v29 = vld [vmem:[#allocation7 + $0x30] sm:$0xff] }
 0xea1   :  { %3597 = vmatmul.msk.f32.gmra.mxu0 %vm340_vm4, %v2298_v7  ;;  %3617 = vmatmul.msk.f32.gmra.mxu2 %vm340_vm4, %v2539_v28 }
 0xea2   :  { %2393 = vmatpush.msra.mxu1 %v1705_v29 }
 0xea3   :  { %v2068_v30 = vpop.f32.mrf.mxu0 }
 0xea4   :  { %3576 = vmatmul.msk.f32.gmra.mxu1 %vm287_vm3, %v2068_v30 }
 0xea9   :  { %3598 = vmatmul.msk.f32.gmra.mxu0 %vm340_vm4, %v2299_v36 }
 0xeab   :  { %v2071_v48 = vpop.f32.mrf.mxu0 }
 0xeac   :  { %3577 = vmatmul.msk.f32.gmra.mxu1 %vm287_vm3, %v2071_v48  ;;  %v2290_v4 = vpop.xlane.xlu0 %2289 }
 0xead   :  { %3972 = vrcp.f32 %v2290_v4 }
 0xeb3   :  { %v3973_v49 = vpop.eup %3972 }
 0xeb4   :  { %v2300_v12 = vmul.f32 %v3973_v49, %v5365_v40 }
 0xeb6   :  { %3599 = vmatmul.msk.f32.gmra.mxu0 %vm340_vm4, %v2300_v12 }
 0xebb   :  { %v2074_v60 = vpop.f32.mrf.mxu0 }
 0xebc   :  { %3578 = vmatmul.msk.f32.gmra.mxu1 %vm287_vm3, %v2074_v60 }
 0xec3   :  { %v2077_v16 = vpop.f32.mrf.mxu0 }
 0xec4   :  { %3579 = vmatmul.msk.f32.gmra.mxu1 %vm287_vm3, %v2077_v16  ;;  %v2528_v53 = vpop.xlane.xlu2 %2527 }
 0xec5   :  { %3974 = vrcp.f32 %v2528_v53 }
 0xecb   :  { %v3975_v5 = vpop.eup %3974 }
 0xecc   :  { %v2531_v24 = vpop.xlane.xlu2 %2530  ;;  %v2540_v10 = vmul.f32 %v3975_v5, %v5375_v18 }
 0xecd   :  { %3976 = vrcp.f32 %v2531_v24 }
 0xece   :  { %3618 = vmatmul.msk.f32.gmra.mxu2 %vm340_vm4, %v2540_v10 }
 0xed3   :  { %v3977_v40 = vpop.eup %3976 }
 0xed4   :  { %v2541_v0 = vmul.f32 %v3977_v40, %v5379_v23 }
 0xed6   :  { %3619 = vmatmul.msk.f32.gmra.mxu2 %vm340_vm4, %v2541_v0 }
 0xee4   :  { %v2348_v14 = vpop.f32.mrf.mxu0 }
 0xee5   :  { %3600 = vmatmul.msk.f32.vlgmr.msra.gmra.mxu1 %vm287_vm3, %v2348_v14 }
 0xf11   :  { %v2351_v11 = vpop.f32.mrf.mxu0  ;;  %v2112_v23 = vpop.f32.mrf.mxu1 }
 0xf12   :  { %3601 = vmatmul.msk.f32.gmra.mxu1 %vm287_vm3, %v2351_v11  ;;  %v2160_v59 = vadd.f32 %v5237_v1, %v2112_v23 }
 0xf14   :  { %v2589_v33 = vpop.f32.mrf.mxu2 }
 0xf15   :  { %3620 = vmatmul.msk.f32.vlgmr.msrb.gmra.mxu0 %vm287_vm3, %v2589_v33 }
 0xf1c   :  { %v2592_v18 = vpop.f32.mrf.mxu2 }
 0xf1d   :  { %3621 = vmatmul.msk.f32.gmra.mxu0 %vm287_vm3, %v2592_v18 }
 0xf1e   :  { %v2354_v8 = vpop.f32.mrf.mxu0 }
 0xf1f   :  { %3602 = vmatmul.msk.f32.gmra.mxu1 %vm287_vm3, %v2354_v8  ;;  %v2815_v8 = vld [vmem:[#allocation8 + $0x38] sm:$0xff] }
 0xf20   :  { %2848 = vmatpush.msrb.mxu1 %v2815_v8 }
 0xf21   :  { %v2115_v37 = vpop.f32.mrf.mxu1 }
 0xf22   :  { %v2163_v42 = vadd.f32 %v5241_v43, %v2115_v37 }
 0xf24   :  { %v2595_v3 = vpop.f32.mrf.mxu2 }
 0xf25   :  { %3622 = vmatmul.msk.f32.gmra.mxu0 %vm287_vm3, %v2595_v3  ;;  %v2814_v3 = vld [vmem:[#allocation8 + $0x30] sm:$0xff] }
 0xf26   :  { %v2357_v62 = vpop.f32.mrf.mxu0  ;;  %2849 = vmatpush.msrb.mxu1 %v2814_v3 }
 0xf27   :  { %3603 = vmatmul.msk.f32.gmra.mxu1 %vm287_vm3, %v2357_v62  ;;  %v2813_v62 = vld [vmem:[#allocation8 + $0x28] sm:$0xff] }
 0xf28   :  { %2850 = vmatpush.msrb.mxu1 %v2813_v62 }
 0xf29   :  { %v2118_v52 = vpop.f32.mrf.mxu1 }
 0xf2a   :  { %v2166_v43 = vadd.f32 %v5243_v46, %v2118_v52 }
 0xf33   :  { %v2360_v45 = vpop.f32.mrf.mxu0 }
 0xf34   :  { %3604 = vmatmul.msk.f32.gmra.mxu1 %vm287_vm3, %v2360_v45 }
 0xf39   :  { %v2121_v35 = vpop.f32.mrf.mxu1 }
 0xf3a   :  { %v2169_v12 = vadd.f32 %v5245_v25, %v2121_v35 }
 0xf41   :  { %v2124_v26 = vpop.f32.mrf.mxu1 }
 0xf51   :  { %v2598_v41 = vpop.f32.mrf.mxu2 }
 0xf52   :  { %3623 = vmatmul.msk.f32.gmra.mxu0 %vm287_vm3, %v2598_v41  ;;  %v2812_v41 = vld [vmem:[#allocation8 + $0x20] sm:$0xff] }
 0xf53   :  { %2851 = vmatpush.msrb.mxu1 %v2812_v41 }
 0xf59   :  { %v2601_v44 = vpop.f32.mrf.mxu2 }
 0xf5a   :  { %3624 = vmatmul.msk.f32.gmra.mxu0 %vm287_vm3, %v2601_v44 }
 0xf62   :  { %v2395_v20 = vpop.f32.mrf.mxu1 }
 0xf63   :  { %v2410_v51 = vadd.f32 %v2395_v20, %v2160_v59 }
 0xf8f   :  { %v2398_v38 = vpop.f32.mrf.mxu1 }
 0xf90   :  { %v2411_v6 = vadd.f32 %v2398_v38, %v2163_v42 }
 0xf92   :  { %v2636_v54 = vpop.f32.mrf.mxu0 }
 0xf93   :  { %v2651_v21 = vadd.f32 %v2636_v54, %v2410_v51 }
 0xf95   :  { %v2661_v31 = vadd.f32 %v3785_v39, %v2651_v21 }
 0xf97   :  { %v5424_v22 = vadd.f32 %v2661_v31, %v4974_v47 }
 0xf99   :  { %v2675_v27 = vsel %vm220_vm2, %v5424_v22, 0.0  ;;  %v2695_v1 = vmul.f32 %v5424_v22, %v5424_v22 }
 0xf9a   :  { %v2639_v19 = vpop.f32.mrf.mxu0  ;;  %2676 = vadd.xlane.f32.xlu2 %v2675_v27 }
 0xf9b   :  { %v2652_v58 = vadd.f32 %v2639_v19, %v2411_v6  ;;  %v2700_v57 = vsel %vm220_vm2, %v2695_v1, 0.0 }
 0xf9c   :  { %2701 = vadd.xlane.f32.xlu1 %v2700_v57  ;;  %v2401_v15 = vpop.f32.mrf.mxu1 }
 0xf9d   :  { %v2662_v63 = vadd.f32 %v3785_v39, %v2652_v58  ;;  %v2412_v32 = vadd.f32 %v2401_v15, %v2166_v43 }
 0xf9f   :  { %v5433_v47 = vadd.f32 %v2662_v63, %v4985_v9 }
 0xfa1   :  { %v2678_v2 = vsel %vm220_vm2, %v5433_v47, 0.0  ;;  %v2696_v7 = vmul.f32 %v5433_v47, %v5433_v47 }
 0xfa2   :  { %v2642_v28 = vpop.f32.mrf.mxu0  ;;  %2679 = vadd.xlane.f32.xlu0 %v2678_v2 }
 0xfa3   :  { %v2653_v30 = vadd.f32 %v2642_v28, %v2412_v32  ;;  %v2703_v34 = vsel %vm220_vm2, %v2696_v7, 0.0 }
 0xfa4   :  { %2704 = vadd.xlane.f32.xlu2 %v2703_v34  ;;  %v2404_v49 = vpop.f32.mrf.mxu1 }
 0xfa5   :  { %v2663_v36 = vadd.f32 %v3785_v39, %v2653_v30  ;;  %v2413_v60 = vadd.f32 %v2404_v49, %v2169_v12  ;;  %v5476_v30 = vld [vmem:[%s5802_s11 + $0x1] ss:$0 sm:$0xff] }
 0xfa7   :  { %v5441_v48 = vadd.f32 %v2663_v36, %v4993_v17  ;;  %v2172_v17 = vadd.f32 %v5247_v50, %v2124_v26 }
 0xfa9   :  { %v2681_v9 = vsel %vm220_vm2, %v5441_v48, 0.0  ;;  %v2697_v46 = vmul.f32 %v5441_v48, %v5441_v48 }
 0xfaa   :  { %2682 = vadd.xlane.f32.xlu1 %v2681_v9  ;;  %v5481_v9 = vld [vmem:[%s5803_s12 + $0x1] ss:$0 sm:$0xff]  ;;  %s5850_s12 = sld [smem:[#allocation25_spill]] }
 0xfab   :  { %v2706_v4 = vsel %vm220_vm2, %v2697_v46, 0.0 }
 0xfac   :  { %2707 = vadd.xlane.f32.xlu0 %v2706_v4 }
 0xfb1   :  { %v2407_v5 = vpop.f32.mrf.mxu1 }
 0xfb2   :  { %v2414_v10 = vadd.f32 %v2407_v5, %v2172_v17 }
 0xfcf   :  { %v2645_v16 = vpop.f32.mrf.mxu0 }
 0xfd0   :  { %v2654_v53 = vadd.f32 %v2645_v16, %v2413_v60 }
 0xfd2   :  { %v2664_v29 = vadd.f32 %v3785_v39, %v2654_v53 }
 0xfd4   :  { %v5451_v24 = vadd.f32 %v2664_v29, %v5003_v55 }
 0xfd6   :  { %v2684_v40 = vsel %vm220_vm2, %v5451_v24, 0.0  ;;  %v2698_v0 = vmul.f32 %v5451_v24, %v5451_v24 }
 0xfd7   :  { %v2648_v14 = vpop.f32.mrf.mxu0  ;;  %2685 = vadd.xlane.f32.xlu2 %v2684_v40 }
 0xfd8   :  { %v2655_v25 = vadd.f32 %v2648_v14, %v2414_v10  ;;  %v2709_v61 = vsel %vm220_vm2, %v2698_v0, 0.0 }
 0xfd9   :  { %2710 = vadd.xlane.f32.xlu1 %v2709_v61 }
 0xfda   :  { %v2665_v11 = vadd.f32 %v3785_v39, %v2655_v25 }
 0xfdc   :  { %v5459_v33 = vadd.f32 %v2665_v11, %v5010_v56 }
 0xfde   :  { %v2687_v55 = vsel %vm220_vm2, %v5459_v33, 0.0  ;;  %v2699_v50 = vmul.f32 %v5459_v33, %v5459_v33 }
 0xfdf   :  { %2688 = vadd.xlane.f32.xlu0 %v2687_v55 }
 0xfe0   :  { %v2712_v18 = vsel %vm220_vm2, %v2699_v50, 0.0 }
 0xfe1   :  { %2713 = vadd.xlane.f32.xlu2 %v2712_v18 }
0x100d   :  { %v2677_v45 = vpop.xlane.xlu2 %2676 }
0x100e   :  { %v2690_v56 = vmul.f32 %v2677_v45, %v4815_v13 }
0x100f   :  { %v2702_v44 = vpop.xlane.xlu1 %2701 }
0x1010   :  { %v2725_v23 = vmul.f32 %v2690_v56, %v2690_v56  ;;  %v2715_v37 = vmul.f32 %v2702_v44, %v4815_v13  ;;  %v2720_v28 = vsub.f32 %v5424_v22, %v2690_v56 }
0x1012   :  { %v2730_v52 = vsub.f32 %v2715_v37, %v2725_v23  ;;  %v3641_v37 = vld [vmem:[%s5806_s15 + $0x78] sm:$0xff] }
0x1013   :  { %2910 = vmatpush.msrb.mxu3 %v3641_v37 }
0x1014   :  { %v2735_v35 = vadd.f32 1e-05, %v2730_v52  ;;  %v3640_v52 = vld [vmem:[%s5806_s15 + $0x70] sm:$0xff] }
0x1015   :  { %v2680_v26 = vpop.xlane.xlu0 %2679  ;;  %2911 = vmatpush.msrb.mxu3 %v3640_v52 }
0x1016   :  { %3978 = vrsqrt.f32 %v2735_v35  ;;  %v2691_v20 = vmul.f32 %v2680_v26, %v4815_v13  ;;  %vm2746_vm14 = vweird.f32 %v2735_v35 }
0x1017   :  { %v2705_v59 = vpop.xlane.xlu2 %2704 }
0x1018   :  { %v2726_v51 = vmul.f32 %v2691_v20, %v2691_v20  ;;  %v2716_v39 = vmul.f32 %v2705_v59, %v4815_v13  ;;  %v2721_v29 = vsub.f32 %v5433_v47, %v2691_v20  ;;  %v3639_v59 = vld [vmem:[%s5806_s15 + $0x68] sm:$0xff] }
0x1019   :  { %2912 = vmatpush.msrb.mxu3 %v3639_v59 }
0x101a   :  { %v2731_v54 = vsub.f32 %v2716_v39, %v2726_v51  ;;  %v3638_v39 = vld [vmem:[%s5806_s15 + $0x60] sm:$0xff] }
0x101b   :  { %2913 = vmatpush.msrb.mxu3 %v3638_v39 }
0x101c   :  { %v3979_v21 = vpop.eup %3978  ;;  %v2736_v31 = vadd.f32 1e-05, %v2731_v54 }
0x101d   :  { %v2741_v38 = vmul.f32 %v3979_v21, %v2735_v35  ;;  %v2683_v42 = vpop.xlane.xlu1 %2682  ;;  %vm2747_vm4 = vweird.f32 %v3979_v21 }
0x101e   :  { %3980 = vrsqrt.f32 %v2736_v31  ;;  %v2692_v6 = vmul.f32 %v2683_v42, %v4815_v13  ;;  %vm2748_vm15 = vmor %vm2746_vm14, %vm2747_vm4  ;;  %vm2756_vm5 = vweird.f32 %v2736_v31 }
0x101f   :  { %v2742_v27 = vmul.f32 %v3979_v21, %v2741_v38  ;;  %v2708_v1 = vpop.xlane.xlu0 %2707 }
0x1020   :  { %v2727_v19 = vmul.f32 %v2692_v6, %v2692_v6  ;;  %v2717_v58 = vmul.f32 %v2708_v1, %v4815_v13  ;;  %v2722_v11 = vsub.f32 %v5441_v48, %v2692_v6 }
0x1021   :  { %v2743_v57 = vmul.f32 0.5, %v2742_v27 }
0x1022   :  { %v2732_v63 = vsub.f32 %v2717_v58, %v2727_v19 }
0x1023   :  { %v2744_v15 = vsub.f32 1.5, %v2743_v57 }
0x1024   :  { %v3981_v43 = vpop.eup %3980  ;;  %v2737_v32 = vadd.f32 1e-05, %v2732_v63 }
0x1025   :  { %v2745_v2 = vmul.f32 %v3979_v21, %v2744_v15  ;;  %v2751_v7 = vmul.f32 %v3981_v43, %v2736_v31  ;;  %vm2757_vm1 = vweird.f32 %v3981_v43  ;;  %v3637_v31 = vld [vmem:[%s5806_s15 + $0x58] sm:$0xff] }
0x1026   :  { %3982 = vrsqrt.f32 %v2737_v32  ;;  %vm2758_vm6 = vmor %vm2756_vm5, %vm2757_vm1  ;;  %vm2766_vm8 = vweird.f32 %v2737_v32  ;;  %2914 = vmatpush.msrb.mxu3 %v3637_v31 }
0x1027   :  { %v2749_v34 = vsel %vm2748_vm15, %v3979_v21, %v2745_v2  ;;  %v2752_v36 = vmul.f32 %v3981_v43, %v2751_v7 }
0x1028   :  { %v2790_v46 = vmul.f32 %v2749_v34, %v2720_v28 }
0x1029   :  { %v2753_v4 = vmul.f32 0.5, %v2752_v36 }
0x102a   :  { %v2798_v49 = vmul.f32 %v5476_v30, %v2790_v46 }
0x102b   :  { %v2754_v12 = vsub.f32 1.5, %v2753_v4 }
0x102c   :  { %v3983_v22 = vpop.eup %3982  ;;  %v5485_v60 = vadd.f32 %v5481_v9, %v2798_v49 }
0x102d   :  { %v2755_v16 = vmul.f32 %v3981_v43, %v2754_v12  ;;  %v2761_v53 = vmul.f32 %v3983_v22, %v2737_v32  ;;  %vm2767_vm7 = vweird.f32 %v3983_v22  ;;  %v3636_v12 = vld [vmem:[%s5806_s15 + $0x50] sm:$0xff] }
0x102e   :  { %3629 = vmatmul.msk.f32.vlgmr.msrb.gmra.mxu1 %vm220_vm2, %v5485_v60  ;;  %vm2768_vm10 = vmor %vm2766_vm8, %vm2767_vm7  ;;  %2915 = vmatpush.msrb.mxu3 %v3636_v12 }
0x102f   :  { %v2759_v5 = vsel %vm2758_vm6, %v3981_v43, %v2755_v16  ;;  %v2762_v17 = vmul.f32 %v3983_v22, %v2761_v53 }
0x1030   :  { %v2791_v10 = vmul.f32 %v2759_v5, %v2721_v29 }
0x1031   :  { %v2763_v40 = vmul.f32 0.5, %v2762_v17 }
0x1032   :  { %v2799_v0 = vmul.f32 %v5476_v30, %v2791_v10 }
0x1033   :  { %v2764_v14 = vsub.f32 1.5, %v2763_v40 }
0x1034   :  { %v5492_v25 = vadd.f32 %v5481_v9, %v2799_v0 }
0x1035   :  { %v2765_v61 = vmul.f32 %v3983_v22, %v2764_v14 }
0x1036   :  { %3630 = vmatmul.msk.f32.gmra.mxu1 %vm220_vm2, %v5492_v25 }
0x1037   :  { %v2769_v47 = vsel %vm2768_vm10, %v3983_v22, %v2765_v61  ;;  %v3634_v22 = vld [vmem:[%s5806_s15 + $0x40] sm:$0xff] }
0x1038   :  { %v2792_v55 = vmul.f32 %v2769_v47, %v2722_v11 }
0x103a   :  { %v2800_v50 = vmul.f32 %v5476_v30, %v2792_v55 }
0x103c   :  { %v5499_v18 = vadd.f32 %v5481_v9, %v2800_v50 }
0x103e   :  { %3631 = vmatmul.msk.f32.gmra.mxu1 %vm220_vm2, %v5499_v18 }
0x104a   :  { %v2686_v8 = vpop.xlane.xlu2 %2685 }
0x104b   :  { %v2693_v3 = vmul.f32 %v2686_v8, %v4815_v13  ;;  %v3789_v8 = vld [vmem:[%s5807_s16 + $0x1] ss:$0 sm:$0xff]  ;;  %s5847_s16 = sld [smem:[#allocation17_spill]] }
0x104c   :  { %v2711_v62 = vpop.xlane.xlu1 %2710 }
0x104d   :  { %v2728_v45 = vmul.f32 %v2693_v3, %v2693_v3  ;;  %v2718_v48 = vmul.f32 %v2711_v62, %v4815_v13  ;;  %v2723_v57 = vsub.f32 %v5451_v24, %v2693_v3 }
0x104f   :  { %v2733_v41 = vsub.f32 %v2718_v48, %v2728_v45 }
0x1051   :  { %v2738_v56 = vadd.f32 1e-05, %v2733_v41 }
0x1052   :  { %v2689_v44 = vpop.xlane.xlu0 %2688 }
0x1053   :  { %3984 = vrsqrt.f32 %v2738_v56  ;;  %v2694_v23 = vmul.f32 %v2689_v44, %v4815_v13  ;;  %vm2776_vm12 = vweird.f32 %v2738_v56 }
0x1054   :  { %v2714_v35 = vpop.xlane.xlu2 %2713 }
0x1055   :  { %v2729_v26 = vmul.f32 %v2694_v23, %v2694_v23  ;;  %v2719_v20 = vmul.f32 %v2714_v35, %v4815_v13  ;;  %v2724_v36 = vsub.f32 %v5459_v33, %v2694_v23  ;;  %v3635_v33 = vld [vmem:[%s5806_s15 + $0x48] sm:$0xff] }
0x1056   :  { %2916 = vmatpush.msrb.mxu3 %v3635_v33 }
0x1057   :  { %v2734_v51 = vsub.f32 %v2719_v20, %v2729_v26 }
0x1058   :  { %2917 = vmatpush.msrb.mxu3 %v3634_v22 }
0x1059   :  { %v3985_v54 = vpop.eup %3984  ;;  %v2739_v21 = vadd.f32 1e-05, %v2734_v51 }
0x105a   :  { %v2771_v38 = vmul.f32 %v3985_v54, %v2738_v56  ;;  %vm2777_vm11 = vweird.f32 %v3985_v54 }
0x105b   :  { %3986 = vrsqrt.f32 %v2739_v21  ;;  %vm2778_vm13 = vmor %vm2776_vm12, %vm2777_vm11  ;;  %vm2786_vm14 = vweird.f32 %v2739_v21 }
0x105c   :  { %v2772_v42 = vmul.f32 %v3985_v54, %v2771_v38 }
0x105e   :  { %v2773_v6 = vmul.f32 0.5, %v2772_v42 }
0x1060   :  { %v2774_v27 = vsub.f32 1.5, %v2773_v6 }
0x1061   :  { %v3987_v1 = vpop.eup %3986 }
0x1062   :  { %v2775_v19 = vmul.f32 %v3985_v54, %v2774_v27  ;;  %v2781_v58 = vmul.f32 %v3987_v1, %v2739_v21  ;;  %vm2787_vm4 = vweird.f32 %v3987_v1 }
0x1063   :  { %vm2788_vm15 = vmor %vm2786_vm14, %vm2787_vm4 }
0x1064   :  { %v2779_v63 = vsel %vm2778_vm13, %v3985_v54, %v2775_v19  ;;  %v2782_v15 = vmul.f32 %v3987_v1, %v2781_v58 }
0x1065   :  { %v2793_v43 = vmul.f32 %v2779_v63, %v2723_v57 }
0x1066   :  { %v2783_v32 = vmul.f32 0.5, %v2782_v15 }
0x1067   :  { %v2801_v2 = vmul.f32 %v5476_v30, %v2793_v43 }
0x1068   :  { %v2784_v7 = vsub.f32 1.5, %v2783_v32 }
0x1069   :  { %v5525_v28 = vadd.f32 %v5481_v9, %v2801_v2 }
0x106a   :  { %v2785_v34 = vmul.f32 %v3987_v1, %v2784_v7 }
0x106b   :  { %3632 = vmatmul.msk.f32.gmra.mxu1 %vm220_vm2, %v5525_v28 }
0x106c   :  { %v2789_v24 = vsel %vm2788_vm15, %v3987_v1, %v2785_v34 }
0x106d   :  { %v2794_v46 = vmul.f32 %v2789_v24, %v2724_v36 }
0x106f   :  { %v2802_v4 = vmul.f32 %v5476_v30, %v2794_v46  ;;  %v3788_v30 = vld [vmem:[%s5805_s14 + $0x1] ss:$0 sm:$0xff] }
0x1071   :  { %v2810_v49 = vadd.f32 %v5481_v9, %v2802_v4 }
0x1073   :  { %3633 = vmatmul.msk.f32.gmra.mxu1 %vm220_vm2, %v2810_v49 }
0x10ab   :  { %v2853_v9 = vpop.f32.mrf.mxu1 }
0x10ac   :  { %v2854_v16 = vadd.f32 %v3788_v30, %v2853_v9 }
0x10ae   :  { %v2868_v53 = vmax.f32 %v2854_v16, 0.0 }
0x10b0   :  { %3643 = vmatmul.msk.f32.vlgmr.msrb.gmra.mxu3 %vm1454_vm9, %v2868_v53 }
0x10b3   :  { %v2856_v29 = vpop.f32.mrf.mxu1 }
0x10b4   :  { %v2857_v5 = vadd.f32 %v3788_v30, %v2856_v29 }
0x10b6   :  { %v2869_v17 = vmax.f32 %v2857_v5, 0.0 }
0x10b8   :  { %3644 = vmatmul.msk.f32.gmra.mxu3 %vm1454_vm9, %v2869_v17 }
0x10bb   :  { %v2859_v10 = vpop.f32.mrf.mxu1 }
0x10bc   :  { %v2860_v40 = vadd.f32 %v3788_v30, %v2859_v10 }
0x10be   :  { %v2870_v0 = vmax.f32 %v2860_v40, 0.0 }
0x10c0   :  { %3645 = vmatmul.msk.f32.gmra.mxu3 %vm1454_vm9, %v2870_v0 }
0x10e8   :  { %v2862_v14 = vpop.f32.mrf.mxu1 }
0x10e9   :  { %v2863_v61 = vadd.f32 %v3788_v30, %v2862_v14 }
0x10eb   :  { %v2871_v11 = vmax.f32 %v2863_v61, 0.0 }
0x10ed   :  { %3646 = vmatmul.msk.f32.gmra.mxu3 %vm1454_vm9, %v2871_v11 }
0x10f0   :  { %v2865_v47 = vpop.f32.mrf.mxu1 }
0x10f1   :  { %v2866_v55 = vadd.f32 %v3788_v30, %v2865_v47 }
0x10f3   :  { %v2872_v50 = vmax.f32 %v2866_v55, 0.0 }
0x10f5   :  { %3647 = vmatmul.msk.f32.gmra.mxu3 %vm1454_vm9, %v2872_v50 }
0x1133   :  { %v2919_v3 = vpop.f32.mrf.mxu3 }
0x1134   :  { %v2920_v62 = vadd.f32 %v3789_v8, %v2919_v3 }
0x1136   :  { %v5554_v45 = vadd.f32 %v2920_v62, %v5485_v60 }
0x1138   :  { %v2943_v48 = vsel %vm220_vm2, %v5554_v45, 0.0  ;;  %v2963_v26 = vmul.f32 %v5554_v45, %v5554_v45 }
0x1139   :  { %2944 = vadd.xlane.f32.xlu2 %v2943_v48 }
0x113b   :  { %v2922_v41 = vpop.f32.mrf.mxu3 }
0x113c   :  { %v2923_v56 = vadd.f32 %v3789_v8, %v2922_v41 }
0x113e   :  { %v5559_v44 = vadd.f32 %v2923_v56, %v5492_v25  ;;  %v2968_v25 = vsel %vm220_vm2, %v2963_v26, 0.0  ;;  %v5607_v56 = vld [vmem:[%s5809_s18 + $0x1] ss:$0 sm:$0xff]  ;;  %s5849_s18 = sld [smem:[#allocation26_spill]] }
0x1140   :  { %v2946_v23 = vsel %vm220_vm2, %v5559_v44, 0.0  ;;  %v2964_v37 = vmul.f32 %v5559_v44, %v5559_v44 }
0x1141   :  { %2947 = vadd.xlane.f32.xlu1 %v2946_v23 }
0x1142   :  { %v2971_v52 = vsel %vm220_vm2, %v2964_v37, 0.0 }
0x1143   :  { %v2925_v60 = vpop.f32.mrf.mxu3  ;;  %2972 = vadd.xlane.f32.xlu0 %v2971_v52 }
0x1144   :  { %v2926_v35 = vadd.f32 %v3789_v8, %v2925_v60 }
0x1146   :  { %v5569_v20 = vadd.f32 %v2926_v35, %v5499_v18 }
0x1148   :  { %v2965_v59 = vmul.f32 %v5569_v20, %v5569_v20  ;;  %v2949_v39 = vsel %vm220_vm2, %v5569_v20, 0.0 }
0x1149   :  { %2969 = vadd.xlane.f32.xlu1 %v2968_v25 }
0x114a   :  { %v2974_v51 = vsel %vm220_vm2, %v2965_v59, 0.0 }
0x114b   :  { %2975 = vadd.xlane.f32.xlu2 %v2974_v51  ;;  %2950 = vadd.xlane.f32.xlu0 %v2949_v39 }
0x1170   :  { %v2928_v54 = vpop.f32.mrf.mxu3 }
0x1171   :  { %v2929_v21 = vadd.f32 %v3789_v8, %v2928_v54 }
0x1173   :  { %v5578_v31 = vadd.f32 %v2929_v21, %v5525_v28 }
0x1175   :  { %v2952_v18 = vsel %vm220_vm2, %v5578_v31, 0.0  ;;  %v2966_v58 = vmul.f32 %v5578_v31, %v5578_v31 }
0x1176   :  { %2953 = vadd.xlane.f32.xlu2 %v2952_v18 }
0x1177   :  { %v2977_v57 = vsel %vm220_vm2, %v2966_v58, 0.0 }
0x1178   :  { %v2931_v38 = vpop.f32.mrf.mxu3 }
0x1179   :  { %v2932_v42 = vadd.f32 %v3789_v8, %v2931_v38  ;;  %v5602_v8 = vld [vmem:[%s5808_s17 + $0x1] ss:$0 sm:$0xff] }
0x117b   :  { %v5582_v6 = vadd.f32 %v2932_v42, %v2810_v49 }
0x117d   :  { %v2955_v27 = vsel %vm220_vm2, %v5582_v6, 0.0  ;;  %v2967_v1 = vmul.f32 %v5582_v6, %v5582_v6 }
0x117e   :  { %2956 = vadd.xlane.f32.xlu1 %v2955_v27 }
0x117f   :  { %v2980_v19 = vsel %vm220_vm2, %v2967_v1, 0.0 }
0x1180   :  { %2981 = vadd.xlane.f32.xlu0 %v2980_v19 }
0x1186   :  { %2978 = vadd.xlane.f32.xlu1 %v2977_v57 }
0x11ac   :  { %v2945_v43 = vpop.xlane.xlu2 %2944 }
0x11ad   :  { %v2958_v28 = vmul.f32 %v2945_v43, %v4815_v13 }
0x11af   :  { %v2993_v46 = vmul.f32 %v2958_v28, %v2958_v28  ;;  %v2988_v35 = vsub.f32 %v5554_v45, %v2958_v28 }
0x11b4   :  { %v2948_v63 = vpop.xlane.xlu1 %2947 }
0x11b5   :  { %v2959_v15 = vmul.f32 %v2948_v63, %v4815_v13 }
0x11b6   :  { %v2973_v32 = vpop.xlane.xlu0 %2972 }
0x11b7   :  { %v2994_v2 = vmul.f32 %v2959_v15, %v2959_v15  ;;  %v2984_v7 = vmul.f32 %v2973_v32, %v4815_v13  ;;  %v2989_v50 = vsub.f32 %v5559_v44, %v2959_v15 }
0x11b9   :  { %v2999_v34 = vsub.f32 %v2984_v7, %v2994_v2 }
0x11bb   :  { %v3004_v36 = vadd.f32 1e-05, %v2999_v34 }
0x11bc   :  { %v2970_v24 = vpop.xlane.xlu1 %2969 }
0x11bd   :  { %3988 = vrsqrt.f32 %v3004_v36  ;;  %v2983_v4 = vmul.f32 %v2970_v24, %v4815_v13  ;;  %vm3024_vm1 = vweird.f32 %v3004_v36 }
0x11be   :  { %v2951_v49 = vpop.xlane.xlu0 %2950  ;;  %v2976_v12 = vpop.xlane.xlu2 %2975 }
0x11bf   :  { %v2998_v33 = vsub.f32 %v2983_v4, %v2993_v46  ;;  %v2960_v22 = vmul.f32 %v2951_v49, %v4815_v13  ;;  %v2985_v16 = vmul.f32 %v2976_v12, %v4815_v13 }
0x11c1   :  { %v3003_v30 = vadd.f32 1e-05, %v2998_v33  ;;  %v2995_v9 = vmul.f32 %v2960_v22, %v2960_v22  ;;  %v2990_v18 = vsub.f32 %v5569_v20, %v2960_v22 }
0x11c3   :  { %v3989_v53 = vpop.eup %3988  ;;  %3990 = vrsqrt.f32 %v3003_v30  ;;  %v3000_v29 = vsub.f32 %v2985_v16, %v2995_v9  ;;  %vm3014_vm7 = vweird.f32 %v3003_v30 }
0x11c4   :  { %v3019_v5 = vmul.f32 %v3989_v53, %v3004_v36  ;;  %vm3025_vm9 = vweird.f32 %v3989_v53 }
0x11c5   :  { %v3005_v17 = vadd.f32 1e-05, %v3000_v29  ;;  %vm3026_vm5 = vmor %vm3024_vm1, %vm3025_vm9 }
0x11c6   :  { %v3020_v10 = vmul.f32 %v3989_v53, %v3019_v5 }
0x11c7   :  { %3992 = vrsqrt.f32 %v3005_v17  ;;  %vm3034_vm11 = vweird.f32 %v3005_v17 }
0x11c8   :  { %v3021_v40 = vmul.f32 0.5, %v3020_v10 }
0x11c9   :  { %v3991_v0 = vpop.eup %3990 }
0x11ca   :  { %v3022_v14 = vsub.f32 1.5, %v3021_v40  ;;  %v3009_v61 = vmul.f32 %v3991_v0, %v3003_v30  ;;  %vm3015_vm6 = vweird.f32 %v3991_v0 }
0x11cb   :  { %vm3016_vm8 = vmor %vm3014_vm7, %vm3015_vm6 }
0x11cc   :  { %v3023_v11 = vmul.f32 %v3989_v53, %v3022_v14  ;;  %v3010_v47 = vmul.f32 %v3991_v0, %v3009_v61 }
0x11cd   :  { %v3993_v55 = vpop.eup %3992 }
0x11ce   :  { %v3027_v3 = vsel %vm3026_vm5, %v3989_v53, %v3023_v11  ;;  %v3011_v62 = vmul.f32 0.5, %v3010_v47  ;;  %v3029_v48 = vmul.f32 %v3993_v55, %v3005_v17  ;;  %vm3035_vm10 = vweird.f32 %v3993_v55 }
0x11cf   :  { %v3059_v41 = vmul.f32 %v3027_v3, %v2989_v50  ;;  %vm3036_vm12 = vmor %vm3034_vm11, %vm3035_vm10 }
0x11d0   :  { %v3012_v23 = vsub.f32 1.5, %v3011_v62  ;;  %v3030_v37 = vmul.f32 %v3993_v55, %v3029_v48 }
0x11d1   :  { %v3067_v44 = vmul.f32 %v5602_v8, %v3059_v41 }
0x11d2   :  { %v3013_v52 = vmul.f32 %v3991_v0, %v3012_v23  ;;  %v3031_v60 = vmul.f32 0.5, %v3030_v37 }
0x11d3   :  { %v5612_v26 = vadd.f32 %v5607_v56, %v3067_v44 }
0x11d4   :  { %v3017_v25 = vsel %vm3016_vm8, %v3991_v0, %v3013_v52  ;;  %v3032_v59 = vsub.f32 1.5, %v3031_v60 }
0x11d5   :  { %v3084_v51 = vsel %vm220_vm2, %v5612_v26, 0.0  ;;  %v3102_v39 = vmul.f32 %v5612_v26, %v5612_v26  ;;  %v3058_v54 = vmul.f32 %v3017_v25, %v2988_v35 }
0x11d6   :  { %v3033_v21 = vmul.f32 %v3993_v55, %v3032_v59  ;;  %3085 = vadd.xlane.f32.xlu0 %v3084_v51  ;;  %v3653_v51 = vld [vmem:[%s5812_s21 + $0x38] sm:$0xff] }
0x11d7   :  { %v3109_v45 = vsel %vm220_vm2, %v3102_v39, 0.0  ;;  %v3066_v38 = vmul.f32 %v5602_v8, %v3058_v54  ;;  %3241 = vmatpush.msrb.mxu2 %v3653_v51  ;;  %v3650_v54 = vld [vmem:[%s5812_s21 + $0x20] sm:$0xff] }
0x11d8   :  { %v3037_v42 = vsel %vm3036_vm12, %v3993_v55, %v3033_v21  ;;  %3110 = vadd.xlane.f32.xlu2 %v3109_v45  ;;  %v3220_v45 = vld [vmem:[%s5812_s21 + $0x18] sm:$0xff] }
0x11d9   :  { %v5622_v27 = vadd.f32 %v5607_v56, %v3066_v38  ;;  %v3060_v1 = vmul.f32 %v3037_v42, %v2990_v18 }
0x11db   :  { %v3081_v19 = vsel %vm220_vm2, %v5622_v27, 0.0  ;;  %v3101_v58 = vmul.f32 %v5622_v27, %v5622_v27  ;;  %v3068_v57 = vmul.f32 %v5602_v8, %v3060_v1  ;;  %v3219_v1 = vld [vmem:[%s5812_s21 + $0x10] sm:$0xff] }
0x11dc   :  { %3082 = vadd.xlane.f32.xlu1 %v3081_v19 }
0x11dd   :  { %v3106_v20 = vsel %vm220_vm2, %v3101_v58, 0.0  ;;  %v5631_v63 = vadd.f32 %v5607_v56, %v3068_v57  ;;  %v3218_v57 = vld [vmem:[%s5812_s21 + $0x8] sm:$0xff] }
0x11de   :  { %3107 = vadd.xlane.f32.xlu0 %v3106_v20 }
0x11df   :  { %v3087_v15 = vsel %vm220_vm2, %v5631_v63, 0.0  ;;  %v3103_v43 = vmul.f32 %v5631_v63, %v5631_v63 }
0x11e0   :  { %3088 = vadd.xlane.f32.xlu2 %v3087_v15 }
0x11e1   :  { %v3112_v32 = vsel %vm220_vm2, %v3103_v43, 0.0 }
0x11e4   :  { %3113 = vadd.xlane.f32.xlu1 %v3112_v32  ;;  %v3217_v32 = vld [vmem:[%s5812_s21] sm:$0xff] }
0x11e9   :  { %v2954_v28 = vpop.xlane.xlu2 %2953 }
0x11ea   :  { %v2961_v46 = vmul.f32 %v2954_v28, %v4815_v13 }
0x11ec   :  { %v2996_v33 = vmul.f32 %v2961_v46, %v2961_v46  ;;  %v2991_v48 = vsub.f32 %v5578_v31, %v2961_v46 }
0x11f1   :  { %v2957_v2 = vpop.xlane.xlu1 %2956 }
0x11f2   :  { %v2962_v7 = vmul.f32 %v2957_v2, %v4815_v13 }
0x11f3   :  { %v2982_v34 = vpop.xlane.xlu0 %2981 }
0x11f4   :  { %v2997_v36 = vmul.f32 %v2962_v7, %v2962_v7  ;;  %v2987_v24 = vmul.f32 %v2982_v34, %v4815_v13  ;;  %v2992_v61 = vsub.f32 %v5582_v6, %v2962_v7 }
0x11f6   :  { %v3002_v4 = vsub.f32 %v2987_v24, %v2997_v36 }
0x11f8   :  { %v3007_v49 = vadd.f32 1e-05, %v3002_v4 }
0x11f9   :  { %v2979_v12 = vpop.xlane.xlu1 %2978 }
0x11fa   :  { %3994 = vrsqrt.f32 %v3007_v49  ;;  %v2986_v22 = vmul.f32 %v2979_v12, %v4815_v13  ;;  %vm3054_vm4 = vweird.f32 %v3007_v49 }
0x11fc   :  { %v3001_v30 = vsub.f32 %v2986_v22, %v2996_v33 }
0x11fe   :  { %v3006_v9 = vadd.f32 1e-05, %v3001_v30 }
0x1200   :  { %v3995_v16 = vpop.eup %3994  ;;  %3996 = vrsqrt.f32 %v3006_v9  ;;  %vm3044_vm9 = vweird.f32 %v3006_v9 }
0x1201   :  { %v3049_v53 = vmul.f32 %v3995_v16, %v3007_v49  ;;  %vm3055_vm13 = vweird.f32 %v3995_v16 }
0x1202   :  { %vm3056_vm14 = vmor %vm3054_vm4, %vm3055_vm13 }
0x1203   :  { %v3050_v29 = vmul.f32 %v3995_v16, %v3049_v53 }
0x1205   :  { %v3051_v5 = vmul.f32 0.5, %v3050_v29 }
0x1206   :  { %v3997_v17 = vpop.eup %3996 }
0x1207   :  { %v3052_v10 = vsub.f32 1.5, %v3051_v5  ;;  %v3039_v40 = vmul.f32 %v3997_v17, %v3006_v9  ;;  %vm3045_vm15 = vweird.f32 %v3997_v17 }
0x1208   :  { %vm3046_vm1 = vmor %vm3044_vm9, %vm3045_vm15 }
0x1209   :  { %v3053_v0 = vmul.f32 %v3995_v16, %v3052_v10  ;;  %v3040_v14 = vmul.f32 %v3997_v17, %v3039_v40  ;;  %v5696_v40 = vld [vmem:[%s5810_s19] ss:$0 sm:$0xff] }
0x120b   :  { %v3057_v11 = vsel %vm3056_vm14, %v3995_v16, %v3053_v0  ;;  %v3041_v47 = vmul.f32 0.5, %v3040_v14  ;;  %vm3372_vm14 = vcmask 162816  }
0x120c   :  { %v3062_v55 = vmul.f32 %v3057_v11, %v2992_v61  ;;  %v5701_v11 = vld [vmem:[%s5811_s20] ss:$0 sm:$0xff]  ;;  %s5846_s20 = sld [smem:[#allocation15_spill]] }
0x120d   :  { %v3042_v50 = vsub.f32 1.5, %v3041_v47 }
0x120e   :  { %v3070_v3 = vmul.f32 %v5602_v8, %v3062_v55 }
0x120f   :  { %v3043_v62 = vmul.f32 %v3997_v17, %v3042_v50 }
0x1210   :  { %v5646_v41 = vadd.f32 %v5607_v56, %v3070_v3 }
0x1211   :  { %v3047_v23 = vsel %vm3046_vm1, %v3997_v17, %v3043_v62 }
0x1212   :  { %v3093_v6 = vsel %vm220_vm2, %v5646_v41, 0.0  ;;  %v3105_v37 = vmul.f32 %v5646_v41, %v5646_v41  ;;  %v3061_v44 = vmul.f32 %v3047_v23, %v2991_v48 }
0x1213   :  { %3094 = vadd.xlane.f32.xlu0 %v3093_v6  ;;  %v3659_v6 = vld [vmem:[%s5812_s21 + $0x58] sm:$0xff] }
0x1214   :  { %v3118_v52 = vsel %vm220_vm2, %v3105_v37, 0.0  ;;  %v3069_v60 = vmul.f32 %v5602_v8, %v3061_v44  ;;  %v3652_v8 = vld [vmem:[%s5812_s21 + $0x30] sm:$0xff] }
0x1215   :  { %3119 = vadd.xlane.f32.xlu2 %v3118_v52  ;;  %3242 = vmatpush.msrb.mxu2 %v3652_v8 }
0x1216   :  { %v5655_v31 = vadd.f32 %v5607_v56, %v3069_v60  ;;  %v3651_v56 = vld [vmem:[%s5812_s21 + $0x28] sm:$0xff]  ;;  %v3658_v60 = vld [vmem:[%s5812_s21 + $0x50] sm:$0xff] }
0x1217   :  { %3243 = vmatpush.msrb.mxu2 %v3651_v56  ;;  %v3656_v56 = vld [vmem:[%s5812_s21 + $0x40] sm:$0xff] }
0x1218   :  { %v3090_v35 = vsel %vm220_vm2, %v5655_v31, 0.0  ;;  %v3104_v25 = vmul.f32 %v5655_v31, %v5655_v31 }
0x1219   :  { %3091 = vadd.xlane.f32.xlu1 %v3090_v35  ;;  %3244 = vmatpush.msrb.mxu2 %v3650_v54 }
0x121a   :  { %v3115_v59 = vsel %vm220_vm2, %v3104_v25, 0.0 }
0x121b   :  { %3116 = vadd.xlane.f32.xlu0 %v3115_v59  ;;  %3264 = vmatpush.msra.mxu2 %v3220_v45  ;;  %v3657_v59 = vld [vmem:[%s5812_s21 + $0x48] sm:$0xff] }
0x121d   :  { %3265 = vmatpush.msra.mxu2 %v3219_v1 }
0x121f   :  { %3266 = vmatpush.msra.mxu2 %v3218_v57 }
0x1221   :  { %3267 = vmatpush.msra.mxu2 %v3217_v32 }
0x1249   :  { %v3086_v39 = vpop.xlane.xlu0 %3085 }
0x124a   :  { %v3097_v21 = vmul.f32 %v3086_v39, %v4815_v13 }
0x124b   :  { %v3111_v18 = vpop.xlane.xlu2 %3110 }
0x124c   :  { %v3132_v38 = vmul.f32 %v3097_v21, %v3097_v21  ;;  %v3122_v42 = vmul.f32 %v3111_v18, %v4815_v13  ;;  %v3127_v10 = vsub.f32 %v5612_v26, %v3097_v21 }
0x124e   :  { %v3137_v19 = vsub.f32 %v3122_v42, %v3132_v38  ;;  %v3668_v38 = vld [vmem:[%s5812_s21 + $0x90] sm:$0xff]  ;;  %v3667_v42 = vld [vmem:[%s5812_s21 + $0x88] sm:$0xff] }
0x124f   :  { %v3083_v58 = vpop.xlane.xlu1 %3082 }
0x1250   :  { %v3142_v20 = vadd.f32 1e-05, %v3137_v19  ;;  %v3096_v15 = vmul.f32 %v3083_v58, %v4815_v13  ;;  %v3664_v19 = vld [vmem:[%s5812_s21 + $0x78] sm:$0xff]  ;;  %v3666_v58 = vld [vmem:[%s5812_s21 + $0x80] sm:$0xff] }
0x1251   :  { %v3108_v43 = vpop.xlane.xlu0 %3107  ;;  %3321 = vmatpush.msra.mxu0 %v3664_v19 }
0x1252   :  { %3998 = vrsqrt.f32 %v3142_v20  ;;  %v3131_v2 = vmul.f32 %v3096_v15, %v3096_v15  ;;  %v3121_v7 = vmul.f32 %v3108_v43, %v4815_v13  ;;  %vm3162_vm6 = vweird.f32 %v3142_v20 }
0x1253   :  { %v3089_v28 = vpop.xlane.xlu2 %3088  ;;  %v3126_v37 = vsub.f32 %v5622_v27, %v3096_v15  ;;  %v3663_v15 = vld [vmem:[%s5812_s21 + $0x70] sm:$0xff] }
0x1254   :  { %v3098_v34 = vmul.f32 %v3089_v28, %v4815_v13  ;;  %v3136_v36 = vsub.f32 %v3121_v7, %v3131_v2  ;;  %3322 = vmatpush.msra.mxu0 %v3663_v15  ;;  %v3662_v2 = vld [vmem:[%s5812_s21 + $0x68] sm:$0xff] }
0x1256   :  { %v3141_v24 = vadd.f32 1e-05, %v3136_v36  ;;  %v3133_v49 = vmul.f32 %v3098_v34, %v3098_v34  ;;  %v3128_v8 = vsub.f32 %v5631_v63, %v3098_v34  ;;  %v3669_v63 = vld [vmem:[%s5812_s21 + $0x98] sm:$0xff]  ;;  %3323 = vmatpush.msra.mxu0 %v3662_v2  ;;  %v3367_v34 = vld [vmem:[%s5814_s23 + $0x10] sm:$0xf]  ;;  %v3661_v36 = vld [vmem:[%s5812_s21 + $0x60] sm:$0xff] }
0x1257   :  { %v3114_v46 = vpop.xlane.xlu1 %3113  ;;  %3671 = vmatpush.msk.msra.mxu1 %vm176_vm0, %v3367_v34 }
0x1258   :  { %v3999_v4 = vpop.eup %3998  ;;  %v3123_v12 = vmul.f32 %v3114_v46, %v4815_v13  ;;  %4000 = vrsqrt.f32 %v3141_v24  ;;  %vm3152_vm10 = vweird.f32 %v3141_v24  ;;  %3324 = vmatpush.msra.mxu0 %v3661_v36 }
0x1259   :  { %v3157_v33 = vmul.f32 %v3999_v4, %v3142_v20  ;;  %vm3163_vm5 = vweird.f32 %v3999_v4 }
0x125a   :  { %v3138_v22 = vsub.f32 %v3123_v12, %v3133_v49  ;;  %vm3164_vm7 = vmor %vm3162_vm6, %vm3163_vm5  ;;  %v3366_v49 = vld [vmem:[%s5814_s23 + $0x8] sm:$0xff]  ;;  %v3365_v12 = vld [vmem:[%s5814_s23] sm:$0xff] }
0x125b   :  { %v3158_v30 = vmul.f32 %v3999_v4, %v3157_v33  ;;  %3393 = vmatpush.msra.mxu1 %v3366_v49 }
0x125c   :  { %v3143_v9 = vadd.f32 1e-05, %v3138_v22  ;;  %v3364_v22 = vld [vmem:[%s5846_s20] sm:$0xff] }
0x125d   :  { %v3159_v16 = vmul.f32 0.5, %v3158_v30  ;;  %v4159_v30 = vmov 0   ;;  %3394 = vmatpush.msra.mxu1 %v3365_v12 }
0x125e   :  { %4002 = vrsqrt.f32 %v3143_v9  ;;  %v4001_v53 = vpop.eup %4000  ;;  %vm3172_vm13 = vweird.f32 %v3143_v9  ;;  %3774 = vset.pattern.permute.xlu1 %v4159_v30  ;;  %3773 = vset.pattern.permute.xlu2 %v4159_v30 }
0x125f   :  { %v3160_v29 = vsub.f32 1.5, %v3159_v16  ;;  %v3147_v5 = vmul.f32 %v4001_v53, %v3141_v24  ;;  %vm3153_vm8 = vweird.f32 %v4001_v53  ;;  %v3399_v16 = vld [vmem:[%s5848_s29] sm:$0xff]  ;;  %3672 = vmatmul.msk.f32.vlgmr.msra.gmra.mxu1 %vm3372_vm14, %v3364_v22  ;;  %3775 = vset.pattern.permute.xlu0 %v4159_v30 }
0x1260   :  { %vm3154_vm11 = vmor %vm3152_vm10, %vm3153_vm8  ;;  %3402 = vperm.xlu2 %3773, %v3399_v16  }
0x1261   :  { %v3161_v17 = vmul.f32 %v3999_v4, %v3160_v29  ;;  %v3148_v0 = vmul.f32 %v4001_v53, %v3147_v5 }
0x1263   :  { %v3165_v14 = vsel %vm3164_vm7, %v3999_v4, %v3161_v17  ;;  %v3149_v55 = vmul.f32 0.5, %v3148_v0 }
0x1264   :  { %v4003_v61 = vpop.eup %4002  ;;  %v3197_v47 = vmul.f32 %v3165_v14, %v3127_v10 }
0x1265   :  { %v3167_v50 = vmul.f32 %v4003_v61, %v3143_v9  ;;  %v3150_v26 = vsub.f32 1.5, %v3149_v55  ;;  %vm3173_vm12 = vweird.f32 %v4003_v61  ;;  %v3407_v9 = vld [vmem:[%s5847_s16] sm:$0xff] }
0x1266   :  { %v3205_v3 = vmul.f32 %v5696_v40, %v3197_v47  ;;  %vm3174_vm4 = vmor %vm3172_vm13, %vm3173_vm12  ;;  %3410 = vperm.xlu1 %3774, %v3407_v9  }
0x1267   :  { %v3168_v62 = vmul.f32 %v4003_v61, %v3167_v50  ;;  %v3151_v23 = vmul.f32 %v4001_v53, %v3150_v26 }
0x1268   :  { %v3213_v48 = vadd.f32 %v5701_v11, %v3205_v3 }
0x1269   :  { %v3169_v44 = vmul.f32 0.5, %v3168_v62  ;;  %v3155_v52 = vsel %vm3154_vm11, %v4001_v53, %v3151_v23 }
0x126a   :  { %3654 = vmatmul.msk.f32.vlgmr.msrb.gmra.mxu2 %vm220_vm2, %v3213_v48  ;;  %v3196_v35 = vmul.f32 %v3155_v52, %v3126_v37 }
0x126b   :  { %v3170_v25 = vsub.f32 1.5, %v3169_v44  ;;  %3292 = vmatpush.msrb.mxu2 %v3659_v6 }
0x126c   :  { %v3204_v51 = vmul.f32 %v5696_v40, %v3196_v35 }
0x126d   :  { %v3171_v27 = vmul.f32 %v4003_v61, %v3170_v25  ;;  %3293 = vmatpush.msrb.mxu2 %v3658_v60 }
0x126e   :  { %v3212_v54 = vadd.f32 %v5701_v11, %v3204_v51 }
0x126f   :  { %v3175_v39 = vsel %vm3174_vm4, %v4003_v61, %v3171_v27  ;;  %3294 = vmatpush.msrb.mxu2 %v3657_v59 }
0x1270   :  { %v3198_v21 = vmul.f32 %v3175_v39, %v3128_v8 }
0x1271   :  { %3295 = vmatpush.msrb.mxu2 %v3656_v56 }
0x1272   :  { %3655 = vmatmul.msk.f32.vlgmr.msra.gmra.mxu2 %vm220_vm2, %v3212_v54  ;;  %v3206_v18 = vmul.f32 %v5696_v40, %v3198_v21  ;;  %v3795_v21 = vld [vmem:[%s5850_s12] ss:$0 sm:$0xff] }
0x1273   :  { %3350 = vmatpush.msra.mxu2 %v3669_v63 }
0x1274   :  { %v3214_v45 = vadd.f32 %v5701_v11, %v3206_v18 }
0x1275   :  { %3351 = vmatpush.msra.mxu2 %v3668_v38 }
0x1277   :  { %3352 = vmatpush.msra.mxu2 %v3667_v42 }
0x1279   :  { %3353 = vmatpush.msra.mxu2 %v3666_v58 }
0x127a   :  { %3660 = vmatmul.msk.f32.vlgmr.msrb.gmra.mxu2 %vm220_vm2, %v3214_v45 }
0x1286   :  { %v3095_v1 = vpop.xlane.xlu0 %3094 }
0x1287   :  { %v3100_v57 = vmul.f32 %v3095_v1, %v4815_v13 }
0x1288   :  { %v3120_v20 = vpop.xlane.xlu2 %3119 }
0x1289   :  { %v3135_v43 = vmul.f32 %v3100_v57, %v3100_v57  ;;  %v3125_v32 = vmul.f32 %v3120_v20, %v4815_v13 }
0x128b   :  { %v3140_v7 = vsub.f32 %v3125_v32, %v3135_v43 }
0x128c   :  { %v3092_v28 = vpop.xlane.xlu1 %3091 }
0x128d   :  { %v3145_v24 = vadd.f32 1e-05, %v3140_v7  ;;  %v3099_v46 = vmul.f32 %v3092_v28, %v4815_v13 }
0x128e   :  { %v3117_v4 = vpop.xlane.xlu0 %3116 }
0x128f   :  { %4004 = vrsqrt.f32 %v3145_v24  ;;  %v3134_v33 = vmul.f32 %v3099_v46, %v3099_v46  ;;  %v3124_v53 = vmul.f32 %v3117_v4, %v4815_v13  ;;  %vm3192_vm15 = vweird.f32 %v3145_v24 }
0x1290   :  { %v3130_v13 = vsub.f32 %v5646_v41, %v3100_v57  ;;  %v3129_v52 = vsub.f32 %v5655_v31, %v3099_v46  ;;  %v3794_v31 = vld [vmem:[%s5849_s18] ss:$0 sm:$0xff] }
0x1291   :  { %v3139_v29 = vsub.f32 %v3124_v53, %v3134_v33 }
0x1293   :  { %v3144_v5 = vadd.f32 1e-05, %v3139_v29 }
0x1295   :  { %v4005_v17 = vpop.eup %4004  ;;  %4006 = vrsqrt.f32 %v3144_v5  ;;  %vm3182_vm5 = vweird.f32 %v3144_v5 }
0x1296   :  { %v3187_v10 = vmul.f32 %v4005_v17, %v3145_v24  ;;  %vm3193_vm0 = vweird.f32 %v4005_v17 }
0x1297   :  { %vm3194_vm9 = vmor %vm3192_vm15, %vm3193_vm0 }
0x1298   :  { %v3188_v0 = vmul.f32 %v4005_v17, %v3187_v10 }
0x129a   :  { %v3189_v14 = vmul.f32 0.5, %v3188_v0 }
0x129b   :  { %v4007_v61 = vpop.eup %4006 }
0x129c   :  { %v3190_v47 = vsub.f32 1.5, %v3189_v14  ;;  %v3177_v55 = vmul.f32 %v4007_v61, %v3144_v5  ;;  %vm3183_vm1 = vweird.f32 %v4007_v61 }
0x129d   :  { %vm3184_vm6 = vmor %vm3182_vm5, %vm3183_vm1 }
0x129e   :  { %v3191_v50 = vmul.f32 %v4005_v17, %v3190_v47  ;;  %v3178_v3 = vmul.f32 %v4007_v61, %v3177_v55 }
0x12a0   :  { %v3195_v26 = vsel %vm3194_vm9, %v4005_v17, %v3191_v50  ;;  %v3179_v48 = vmul.f32 0.5, %v3178_v3 }
0x12a1   :  { %v3200_v62 = vmul.f32 %v3195_v26, %v3130_v13 }
0x12a2   :  { %v3180_v6 = vsub.f32 1.5, %v3179_v48 }
0x12a3   :  { %v3208_v23 = vmul.f32 %v5696_v40, %v3200_v62 }
0x12a4   :  { %v3181_v44 = vmul.f32 %v4007_v61, %v3180_v6 }
0x12a5   :  { %v3216_v37 = vadd.f32 %v5701_v11, %v3208_v23 }
0x12a6   :  { %v3185_v60 = vsel %vm3184_vm6, %v4007_v61, %v3181_v44 }
0x12a7   :  { %3670 = vmatmul.msk.f32.vlgmr.msra.gmra.mxu2 %vm220_vm2, %v3216_v37  ;;  %v3199_v41 = vmul.f32 %v3185_v60, %v3129_v52 }
0x12a9   :  { %v3207_v35 = vmul.f32 %v5696_v40, %v3199_v41 }
0x12ab   :  { %v3215_v25 = vadd.f32 %v5701_v11, %v3207_v35 }
0x12ad   :  { %3665 = vmatmul.msk.f32.vlgmr.msra.gmra.mxu0 %vm220_vm2, %v3215_v25 }
0x12ba   :  { %v3403_v45 = vpop.permute.xlu2 %3402 }
0x12d8   :  { %v3411_v1 = vpop.permute.xlu1 %3410 }
0x12dc   :  { %v3396_v18 = vpop.f32.mrf.mxu1 }
0x12dd   :  { %v3397_v63 = vadd.f32 %v3794_v31, %v3396_v18 }
0x12ed   :  { %v3246_v59 = vpop.f32.mrf.mxu2 }
0x12f5   :  { %v3269_v51 = vpop.f32.mrf.mxu2 }
0x12f6   :  { %v3270_v8 = vadd.f32 %v3269_v51, %v3246_v59 }
0x12fd   :  { %v3297_v27 = vpop.f32.mrf.mxu2 }
0x12fe   :  { %v3300_v56 = vadd.f32 %v3297_v27, %v3270_v8 }
0x132a   :  { %v3326_v39 = vpop.f32.mrf.mxu0  ;;  %v3355_v40 = vpop.f32.mrf.mxu2 }
0x132b   :  { %v3329_v54 = vadd.f32 %v3326_v39, %v3300_v56 }
0x132d   :  { %v3358_v11 = vadd.f32 %v3355_v40, %v3329_v54 }
0x132f   :  { %v3363_v38 = vadd.f32 %v3795_v21, %v3358_v11 }
0x1331   :  { %v3405_v42 = vmul.f32 %v3403_v45, %v3363_v38 }
0x1333   :  { %v3406_v19 = vadd.f32 %v3405_v42, %v3397_v63 }
0x1335   :  { %v3413_v58 = vadd.f32 %v3411_v1, %v3406_v19 }
0x1337   :  { %3414 = vst.msk [vmem:[#allocation10] sm:$0xff] %vm287_vm3, %v3413_v58 }
0x1338   :  { %3425 = dma.vmem_to_hbm [thread:$0]  %s3421_s7, 128, %s3423_s3, [#allocation4]  }
0x1339   :  { %4139 = dma.done.wait [#allocation4], 128  }
0x133a   :  { %4140 = vsyncadd [#allocation4], 4294967168 }
0x133b   :  { %3430 = vsyncpa [#allocation3], 1 }
0x133c   :  { %3431 = vsyncpa [#allocation6], 1 }
0x133d   :  { %3432 = vsyncpa [#allocation9], 1 }
0x133e   :  { %3433 = vsyncpa [#allocation4], 1 }

</bundles_post_ra>
